<compile_context>
chip_gen: v7x
topology: tpu7x:2x2x1
jax: 0.10.0
libtpu: 0.0.40
codegen_flags: <defaults>
</compile_context>

<pallas_src>
import jax
import jax.numpy as jnp
import numpy as np
from jax.experimental import pallas as pl
from jax.experimental.pallas import tpu as pltpu

BN_EPS = 1e-5


def _frelu_kernel(x_ref, w_ref, g_ref, b_ref, o_ref, xpad_ref):
    """FReLU on one channels-last block.

    x_ref    : VMEM (B, H, W, cb)      input block (channels on lanes)
    w_ref    : VMEM (3, 3, cb)         depthwise 3x3 taps, per channel
    g_ref    : VMEM (1, cb)            BN gamma
    b_ref    : VMEM (1, cb)            BN beta
    o_ref    : VMEM (B, H, W, cb)      output block
    xpad_ref : VMEM (B, H+2, W+2, cb)  zero-halo scratch
    """
    B, H, W, cb = x_ref.shape
    f32 = jnp.float32

    # Zero only the 1-pixel halo border; the interior is overwritten right after.
    # (Re-done every grid step so the kernel stays correct when the 'parallel'
    # channel axis is sharded across TensorCores — the border is tiny.)
    zrow = jnp.zeros((B, 1, W + 2, cb), xpad_ref.dtype)
    zcol = jnp.zeros((B, H + 2, 1, cb), xpad_ref.dtype)
    xpad_ref[:, 0:1, :, :] = zrow
    xpad_ref[:, H + 1:H + 2, :, :] = zrow
    xpad_ref[:, :, 0:1, :] = zcol
    xpad_ref[:, :, W + 1:W + 2, :] = zcol
    # TODO(synk): DMA from HBM directly into this interior window instead of the
    # VMEM->VMEM copy (memory_space=pl.ANY + make_async_copy double-buffer).
    xpad_ref[:, 1:H + 1, 1:W + 1, :] = x_ref[...].astype(xpad_ref.dtype)

    # Depthwise 3x3 conv as 9 shifted multiply-accumulates.  Channels stay on
    # the lane axis, so each tap is one per-lane-weighted MAC over the whole
    # block; dy shifts are leading-dim offsets, dx shifts are sublane offsets.
    # The conv bias is omitted: training-mode BN subtracts the per-channel mean,
    # which cancels it exactly.
    acc = None
    x_c = None
    for dy in range(3):
        for dx in range(3):
            tap = xpad_ref[:, dy:dy + H, dx:dx + W, :].astype(f32)
            if dy == 1 and dx == 1:
                x_c = tap                               # center tap == the input
            wk = w_ref[dy, dx, :].astype(f32)           # (cb,) lane vector
            contrib = tap * wk
            acc = contrib if acc is None else acc + contrib

    # BatchNorm2d (training-mode stats over (B, H, W) per channel), single pass:
    # var = E[x^2] - mean^2, f32 accumulation, clamped at 0 for safety.
    inv_n = 1.0 / (B * H * W)
    s1 = jnp.sum(acc, axis=(0, 1, 2), keepdims=True)
    s2 = jnp.sum(acc * acc, axis=(0, 1, 2), keepdims=True)
    mean = s1 * inv_n
    var = jnp.maximum(s2 * inv_n - mean * mean, 0.0)
    scale = g_ref[...].reshape(1, 1, 1, cb).astype(f32) * jax.lax.rsqrt(var + BN_EPS)
    shift = b_ref[...].reshape(1, 1, 1, cb).astype(f32) - mean * scale
    y = acc * scale + shift

    # Funnel ReLU: elementwise max with the input.
    o_ref[...] = jnp.maximum(x_c, y).astype(o_ref.dtype)


def _vmem_config():
    """Returns (c_blk sizing budget, vmem_limit_bytes, prefer >=2 grid steps)."""
    try:
        cap = int(pltpu.get_tpu_info().vmem_capacity_bytes)
    except Exception:
        cap = 64 * 1024 * 1024            # conservative fallback (v7x-class per-TC)
    if cap >= 100 * 1024 * 1024:
        # 128 MiB parts (v5e / v6e): single TensorCore, use the big VMEM.
        return 88 * 1024 * 1024, min(104 * 1024 * 1024, cap), False
    # 64 MiB-per-TC parts (v7x-class): leave headroom and keep >= 2 grid steps
    # so the 'parallel' channel axis can shard across the 2 TensorCores.
    return 40 * 1024 * 1024, min(52 * 1024 * 1024, cap), True


def _pick_channel_block(B, C, H, W, x_itemsize, scratch_itemsize, budget,
                        prefer_multi_step):
    """Largest channel block (divisor of C, and either == C or a multiple of 128
    so the lane dim of every BlockSpec stays legal) whose *physically padded*
    VMEM footprint fits the budget."""

    def rup(n, m):
        return ((n + m - 1) // m) * m

    def sublane(itemsize):
        return 8 if itemsize >= 4 else 16          # f32 pads to 8 rows, bf16 to 16

    def footprint(cb):
        lanes = rup(cb, 128)                       # channel axis sits on lanes
        io = B * H * rup(W, sublane(x_itemsize)) * lanes * x_itemsize
        halo = (B * (H + 2) * rup(W + 2, sublane(scratch_itemsize))
                * lanes * scratch_itemsize)
        wts = 3 * rup(3, 8) * lanes * 4
        vec = rup(1, 8) * lanes * 4
        # 2x double-buffered input + 2x double-buffered output + halo scratch
        # + small double-buffered params, plus ~1 MiB Mosaic-internal slack.
        return 4 * io + halo + 2 * (wts + 2 * vec) + (1 << 20)

    cands = [d for d in range(1, C + 1)
             if C % d == 0 and (d == C or d % 128 == 0)]
    fitting = [d for d in cands if footprint(d) <= budget]
    if not fitting:
        # TODO(synk): two-phase BN (sum/sumsq accumulation over an extra
        # 'arbitrary' grid axis + a normalize/max sweep) for per-channel slabs
        # too large to hold resident in VMEM.
        return min(cands)
    if prefer_multi_step:
        multi = [d for d in fitting if C // d >= 2]
        if multi:
            return max(multi)
    return max(fitting)


def frelu_forward(x, conv_w, conv_b, bn_gamma, bn_beta):
    """x: (B, C, H, W); conv_w: (C, 1, 3, 3) depthwise; conv_b/gamma/beta: (C,)."""
    B, C, H, W = x.shape
    assert conv_w.shape == (C, 1, 3, 3), "FReLU uses a 3x3 depthwise conv (padding=1)"
    # conv_b is intentionally unused inside the kernel: training-mode BatchNorm
    # subtracts the per-channel mean, which cancels the conv bias exactly.
    del conv_b

    # Channels-last at the kernel boundary (channels on the lane axis).
    # TODO(synk): fold these transposes into neighboring ops / keep the model NHWC.
    x_t = jnp.transpose(x, (0, 2, 3, 1))                               # (B, H, W, C)
    w_t = jnp.transpose(conv_w.reshape(C, 3, 3).astype(jnp.float32),
                        (1, 2, 0))                                     # (3, 3, C)
    gamma = bn_gamma.reshape(1, C).astype(jnp.float32)
    beta = bn_beta.reshape(1, C).astype(jnp.float32)

    # bf16 inputs keep the halo scratch in bf16 (halves scratch VMEM / copy bytes);
    # everything else stages the halo in f32.  Math is always f32.
    scratch_dtype = jnp.bfloat16 if x.dtype == jnp.bfloat16 else jnp.float32

    budget, vmem_limit, prefer_multi = _vmem_config()
    c_blk = _pick_channel_block(B, C, H, W, x.dtype.itemsize,
                                jnp.dtype(scratch_dtype).itemsize,
                                budget, prefer_multi)

    out_t = pl.pallas_call(
        _frelu_kernel,
        out_shape=jax.ShapeDtypeStruct((B, H, W, C), x.dtype),
        grid_spec=pltpu.PrefetchScalarGridSpec(
            num_scalar_prefetch=0,
            grid=(C // c_blk,),
            in_specs=[
                pl.BlockSpec((B, H, W, c_blk), lambda c: (0, 0, 0, c)),   # x
                pl.BlockSpec((3, 3, c_blk), lambda c: (0, 0, c)),         # taps
                pl.BlockSpec((1, c_blk), lambda c: (0, c)),               # gamma
                pl.BlockSpec((1, c_blk), lambda c: (0, c)),               # beta
            ],
            out_specs=pl.BlockSpec((B, H, W, c_blk), lambda c: (0, 0, 0, c)),
            scratch_shapes=[pltpu.VMEM((B, H + 2, W + 2, c_blk), scratch_dtype)],
        ),
        compiler_params=pltpu.CompilerParams(
            dimension_semantics=("parallel",),
            vmem_limit_bytes=vmem_limit,
        ),
    )(x_t, w_t, gamma, beta)

    return jnp.transpose(out_t, (0, 3, 1, 2))


def frelu_reference(x, conv_w, conv_b, bn_gamma, bn_beta):
    """Pure-JAX reference (matches PyTorch FReLU forward in train mode)."""
    C = x.shape[1]
    xf = x.astype(jnp.float32)
    y = jax.lax.conv_general_dilated(
        xf, conv_w.astype(jnp.float32),
        window_strides=(1, 1), padding=((1, 1), (1, 1)),
        dimension_numbers=("NCHW", "OIHW", "NCHW"),
        feature_group_count=C)
    y = y + conv_b[None, :, None, None]
    mean = jnp.mean(y, axis=(0, 2, 3), keepdims=True)
    var = jnp.mean((y - mean) ** 2, axis=(0, 2, 3), keepdims=True)
    y = (y - mean) * jax.lax.rsqrt(var + BN_EPS)
    y = y * bn_gamma[None, :, None, None] + bn_beta[None, :, None, None]
    return jnp.maximum(xf, y).astype(x.dtype)


if __name__ == "__main__":
    B, C, H, W = 2, 4, 16, 16
    key = jax.random.PRNGKey(0)
    kx, kw, kb = jax.random.split(key, 3)

    x = jax.random.normal(kx, (B, C, H, W), dtype=jnp.float32)

    # Deterministic parameter init (shapes from FReLU.__init__):
    #   depthwise conv: weight (C, 1, 3, 3), bias (C,)  [~ PyTorch default bounds]
    #   BatchNorm2d:    gamma = ones(C), beta = zeros(C)
    fan_in = 1 * 3 * 3
    bound = 1.0 / np.sqrt(fan_in)
    conv_w = jax.random.uniform(kw, (C, 1, 3, 3), jnp.float32, -bound, bound)
    conv_b = jax.random.uniform(kb, (C,), jnp.float32, -bound, bound)
    bn_gamma = jnp.ones((C,), jnp.float32)
    bn_beta = jnp.zeros((C,), jnp.float32)

    out = frelu_forward(x, conv_w, conv_b, bn_gamma, bn_beta)
    out = jax.block_until_ready(out)

    ref = frelu_reference(x, conv_w, conv_b, bn_gamma, bn_beta)
    np.testing.assert_allclose(np.asarray(out), np.asarray(ref), rtol=1e-4, atol=1e-4)

    print("KERNEL_OK")
</pallas_src>

<mosaic_0001>
module attributes {stable_mosaic.version = 11 : i64} {
  func.func @_frelu_kernel(%arg0: i32, %arg1: memref<2x16x16x4xf32, #tpu.memory_space<vmem>>, %arg2: memref<3x3x4xf32, #tpu.memory_space<vmem>>, %arg3: memref<1x4xf32, #tpu.memory_space<vmem>>, %arg4: memref<1x4xf32, #tpu.memory_space<vmem>>, %arg5: memref<2x16x16x4xf32, #tpu.memory_space<vmem>>, %arg6: memref<2x18x18x4xf32, #tpu.memory_space<vmem>>) attributes {dimension_semantics = [#tpu.dimension_semantics<parallel>], iteration_bounds = array<i64: 1>, scalar_prefetch = 0 : i64, scratch_operands = 1 : i64, tpu.core_type = #tpu.core_type<tc>, window_params = [{transform_indices = @transform_0, window_bounds = array<i64: 2, 16, 16, 4>}, {transform_indices = @transform_1, window_bounds = array<i64: 3, 3, 4>}, {transform_indices = @transform_2, window_bounds = array<i64: 1, 4>}, {transform_indices = @transform_3, window_bounds = array<i64: 1, 4>}, {transform_indices = @transform_4, window_bounds = array<i64: 2, 16, 16, 4>}]} {
    %cst = arith.constant 0.000000e+00 : f32
    %0 = vector.broadcast %cst : f32 to vector<2x1x18x4xf32>
    %cst_0 = arith.constant 0.000000e+00 : f32
    %1 = vector.broadcast %cst_0 : f32 to vector<2x18x1x4xf32>
    %c0 = arith.constant 0 : index
    %c0_1 = arith.constant 0 : index
    %c0_2 = arith.constant 0 : index
    %c0_3 = arith.constant 0 : index
    %2 = vector.load %arg6[%c0, %c0_1, %c0_2, %c0_3] : memref<2x18x18x4xf32, #tpu.memory_space<vmem>>, vector<2x1x18x4xf32>
    tpu.vector_store %arg6[%c0, %c0_1, %c0_2, %c0_3], %0 {strides = array<i32>} : memref<2x18x18x4xf32, #tpu.memory_space<vmem>>, vector<2x1x18x4xf32>,
    %c0_4 = arith.constant 0 : index
    %c17 = arith.constant 17 : index
    %c0_5 = arith.constant 0 : index
    %c0_6 = arith.constant 0 : index
    %3 = vector.load %arg6[%c0_4, %c17, %c0_5, %c0_6] : memref<2x18x18x4xf32, #tpu.memory_space<vmem>>, vector<2x1x18x4xf32>
    tpu.vector_store %arg6[%c0_4, %c17, %c0_5, %c0_6], %0 {strides = array<i32>} : memref<2x18x18x4xf32, #tpu.memory_space<vmem>>, vector<2x1x18x4xf32>,
    %c0_7 = arith.constant 0 : index
    %c0_8 = arith.constant 0 : index
    %c0_9 = arith.constant 0 : index
    %c0_10 = arith.constant 0 : index
    %4 = vector.load %arg6[%c0_7, %c0_8, %c0_9, %c0_10] : memref<2x18x18x4xf32, #tpu.memory_space<vmem>>, vector<2x18x1x4xf32>
    tpu.vector_store %arg6[%c0_7, %c0_8, %c0_9, %c0_10], %1 {strides = array<i32>} : memref<2x18x18x4xf32, #tpu.memory_space<vmem>>, vector<2x18x1x4xf32>,
    %c0_11 = arith.constant 0 : index
    %c0_12 = arith.constant 0 : index
    %c17_13 = arith.constant 17 : index
    %c0_14 = arith.constant 0 : index
    %5 = vector.load %arg6[%c0_11, %c0_12, %c17_13, %c0_14] : memref<2x18x18x4xf32, #tpu.memory_space<vmem>>, vector<2x18x1x4xf32>
    tpu.vector_store %arg6[%c0_11, %c0_12, %c17_13, %c0_14], %1 {strides = array<i32>} : memref<2x18x18x4xf32, #tpu.memory_space<vmem>>, vector<2x18x1x4xf32>,
    %c0_15 = arith.constant 0 : index
    %c0_16 = arith.constant 0 : index
    %c0_17 = arith.constant 0 : index
    %c0_18 = arith.constant 0 : index
    %6 = vector.load %arg1[%c0_15, %c0_16, %c0_17, %c0_18] : memref<2x16x16x4xf32, #tpu.memory_space<vmem>>, vector<2x16x16x4xf32>
    %c0_19 = arith.constant 0 : index
    %c1 = arith.constant 1 : index
    %c1_20 = arith.constant 1 : index
    %c0_21 = arith.constant 0 : index
    %7 = vector.load %arg6[%c0_19, %c1, %c1_20, %c0_21] : memref<2x18x18x4xf32, #tpu.memory_space<vmem>>, vector<2x16x16x4xf32>
    tpu.vector_store %arg6[%c0_19, %c1, %c1_20, %c0_21], %6 {strides = array<i32>} : memref<2x18x18x4xf32, #tpu.memory_space<vmem>>, vector<2x16x16x4xf32>,
    %c0_22 = arith.constant 0 : index
    %c0_23 = arith.constant 0 : index
    %c0_24 = arith.constant 0 : index
    %c0_25 = arith.constant 0 : index
    %8 = vector.load %arg6[%c0_22, %c0_23, %c0_24, %c0_25] : memref<2x18x18x4xf32, #tpu.memory_space<vmem>>, vector<2x16x16x4xf32>
    %c0_26 = arith.constant 0 : index
    %c0_27 = arith.constant 0 : index
    %c0_28 = arith.constant 0 : index
    %9 = vector.load %arg2[%c0_26, %c0_27, %c0_28] : memref<3x3x4xf32, #tpu.memory_space<vmem>>, vector<1x1x4xf32>
    %10 = vector.shape_cast %9 : vector<1x1x4xf32> to vector<4xf32>
    %11 = vector.shape_cast %10 : vector<4xf32> to vector<1x1x1x4xf32>
    %12 = vector.broadcast %11 : vector<1x1x1x4xf32> to vector<2x16x16x4xf32>
    %13 = arith.mulf %8, %12 : vector<2x16x16x4xf32>
    %c0_29 = arith.constant 0 : index
    %c0_30 = arith.constant 0 : index
    %c1_31 = arith.constant 1 : index
    %c0_32 = arith.constant 0 : index
    %14 = vector.load %arg6[%c0_29, %c0_30, %c1_31, %c0_32] : memref<2x18x18x4xf32, #tpu.memory_space<vmem>>, vector<2x16x16x4xf32>
    %c0_33 = arith.constant 0 : index
    %c1_34 = arith.constant 1 : index
    %c0_35 = arith.constant 0 : index
    %15 = vector.load %arg2[%c0_33, %c1_34, %c0_35] : memref<3x3x4xf32, #tpu.memory_space<vmem>>, vector<1x1x4xf32>
    %16 = vector.shape_cast %15 : vector<1x1x4xf32> to vector<4xf32>
    %17 = vector.shape_cast %16 : vector<4xf32> to vector<1x1x1x4xf32>
    %18 = vector.broadcast %17 : vector<1x1x1x4xf32> to vector<2x16x16x4xf32>
    %19 = arith.mulf %14, %18 : vector<2x16x16x4xf32>
    %20 = arith.addf %13, %19 : vector<2x16x16x4xf32>
    %c0_36 = arith.constant 0 : index
    %c0_37 = arith.constant 0 : index
    %c2 = arith.constant 2 : index
    %c0_38 = arith.constant 0 : index
    %21 = vector.load %arg6[%c0_36, %c0_37, %c2, %c0_38] : memref<2x18x18x4xf32, #tpu.memory_space<vmem>>, vector<2x16x16x4xf32>
    %c0_39 = arith.constant 0 : index
    %c2_40 = arith.constant 2 : index
    %c0_41 = arith.constant 0 : index
    %22 = vector.load %arg2[%c0_39, %c2_40, %c0_41] : memref<3x3x4xf32, #tpu.memory_space<vmem>>, vector<1x1x4xf32>
    %23 = vector.shape_cast %22 : vector<1x1x4xf32> to vector<4xf32>
    %24 = vector.shape_cast %23 : vector<4xf32> to vector<1x1x1x4xf32>
    %25 = vector.broadcast %24 : vector<1x1x1x4xf32> to vector<2x16x16x4xf32>
    %26 = arith.mulf %21, %25 : vector<2x16x16x4xf32>
    %27 = arith.addf %20, %26 : vector<2x16x16x4xf32>
    %c0_42 = arith.constant 0 : index
    %c1_43 = arith.constant 1 : index
    %c0_44 = arith.constant 0 : index
    %c0_45 = arith.constant 0 : index
    %28 = vector.load %arg6[%c0_42, %c1_43, %c0_44, %c0_45] : memref<2x18x18x4xf32, #tpu.memory_space<vmem>>, vector<2x16x16x4xf32>
    %c1_46 = arith.constant 1 : index
    %c0_47 = arith.constant 0 : index
    %c0_48 = arith.constant 0 : index
    %29 = vector.load %arg2[%c1_46, %c0_47, %c0_48] : memref<3x3x4xf32, #tpu.memory_space<vmem>>, vector<1x1x4xf32>
    %30 = vector.shape_cast %29 : vector<1x1x4xf32> to vector<4xf32>
    %31 = vector.shape_cast %30 : vector<4xf32> to vector<1x1x1x4xf32>
    %32 = vector.broadcast %31 : vector<1x1x1x4xf32> to vector<2x16x16x4xf32>
    %33 = arith.mulf %28, %32 : vector<2x16x16x4xf32>
    %34 = arith.addf %27, %33 : vector<2x16x16x4xf32>
    %c0_49 = arith.constant 0 : index
    %c1_50 = arith.constant 1 : index
    %c1_51 = arith.constant 1 : index
    %c0_52 = arith.constant 0 : index
    %35 = vector.load %arg6[%c0_49, %c1_50, %c1_51, %c0_52] : memref<2x18x18x4xf32, #tpu.memory_space<vmem>>, vector<2x16x16x4xf32>
    %c1_53 = arith.constant 1 : index
    %c1_54 = arith.constant 1 : index
    %c0_55 = arith.constant 0 : index
    %36 = vector.load %arg2[%c1_53, %c1_54, %c0_55] : memref<3x3x4xf32, #tpu.memory_space<vmem>>, vector<1x1x4xf32>
    %37 = vector.shape_cast %36 : vector<1x1x4xf32> to vector<4xf32>
    %38 = vector.shape_cast %37 : vector<4xf32> to vector<1x1x1x4xf32>
    %39 = vector.broadcast %38 : vector<1x1x1x4xf32> to vector<2x16x16x4xf32>
    %40 = arith.mulf %35, %39 : vector<2x16x16x4xf32>
    %41 = arith.addf %34, %40 : vector<2x16x16x4xf32>
    %c0_56 = arith.constant 0 : index
    %c1_57 = arith.constant 1 : index
    %c2_58 = arith.constant 2 : index
    %c0_59 = arith.constant 0 : index
    %42 = vector.load %arg6[%c0_56, %c1_57, %c2_58, %c0_59] : memref<2x18x18x4xf32, #tpu.memory_space<vmem>>, vector<2x16x16x4xf32>
    %c1_60 = arith.constant 1 : index
    %c2_61 = arith.constant 2 : index
    %c0_62 = arith.constant 0 : index
    %43 = vector.load %arg2[%c1_60, %c2_61, %c0_62] : memref<3x3x4xf32, #tpu.memory_space<vmem>>, vector<1x1x4xf32>
    %44 = vector.shape_cast %43 : vector<1x1x4xf32> to vector<4xf32>
    %45 = vector.shape_cast %44 : vector<4xf32> to vector<1x1x1x4xf32>
    %46 = vector.broadcast %45 : vector<1x1x1x4xf32> to vector<2x16x16x4xf32>
    %47 = arith.mulf %42, %46 : vector<2x16x16x4xf32>
    %48 = arith.addf %41, %47 : vector<2x16x16x4xf32>
    %c0_63 = arith.constant 0 : index
    %c2_64 = arith.constant 2 : index
    %c0_65 = arith.constant 0 : index
    %c0_66 = arith.constant 0 : index
    %49 = vector.load %arg6[%c0_63, %c2_64, %c0_65, %c0_66] : memref<2x18x18x4xf32, #tpu.memory_space<vmem>>, vector<2x16x16x4xf32>
    %c2_67 = arith.constant 2 : index
    %c0_68 = arith.constant 0 : index
    %c0_69 = arith.constant 0 : index
    %50 = vector.load %arg2[%c2_67, %c0_68, %c0_69] : memref<3x3x4xf32, #tpu.memory_space<vmem>>, vector<1x1x4xf32>
    %51 = vector.shape_cast %50 : vector<1x1x4xf32> to vector<4xf32>
    %52 = vector.shape_cast %51 : vector<4xf32> to vector<1x1x1x4xf32>
    %53 = vector.broadcast %52 : vector<1x1x1x4xf32> to vector<2x16x16x4xf32>
    %54 = arith.mulf %49, %53 : vector<2x16x16x4xf32>
    %55 = arith.addf %48, %54 : vector<2x16x16x4xf32>
    %c0_70 = arith.constant 0 : index
    %c2_71 = arith.constant 2 : index
    %c1_72 = arith.constant 1 : index
    %c0_73 = arith.constant 0 : index
    %56 = vector.load %arg6[%c0_70, %c2_71, %c1_72, %c0_73] : memref<2x18x18x4xf32, #tpu.memory_space<vmem>>, vector<2x16x16x4xf32>
    %c2_74 = arith.constant 2 : index
    %c1_75 = arith.constant 1 : index
    %c0_76 = arith.constant 0 : index
    %57 = vector.load %arg2[%c2_74, %c1_75, %c0_76] : memref<3x3x4xf32, #tpu.memory_space<vmem>>, vector<1x1x4xf32>
    %58 = vector.shape_cast %57 : vector<1x1x4xf32> to vector<4xf32>
    %59 = vector.shape_cast %58 : vector<4xf32> to vector<1x1x1x4xf32>
    %60 = vector.broadcast %59 : vector<1x1x1x4xf32> to vector<2x16x16x4xf32>
    %61 = arith.mulf %56, %60 : vector<2x16x16x4xf32>
    %62 = arith.addf %55, %61 : vector<2x16x16x4xf32>
    %c0_77 = arith.constant 0 : index
    %c2_78 = arith.constant 2 : index
    %c2_79 = arith.constant 2 : index
    %c0_80 = arith.constant 0 : index
    %63 = vector.load %arg6[%c0_77, %c2_78, %c2_79, %c0_80] : memref<2x18x18x4xf32, #tpu.memory_space<vmem>>, vector<2x16x16x4xf32>
    %c2_81 = arith.constant 2 : index
    %c2_82 = arith.constant 2 : index
    %c0_83 = arith.constant 0 : index
    %64 = vector.load %arg2[%c2_81, %c2_82, %c0_83] : memref<3x3x4xf32, #tpu.memory_space<vmem>>, vector<1x1x4xf32>
    %65 = vector.shape_cast %64 : vector<1x1x4xf32> to vector<4xf32>
    %66 = vector.shape_cast %65 : vector<4xf32> to vector<1x1x1x4xf32>
    %67 = vector.broadcast %66 : vector<1x1x1x4xf32> to vector<2x16x16x4xf32>
    %68 = arith.mulf %63, %67 : vector<2x16x16x4xf32>
    %69 = arith.addf %62, %68 : vector<2x16x16x4xf32>
    %cst_84 = arith.constant dense<0.000000e+00> : vector<4xf32>
    %70 = vector.multi_reduction <add>, %69, %cst_84 [0, 1, 2] : vector<2x16x16x4xf32> to vector<4xf32>
    %71 = vector.shape_cast %70 : vector<4xf32> to vector<1x1x1x4xf32>
    %72 = arith.mulf %69, %69 : vector<2x16x16x4xf32>
    %cst_85 = arith.constant dense<0.000000e+00> : vector<4xf32>
    %73 = vector.multi_reduction <add>, %72, %cst_85 [0, 1, 2] : vector<2x16x16x4xf32> to vector<4xf32>
    %74 = vector.shape_cast %73 : vector<4xf32> to vector<1x1x1x4xf32>
    %cst_86 = arith.constant 0.001953125 : f32
    %75 = vector.broadcast %cst_86 : f32 to vector<1x1x1x4xf32>
    %76 = arith.mulf %71, %75 : vector<1x1x1x4xf32>
    %cst_87 = arith.constant 0.001953125 : f32
    %77 = vector.broadcast %cst_87 : f32 to vector<1x1x1x4xf32>
    %78 = arith.mulf %74, %77 : vector<1x1x1x4xf32>
    %79 = arith.mulf %76, %76 : vector<1x1x1x4xf32>
    %80 = arith.subf %78, %79 : vector<1x1x1x4xf32>
    %cst_88 = arith.constant 0.000000e+00 : f32
    %81 = vector.broadcast %cst_88 : f32 to vector<1x1x1x4xf32>
    %82 = arith.maximumf %80, %81 : vector<1x1x1x4xf32>
    %c0_89 = arith.constant 0 : index
    %c0_90 = arith.constant 0 : index
    %83 = vector.load %arg3[%c0_89, %c0_90] : memref<1x4xf32, #tpu.memory_space<vmem>>, vector<1x4xf32>
    %84 = vector.shape_cast %83 : vector<1x4xf32> to vector<1x1x1x4xf32>
    %cst_91 = arith.constant 9.99999974E-6 : f32
    %85 = vector.broadcast %cst_91 : f32 to vector<1x1x1x4xf32>
    %86 = arith.addf %82, %85 : vector<1x1x1x4xf32>
    %87 = math.rsqrt %86 : vector<1x1x1x4xf32>
    %88 = arith.mulf %84, %87 : vector<1x1x1x4xf32>
    %c0_92 = arith.constant 0 : index
    %c0_93 = arith.constant 0 : index
    %89 = vector.load %arg4[%c0_92, %c0_93] : memref<1x4xf32, #tpu.memory_space<vmem>>, vector<1x4xf32>
    %90 = vector.shape_cast %89 : vector<1x4xf32> to vector<1x1x1x4xf32>
    %91 = arith.mulf %76, %88 : vector<1x1x1x4xf32>
    %92 = arith.subf %90, %91 : vector<1x1x1x4xf32>
    %93 = vector.broadcast %88 : vector<1x1x1x4xf32> to vector<2x16x16x4xf32>
    %94 = arith.mulf %69, %93 : vector<2x16x16x4xf32>
    %95 = vector.broadcast %92 : vector<1x1x1x4xf32> to vector<2x16x16x4xf32>
    %96 = arith.addf %94, %95 : vector<2x16x16x4xf32>
    %97 = arith.maximumf %35, %96 : vector<2x16x16x4xf32>
    %c0_94 = arith.constant 0 : index
    %c0_95 = arith.constant 0 : index
    %c0_96 = arith.constant 0 : index
    %c0_97 = arith.constant 0 : index
    %98 = vector.load %arg5[%c0_94, %c0_95, %c0_96, %c0_97] : memref<2x16x16x4xf32, #tpu.memory_space<vmem>>, vector<2x16x16x4xf32>
    tpu.vector_store %arg5[%c0_94, %c0_95, %c0_96, %c0_97], %97 {strides = array<i32>} : memref<2x16x16x4xf32, #tpu.memory_space<vmem>>, vector<2x16x16x4xf32>,
    return
  }
  func.func @transform_0(%arg0: i32) -> (i32, i32, i32, i32) {
    %c0_i32 = arith.constant 0 : i32
    %c0_i32_0 = arith.constant 0 : i32
    %c0_i32_1 = arith.constant 0 : i32
    %c0_i32_2 = arith.constant 0 : i32
    return %c0_i32, %c0_i32_0, %c0_i32_1, %arg0 : i32, i32, i32, i32
  }
  func.func @transform_1(%arg0: i32) -> (i32, i32, i32) {
    %c0_i32 = arith.constant 0 : i32
    %c0_i32_0 = arith.constant 0 : i32
    %c0_i32_1 = arith.constant 0 : i32
    return %c0_i32, %c0_i32_0, %arg0 : i32, i32, i32
  }
  func.func @transform_2(%arg0: i32) -> (i32, i32) {
    %c0_i32 = arith.constant 0 : i32
    %c0_i32_0 = arith.constant 0 : i32
    return %c0_i32, %arg0 : i32, i32
  }
  func.func @transform_3(%arg0: i32) -> (i32, i32) {
    %c0_i32 = arith.constant 0 : i32
    %c0_i32_0 = arith.constant 0 : i32
    return %c0_i32, %arg0 : i32, i32
  }
  func.func @transform_4(%arg0: i32) -> (i32, i32, i32, i32) {
    %c0_i32 = arith.constant 0 : i32
    %c0_i32_0 = arith.constant 0 : i32
    %c0_i32_1 = arith.constant 0 : i32
    %c0_i32_2 = arith.constant 0 : i32
    return %c0_i32, %c0_i32_0, %c0_i32_1, %arg0 : i32, i32, i32, i32
  }
}

</mosaic_0001>

<bundles_post_ra>
// kernel: tpu_custom_call.1
= control target key start
LH: loop header
LB: loop body
LE: loop exit
PB: predicated region body
PF: predicated region fallthrough
CT: control target
= control target key end

     0   :  { %vm17_vm0 = vcmask 31744   ;;  %vm20_vm1 = vcmask 25600   ;;  %vm32_vm2 = vcmask 24576   ;;  %v2660_v0 = vmov 0.0   ;;  %s5279_s0 = inlined_call_operand.vmem [shape: f32[2,16,16,4], index: 0, kind: input, shape index: {}]   ;;  %s5280_s1 = inlined_call_operand.vmem [shape: f32[3,3,4], index: 1, kind: input, shape index: {}]   ;;  %s5281_s2 = inlined_call_operand.vmem [shape: f32[1,4], index: 2, kind: input, shape index: {}]   ;;  %s5282_s3 = inlined_call_operand.vmem [shape: f32[1,4], index: 3, kind: input, shape index: {}]   ;;  %s5283_s4 = inlined_call_operand.vmem [shape: f32[2,16,16,4], index: 4, kind: output, shape index: {}]  }
   0x1   :  { %18 = vst.msk [vmem:[#allocation2] sm:$0xff] %vm17_vm0, %v2660_v0  ;;  %19 = vst.msk [vmem:[#allocation2 + $0x8] sm:$0xff] %vm17_vm0, %v2660_v0  ;;  %v105_v1 = vld [vmem:[%s5279_s0] sm:$0xff]  ;;  %v106_v2 = vld [vmem:[%s5279_s0 + $0x8] sm:$0xff] }
   0x2   :  { %22 = vst.msk [vmem:[#allocation2 + $0x1b0] sm:$0xff] %vm17_vm0, %v2660_v0  ;;  %23 = vst.msk [vmem:[#allocation2 + $0x1b8] sm:$0xff] %vm17_vm0, %v2660_v0  ;;  %v107_v3 = vld [vmem:[%s5279_s0 + $0x10] sm:$0xff]  ;;  %v108_v4 = vld [vmem:[%s5279_s0 + $0x18] sm:$0xff] }
   0x3   :  { %26 = vst.msk [vmem:[#allocation2 + $0x198] sm:$0xff] %vm17_vm0, %v2660_v0  ;;  %27 = vst.msk [vmem:[#allocation2 + $0x1a0] sm:$0xff] %vm17_vm0, %v2660_v0  ;;  %v109_v5 = vld [vmem:[%s5279_s0 + $0x20] sm:$0xff]  ;;  %v110_v6 = vld [vmem:[%s5279_s0 + $0x28] sm:$0xff] }
   0x4   :  { %29 = vst.msk [vmem:[#allocation2 + $0x348] sm:$0xff] %vm17_vm0, %v2660_v0  ;;  %30 = vst.msk [vmem:[#allocation2 + $0x350] sm:$0xff] %vm17_vm0, %v2660_v0  ;;  %v111_v7 = vld [vmem:[%s5279_s0 + $0x30] sm:$0xff]  ;;  %v112_v8 = vld [vmem:[%s5279_s0 + $0x38] sm:$0xff] }
   0x5   :  { %21 = vst.msk [vmem:[#allocation2 + $0x10] sm:$0x3] %vm20_vm1, %v2660_v0  ;;  %24 = vst.msk [vmem:[#allocation2 + $0x1c0] sm:$0x3] %vm20_vm1, %v2660_v0  ;;  %v113_v9 = vld [vmem:[%s5279_s0 + $0x40] sm:$0xff]  ;;  %v114_v10 = vld [vmem:[%s5279_s0 + $0x48] sm:$0xff] }
   0x6   :  { %28 = vst.msk [vmem:[#allocation2 + $0x1a8] sm:$0x3] %vm20_vm1, %v2660_v0  ;;  %31 = vst.msk [vmem:[#allocation2 + $0x358] sm:$0x3] %vm20_vm1, %v2660_v0  ;;  %v115_v11 = vld [vmem:[%s5279_s0 + $0x50] sm:$0xff]  ;;  %v116_v12 = vld [vmem:[%s5279_s0 + $0x58] sm:$0xff] }
   0x7   :  { %34 = vst.msk [vmem:[#allocation2 + $0x18] sm:$0x1] %vm32_vm2, %v2660_v0  ;;  %35 = vst.msk [vmem:[#allocation2 + $0x30] sm:$0x1] %vm32_vm2, %v2660_v0  ;;  %v117_v13 = vld [vmem:[%s5279_s0 + $0x60] sm:$0xff]  ;;  %v118_v14 = vld [vmem:[%s5279_s0 + $0x68] sm:$0xff] }
   0x8   :  { %36 = vst.msk [vmem:[#allocation2 + $0x48] sm:$0x1] %vm32_vm2, %v2660_v0  ;;  %37 = vst.msk [vmem:[#allocation2 + $0x60] sm:$0x1] %vm32_vm2, %v2660_v0  ;;  %v119_v15 = vld [vmem:[%s5279_s0 + $0x70] sm:$0xff]  ;;  %v120_v16 = vld [vmem:[%s5279_s0 + $0x78] sm:$0xff] }
   0x9   :  { %38 = vst.msk [vmem:[#allocation2 + $0x78] sm:$0x1] %vm32_vm2, %v2660_v0  ;;  %39 = vst.msk [vmem:[#allocation2 + $0x90] sm:$0x1] %vm32_vm2, %v2660_v0  ;;  %v121_v17 = vld [vmem:[%s5279_s0 + $0x80] sm:$0xff]  ;;  %v122_v18 = vld [vmem:[%s5279_s0 + $0x88] sm:$0xff] }
   0xa   :  { %40 = vst.msk [vmem:[#allocation2 + $0xa8] sm:$0x1] %vm32_vm2, %v2660_v0  ;;  %41 = vst.msk [vmem:[#allocation2 + $0xc0] sm:$0x1] %vm32_vm2, %v2660_v0  ;;  %v123_v19 = vld [vmem:[%s5279_s0 + $0x90] sm:$0xff]  ;;  %v124_v20 = vld [vmem:[%s5279_s0 + $0x98] sm:$0xff] }
   0xb   :  { %42 = vst.msk [vmem:[#allocation2 + $0xd8] sm:$0x1] %vm32_vm2, %v2660_v0  ;;  %43 = vst.msk [vmem:[#allocation2 + $0xf0] sm:$0x1] %vm32_vm2, %v2660_v0  ;;  %v125_v21 = vld [vmem:[%s5279_s0 + $0xa0] sm:$0xff]  ;;  %v126_v22 = vld [vmem:[%s5279_s0 + $0xa8] sm:$0xff] }
   0xc   :  { %44 = vst.msk [vmem:[#allocation2 + $0x108] sm:$0x1] %vm32_vm2, %v2660_v0  ;;  %45 = vst.msk [vmem:[#allocation2 + $0x120] sm:$0x1] %vm32_vm2, %v2660_v0  ;;  %v127_v23 = vld [vmem:[%s5279_s0 + $0xb0] sm:$0xff]  ;;  %v128_v24 = vld [vmem:[%s5279_s0 + $0xb8] sm:$0xff] }
   0xd   :  { %46 = vst.msk [vmem:[#allocation2 + $0x138] sm:$0x1] %vm32_vm2, %v2660_v0  ;;  %47 = vst.msk [vmem:[#allocation2 + $0x150] sm:$0x1] %vm32_vm2, %v2660_v0  ;;  %v129_v25 = vld [vmem:[%s5279_s0 + $0xc0] sm:$0xff]  ;;  %v130_v26 = vld [vmem:[%s5279_s0 + $0xc8] sm:$0xff] }
   0xe   :  { %48 = vst.msk [vmem:[#allocation2 + $0x168] sm:$0x1] %vm32_vm2, %v2660_v0  ;;  %49 = vst.msk [vmem:[#allocation2 + $0x180] sm:$0x1] %vm32_vm2, %v2660_v0  ;;  %v131_v27 = vld [vmem:[%s5279_s0 + $0xd0] sm:$0xff]  ;;  %v132_v28 = vld [vmem:[%s5279_s0 + $0xd8] sm:$0xff] }
   0xf   :  { %52 = vst.msk [vmem:[#allocation2 + $0x1c8] sm:$0x1] %vm32_vm2, %v2660_v0  ;;  %53 = vst.msk [vmem:[#allocation2 + $0x1e0] sm:$0x1] %vm32_vm2, %v2660_v0  ;;  %v133_v29 = vld [vmem:[%s5279_s0 + $0xe0] sm:$0xff]  ;;  %v134_v30 = vld [vmem:[%s5279_s0 + $0xe8] sm:$0xff] }
  0x10   :  { %54 = vst.msk [vmem:[#allocation2 + $0x1f8] sm:$0x1] %vm32_vm2, %v2660_v0  ;;  %55 = vst.msk [vmem:[#allocation2 + $0x210] sm:$0x1] %vm32_vm2, %v2660_v0  ;;  %v135_v31 = vld [vmem:[%s5279_s0 + $0xf0] sm:$0xff]  ;;  %v136_v32 = vld [vmem:[%s5279_s0 + $0xf8] sm:$0xff] }
  0x11   :  { %56 = vst.msk [vmem:[#allocation2 + $0x228] sm:$0x1] %vm32_vm2, %v2660_v0  ;;  %57 = vst.msk [vmem:[#allocation2 + $0x240] sm:$0x1] %vm32_vm2, %v2660_v0  ;;  %v137_v33 = vld [vmem:[%s5279_s0 + $0x100] sm:$0xff]  ;;  %v138_v34 = vld [vmem:[%s5279_s0 + $0x108] sm:$0xff] }
  0x12   :  { %58 = vst.msk [vmem:[#allocation2 + $0x258] sm:$0x1] %vm32_vm2, %v2660_v0  ;;  %59 = vst.msk [vmem:[#allocation2 + $0x270] sm:$0x1] %vm32_vm2, %v2660_v0  ;;  %v139_v35 = vld [vmem:[%s5279_s0 + $0x110] sm:$0xff]  ;;  %v140_v36 = vld [vmem:[%s5279_s0 + $0x118] sm:$0xff] }
  0x13   :  { %60 = vst.msk [vmem:[#allocation2 + $0x288] sm:$0x1] %vm32_vm2, %v2660_v0  ;;  %61 = vst.msk [vmem:[#allocation2 + $0x2a0] sm:$0x1] %vm32_vm2, %v2660_v0  ;;  %v141_v37 = vld [vmem:[%s5279_s0 + $0x120] sm:$0xff]  ;;  %v142_v38 = vld [vmem:[%s5279_s0 + $0x128] sm:$0xff] }
  0x14   :  { %62 = vst.msk [vmem:[#allocation2 + $0x2b8] sm:$0x1] %vm32_vm2, %v2660_v0  ;;  %63 = vst.msk [vmem:[#allocation2 + $0x2d0] sm:$0x1] %vm32_vm2, %v2660_v0  ;;  %v143_v39 = vld [vmem:[%s5279_s0 + $0x130] sm:$0xff]  ;;  %v144_v40 = vld [vmem:[%s5279_s0 + $0x138] sm:$0xff] }
  0x15   :  { %64 = vst.msk [vmem:[#allocation2 + $0x2e8] sm:$0x1] %vm32_vm2, %v2660_v0  ;;  %65 = vst.msk [vmem:[#allocation2 + $0x300] sm:$0x1] %vm32_vm2, %v2660_v0  ;;  %v145_v41 = vld [vmem:[%s5279_s0 + $0x140] sm:$0xff]  ;;  %v146_v42 = vld [vmem:[%s5279_s0 + $0x148] sm:$0xff] }
  0x16   :  { %66 = vst.msk [vmem:[#allocation2 + $0x318] sm:$0x1] %vm32_vm2, %v2660_v0  ;;  %67 = vst.msk [vmem:[#allocation2 + $0x330] sm:$0x1] %vm32_vm2, %v2660_v0  ;;  %v147_v43 = vld [vmem:[%s5279_s0 + $0x150] sm:$0xff]  ;;  %v148_v44 = vld [vmem:[%s5279_s0 + $0x158] sm:$0xff] }
  0x17   :  { %70 = vst.msk [vmem:[#allocation2 + $0x29] sm:$0x1] %vm32_vm2, %v2660_v0  ;;  %71 = vst.msk [vmem:[#allocation2 + $0x41] sm:$0x1] %vm32_vm2, %v2660_v0  ;;  %v149_v45 = vld [vmem:[%s5279_s0 + $0x160] sm:$0xff]  ;;  %v150_v46 = vld [vmem:[%s5279_s0 + $0x168] sm:$0xff] }
  0x18   :  { %72 = vst.msk [vmem:[#allocation2 + $0x59] sm:$0x1] %vm32_vm2, %v2660_v0  ;;  %73 = vst.msk [vmem:[#allocation2 + $0x71] sm:$0x1] %vm32_vm2, %v2660_v0  ;;  %v151_v47 = vld [vmem:[%s5279_s0 + $0x170] sm:$0xff]  ;;  %v152_v48 = vld [vmem:[%s5279_s0 + $0x178] sm:$0xff] }
  0x19   :  { %74 = vst.msk [vmem:[#allocation2 + $0x89] sm:$0x1] %vm32_vm2, %v2660_v0  ;;  %75 = vst.msk [vmem:[#allocation2 + $0xa1] sm:$0x1] %vm32_vm2, %v2660_v0  ;;  %v153_v49 = vld [vmem:[%s5279_s0 + $0x180] sm:$0xff]  ;;  %v235_v50 = vld [vmem:[#allocation2 + $0x8] sm:$0xff] }
  0x1a   :  { %76 = vst.msk [vmem:[#allocation2 + $0xb9] sm:$0x1] %vm32_vm2, %v2660_v0  ;;  %77 = vst.msk [vmem:[#allocation2 + $0xd1] sm:$0x1] %vm32_vm2, %v2660_v0  ;;  %v267_v51 = vld [vmem:[#allocation2 + $0x1b8] sm:$0xff]  ;;  %v1385_v56 = vld [vmem:[#allocation2 + $0x1a0] sm:$0xff] }
  0x1b   :  { %78 = vst.msk [vmem:[#allocation2 + $0xe9] sm:$0x1] %vm32_vm2, %v2660_v0  ;;  %79 = vst.msk [vmem:[#allocation2 + $0x101] sm:$0x1] %vm32_vm2, %v2660_v0  ;;  %v3049_v52 = vld [vmem:[%s5280_s1] ss:$0 sm:$0xff] }
  0x1c   :  { %80 = vst.msk [vmem:[#allocation2 + $0x119] sm:$0x1] %vm32_vm2, %v2660_v0  ;;  %81 = vst.msk [vmem:[#allocation2 + $0x131] sm:$0x1] %vm32_vm2, %v2660_v0  ;;  %v3054_v53 = vld [vmem:[%s5280_s1 + $0x1] ss:$0 sm:$0xff] }
  0x1d   :  { %82 = vst.msk [vmem:[#allocation2 + $0x149] sm:$0x1] %vm32_vm2, %v2660_v0  ;;  %83 = vst.msk [vmem:[#allocation2 + $0x161] sm:$0x1] %vm32_vm2, %v2660_v0  ;;  %v399_v54 = vld [vmem:[#allocation2 + $0x1b1] sm:$0xff]  ;;  %v154_v58 = vld [vmem:[%s5279_s0 + $0x188] sm:$0xff] }
  0x1e   :  { %84 = vst.msk [vmem:[#allocation2 + $0x179] sm:$0x1] %vm32_vm2, %v2660_v0  ;;  %85 = vst.msk [vmem:[#allocation2 + $0x191] sm:$0x1] %vm32_vm2, %v2660_v0  ;;  %v596_v55 = vld [vmem:[#allocation2 + $0x1b2] sm:$0xff]  ;;  %v1614_v62 = vld [vmem:[#allocation2 + $0x349] sm:$0xff] }
  0x1f   :  { %88 = vst.msk [vmem:[#allocation2 + $0x1d9] sm:$0x1] %vm32_vm2, %v2660_v0  ;;  %89 = vst.msk [vmem:[#allocation2 + $0x1f1] sm:$0x1] %vm32_vm2, %v2660_v0  ;;  %v1417_v57 = vld [vmem:[#allocation2 + $0x350] sm:$0xff]  ;;  %v1582_v59 = vld [vmem:[#allocation2 + $0x199] sm:$0xff] }
  0x20   :  { %90 = vst.msk [vmem:[#allocation2 + $0x209] sm:$0x1] %vm32_vm2, %v2660_v0  ;;  %91 = vst.msk [vmem:[#allocation2 + $0x221] sm:$0x1] %vm32_vm2, %v2660_v0  ;;  %v1779_v63 = vld [vmem:[#allocation2 + $0x19a] sm:$0xff] }
  0x21   :  { %92 = vst.msk [vmem:[#allocation2 + $0x239] sm:$0x1] %vm32_vm2, %v2660_v0  ;;  %93 = vst.msk [vmem:[#allocation2 + $0x251] sm:$0x1] %vm32_vm2, %v2660_v0 }
  0x22   :  { %94 = vst.msk [vmem:[#allocation2 + $0x269] sm:$0x1] %vm32_vm2, %v2660_v0  ;;  %95 = vst.msk [vmem:[#allocation2 + $0x281] sm:$0x1] %vm32_vm2, %v2660_v0 }
  0x23   :  { %96 = vst.msk [vmem:[#allocation2 + $0x299] sm:$0x1] %vm32_vm2, %v2660_v0  ;;  %97 = vst.msk [vmem:[#allocation2 + $0x2b1] sm:$0x1] %vm32_vm2, %v2660_v0 }
  0x24   :  { %98 = vst.msk [vmem:[#allocation2 + $0x2c9] sm:$0x1] %vm32_vm2, %v2660_v0  ;;  %99 = vst.msk [vmem:[#allocation2 + $0x2e1] sm:$0x1] %vm32_vm2, %v2660_v0 }
  0x25   :  { %100 = vst.msk [vmem:[#allocation2 + $0x2f9] sm:$0x1] %vm32_vm2, %v2660_v0  ;;  %101 = vst.msk [vmem:[#allocation2 + $0x311] sm:$0x1] %vm32_vm2, %v2660_v0 }
  0x26   :  { %102 = vst.msk [vmem:[#allocation2 + $0x329] sm:$0x1] %vm32_vm2, %v2660_v0  ;;  %103 = vst.msk [vmem:[#allocation2 + $0x341] sm:$0x1] %vm32_vm2, %v2660_v0 }
  0x27   :  { %33 = vst.msk [vmem:[#allocation2] sm:$0x1] %vm32_vm2, %v2660_v0  ;;  %50 = vst.msk [vmem:[#allocation2 + $0x198] sm:$0x1] %vm32_vm2, %v2660_v0 }
  0x28   :  { %51 = vst.msk [vmem:[#allocation2 + $0x1b0] sm:$0x1] %vm32_vm2, %v2660_v0  ;;  %68 = vst.msk [vmem:[#allocation2 + $0x348] sm:$0x1] %vm32_vm2, %v2660_v0 }
  0x29   :  { %69 = vst.msk [vmem:[#allocation2 + $0x11] sm:$0x1] %vm32_vm2, %v2660_v0  ;;  %86 = vst.msk [vmem:[#allocation2 + $0x1a9] sm:$0x1] %vm32_vm2, %v2660_v0 }
  0x2a   :  { %87 = vst.msk [vmem:[#allocation2 + $0x1c1] sm:$0x1] %vm32_vm2, %v2660_v0  ;;  %104 = vst.msk [vmem:[#allocation2 + $0x359] sm:$0x1] %vm32_vm2, %v2660_v0  ;;  %v368_v0 = vld [vmem:[#allocation2 + $0x9] sm:$0xff] }
  0x2b   :  { %170 = vst.msk [vmem:[#allocation2 + $0x19] sm:$0xff] %vm17_vm0, %v105_v1  ;;  %171 = vst.msk [vmem:[#allocation2 + $0x21] sm:$0xff] %vm17_vm0, %v106_v2  ;;  %v3067_v1 = vld [vmem:[%s5280_s1 + $0x2] ss:$0 sm:$0xff]  ;;  %v3072_v2 = vld [vmem:[%s5280_s1 + $0x8] ss:$0 sm:$0xff] }
  0x2c   :  { %172 = vst.msk [vmem:[#allocation2 + $0x31] sm:$0xff] %vm17_vm0, %v107_v3  ;;  %173 = vst.msk [vmem:[#allocation2 + $0x39] sm:$0xff] %vm17_vm0, %v108_v4  ;;  %v3077_v4 = vld [vmem:[%s5280_s1 + $0xa] ss:$0 sm:$0xff] }
  0x2d   :  { %174 = vst.msk [vmem:[#allocation2 + $0x49] sm:$0xff] %vm17_vm0, %v109_v5  ;;  %175 = vst.msk [vmem:[#allocation2 + $0x51] sm:$0xff] %vm17_vm0, %v110_v6 }
  0x2e   :  { %176 = vst.msk [vmem:[#allocation2 + $0x61] sm:$0xff] %vm17_vm0, %v111_v7  ;;  %177 = vst.msk [vmem:[#allocation2 + $0x69] sm:$0xff] %vm17_vm0, %v112_v8  ;;  %v3086_v7 = vld [vmem:[%s5280_s1 + $0x9] ss:$0 sm:$0xff]  ;;  %v304_v8 = vmul.f32 %v3049_v52, %v235_v50 }
  0x2f   :  { %178 = vst.msk [vmem:[#allocation2 + $0x79] sm:$0xff] %vm17_vm0, %v113_v9  ;;  %179 = vst.msk [vmem:[#allocation2 + $0x81] sm:$0xff] %vm17_vm0, %v114_v10  ;;  %v266_v3 = vld [vmem:[#allocation2 + $0x1b0] sm:$0xff]  ;;  %v336_v9 = vmul.f32 %v3049_v52, %v267_v51  ;;  %v400_v10 = vld [vmem:[#allocation2 + $0x1b9] sm:$0xff] }
  0x30   :  { %180 = vst.msk [vmem:[#allocation2 + $0x91] sm:$0xff] %vm17_vm0, %v115_v11  ;;  %181 = vst.msk [vmem:[#allocation2 + $0x99] sm:$0xff] %vm17_vm0, %v116_v12  ;;  %v565_v11 = vld [vmem:[#allocation2 + $0xa] sm:$0xff] }
  0x31   :  { %182 = vst.msk [vmem:[#allocation2 + $0xa9] sm:$0xff] %vm17_vm0, %v117_v13  ;;  %183 = vst.msk [vmem:[#allocation2 + $0xb1] sm:$0xff] %vm17_vm0, %v118_v14  ;;  %v597_v12 = vld [vmem:[#allocation2 + $0x1ba] sm:$0xff] }
  0x32   :  { %184 = vst.msk [vmem:[#allocation2 + $0xc1] sm:$0xff] %vm17_vm0, %v119_v15  ;;  %185 = vst.msk [vmem:[#allocation2 + $0xc9] sm:$0xff] %vm17_vm0, %v120_v16  ;;  %v468_v15 = vmul.f32 %v3054_v53, %v399_v54  ;;  %v3096_v16 = vmul.f32 %v3067_v1, %v596_v55  ;;  %v156_v55 = vld [vmem:[%s5279_s0 + $0x198] sm:$0xff] }
  0x33   :  { %186 = vst.msk [vmem:[#allocation2 + $0xd9] sm:$0xff] %vm17_vm0, %v121_v17  ;;  %187 = vst.msk [vmem:[#allocation2 + $0xe1] sm:$0xff] %vm17_vm0, %v122_v18  ;;  %v3059_v60 = vld [vmem:[#allocation2 + $0x30] sm:$0xff]  ;;  %v3079_v5 = vld [vmem:[#allocation2 + $0x38] sm:$0xff] }
  0x34   :  { %188 = vst.msk [vmem:[#allocation2 + $0xf1] sm:$0xff] %vm17_vm0, %v123_v19  ;;  %189 = vst.msk [vmem:[#allocation2 + $0xf9] sm:$0xff] %vm17_vm0, %v124_v20  ;;  %v3061_v61 = vld [vmem:[#allocation2 + $0x31] sm:$0xff]  ;;  %v3081_v6 = vld [vmem:[#allocation2 + $0x39] sm:$0xff]  ;;  %v307_v13 = vmul.f32 %v3049_v52, %v3059_v60  ;;  %v3105_v20 = vmul.f32 %v3072_v2, %v1385_v56 }
  0x35   :  { %190 = vst.msk [vmem:[#allocation2 + $0x109] sm:$0xff] %vm17_vm0, %v125_v21  ;;  %191 = vst.msk [vmem:[#allocation2 + $0x111] sm:$0xff] %vm17_vm0, %v126_v22  ;;  %v440_v14 = vmul.f32 %v3054_v53, %v3061_v61  ;;  %v3098_v17 = vld [vmem:[#allocation2 + $0x20] sm:$0xff]  ;;  %v3102_v19 = vld [vmem:[#allocation2 + $0x32] sm:$0xff]  ;;  %v3108_v21 = vmul.f32 %v3072_v2, %v1417_v57  ;;  %v3111_v22 = vmul.f32 %v3077_v4, %v1779_v63 }
  0x36   :  { %192 = vst.msk [vmem:[#allocation2 + $0x121] sm:$0xff] %vm17_vm0, %v127_v23  ;;  %193 = vst.msk [vmem:[#allocation2 + $0x129] sm:$0xff] %vm17_vm0, %v128_v24  ;;  %v3100_v18 = vld [vmem:[#allocation2 + $0x21] sm:$0xff]  ;;  %v236_v23 = vld [vmem:[#allocation2 + $0x18] sm:$0xff] }
  0x37   :  { %194 = vst.msk [vmem:[#allocation2 + $0x139] sm:$0xff] %vm17_vm0, %v129_v25  ;;  %195 = vst.msk [vmem:[#allocation2 + $0x141] sm:$0xff] %vm17_vm0, %v130_v26  ;;  %v369_v24 = vld [vmem:[#allocation2 + $0x19] sm:$0xff]  ;;  %v308_v25 = vmul.f32 %v3049_v52, %v3079_v5  ;;  %v441_v26 = vmul.f32 %v3054_v53, %v3081_v6 }
  0x38   :  { %196 = vst.msk [vmem:[#allocation2 + $0x151] sm:$0xff] %vm17_vm0, %v131_v27  ;;  %197 = vst.msk [vmem:[#allocation2 + $0x159] sm:$0xff] %vm17_vm0, %v132_v28  ;;  %v3118_v27 = vmul.f32 %v3086_v7, %v1582_v59  ;;  %v155_v28 = vld [vmem:[%s5279_s0 + $0x190] sm:$0xff] }
  0x39   :  { %198 = vst.msk [vmem:[#allocation2 + $0x169] sm:$0xff] %vm17_vm0, %v133_v29  ;;  %199 = vst.msk [vmem:[#allocation2 + $0x171] sm:$0xff] %vm17_vm0, %v134_v30  ;;  %v437_v29 = vmul.f32 %v3054_v53, %v368_v0  ;;  %v335_v30 = vmul.f32 %v3049_v52, %v266_v3  ;;  %v3156_v59 = vld [vmem:[#allocation2 + $0x50] sm:$0xff]  ;;  %v1583_v3 = vld [vmem:[#allocation2 + $0x1a1] sm:$0xff] }
  0x3a   :  { %200 = vst.msk [vmem:[#allocation2 + $0x181] sm:$0xff] %vm17_vm0, %v135_v31  ;;  %201 = vst.msk [vmem:[#allocation2 + $0x189] sm:$0xff] %vm17_vm0, %v136_v32  ;;  %v469_v31 = vmul.f32 %v3054_v53, %v400_v10  ;;  %v3126_v32 = vld [vmem:[#allocation2 + $0x3a] sm:$0xff] }
  0x3b   :  { %202 = vst.msk [vmem:[#allocation2 + $0x1c9] sm:$0xff] %vm17_vm0, %v137_v33  ;;  %203 = vst.msk [vmem:[#allocation2 + $0x1d1] sm:$0xff] %vm17_vm0, %v138_v34  ;;  %v240_v33 = vld [vmem:[#allocation2 + $0x48] sm:$0xff]  ;;  %v638_v50 = vmul.f32 %v3067_v1, %v3126_v32  ;;  %v501_v56 = vadd.f32 %v437_v29, %v304_v8  ;;  %v3149_v57 = vadd.f32 %v468_v15, %v335_v30 }
  0x3c   :  { %204 = vst.msk [vmem:[#allocation2 + $0x1e1] sm:$0xff] %vm17_vm0, %v139_v35  ;;  %205 = vst.msk [vmem:[#allocation2 + $0x1e9] sm:$0xff] %vm17_vm0, %v140_v36  ;;  %v373_v34 = vld [vmem:[#allocation2 + $0x49] sm:$0xff]  ;;  %v3129_v35 = vmul.f32 %v3086_v7, %v1614_v62  ;;  %v1384_v36 = vld [vmem:[#allocation2 + $0x198] sm:$0xff]  ;;  %v309_v51 = vmul.f32 %v3049_v52, %v240_v33 }
  0x3d   :  { %206 = vst.msk [vmem:[#allocation2 + $0x1f9] sm:$0xff] %vm17_vm0, %v141_v37  ;;  %207 = vst.msk [vmem:[#allocation2 + $0x201] sm:$0xff] %vm17_vm0, %v142_v38  ;;  %v1416_v37 = vld [vmem:[#allocation2 + $0x348] sm:$0xff]  ;;  %v306_v38 = vmul.f32 %v3049_v52, %v3098_v17  ;;  %v442_v54 = vmul.f32 %v3054_v53, %v373_v34  ;;  %v3159_v63 = vmul.f32 %v3072_v2, %v1384_v36  ;;  %v242_v36 = vld [vmem:[#allocation2 + $0x60] sm:$0xff] }
  0x3e   :  { %208 = vst.msk [vmem:[#allocation2 + $0x211] sm:$0xff] %vm17_vm0, %v143_v39  ;;  %209 = vst.msk [vmem:[#allocation2 + $0x219] sm:$0xff] %vm17_vm0, %v144_v40  ;;  %v439_v39 = vmul.f32 %v3054_v53, %v3100_v18  ;;  %v504_v40 = vadd.f32 %v440_v14, %v307_v13  ;;  %v570_v62 = vld [vmem:[#allocation2 + $0x4a] sm:$0xff]  ;;  %v3162_v0 = vmul.f32 %v3072_v2, %v1416_v37 }
  0x3f   :  { %210 = vst.msk [vmem:[#allocation2 + $0x229] sm:$0xff] %vm17_vm0, %v145_v41  ;;  %211 = vst.msk [vmem:[#allocation2 + $0x231] sm:$0xff] %vm17_vm0, %v146_v42  ;;  %v637_v41 = vmul.f32 %v3067_v1, %v3102_v19  ;;  %v634_v42 = vmul.f32 %v3067_v1, %v565_v11  ;;  %v374_v13 = vld [vmem:[#allocation2 + $0x51] sm:$0xff]  ;;  %v533_v14 = vadd.f32 %v469_v31, %v336_v9 }
  0x40   :  { %212 = vst.msk [vmem:[#allocation2 + $0x241] sm:$0xff] %vm17_vm0, %v147_v43  ;;  %213 = vst.msk [vmem:[#allocation2 + $0x249] sm:$0xff] %vm17_vm0, %v148_v44  ;;  %v666_v43 = vmul.f32 %v3067_v1, %v597_v12  ;;  %v305_v44 = vmul.f32 %v3049_v52, %v236_v23  ;;  %v503_v8 = vadd.f32 %v439_v39, %v306_v38 }
  0x41   :  { %214 = vst.msk [vmem:[#allocation2 + $0x259] sm:$0xff] %vm17_vm0, %v149_v45  ;;  %215 = vst.msk [vmem:[#allocation2 + $0x261] sm:$0xff] %vm17_vm0, %v150_v46  ;;  %v438_v45 = vmul.f32 %v3054_v53, %v369_v24  ;;  %v567_v46 = vld [vmem:[#allocation2 + $0x22] sm:$0xff]  ;;  %v701_v11 = vadd.f32 %v637_v41, %v504_v40  ;;  %v3174_v30 = vadd.f32 %v634_v42, %v501_v56  ;;  %v571_v42 = vld [vmem:[#allocation2 + $0x52] sm:$0xff] }
  0x42   :  { %216 = vst.msk [vmem:[#allocation2 + $0x271] sm:$0xff] %vm17_vm0, %v151_v47  ;;  %217 = vst.msk [vmem:[#allocation2 + $0x279] sm:$0xff] %vm17_vm0, %v152_v48  ;;  %v1780_v47 = vld [vmem:[#allocation2 + $0x1a2] sm:$0xff]  ;;  %v566_v48 = vld [vmem:[#allocation2 + $0x1a] sm:$0xff]  ;;  %v636_v10 = vmul.f32 %v3067_v1, %v567_v46  ;;  %v310_v9 = vmul.f32 %v3049_v52, %v3156_v59  ;;  %v443_v31 = vmul.f32 %v3054_v53, %v374_v13 }
  0x43   :  { %218 = vst.msk [vmem:[#allocation2 + $0x289] sm:$0xff] %vm17_vm0, %v153_v49  ;;  %219 = vst.msk [vmem:[#allocation2 + $0x291] sm:$0xff] %vm17_vm0, %v154_v58  ;;  %v505_v49 = vadd.f32 %v441_v26, %v308_v25  ;;  %v3154_v58 = vld [vmem:[%s5280_s1 + $0x4] ss:$0 sm:$0xff]  ;;  %v3168_v15 = vmul.f32 %v3077_v4, %v1780_v47  ;;  %v502_v23 = vadd.f32 %v438_v45, %v305_v44 }
  0x44   :  { %5342 = vst [vmem:[#allocation3_spill] sm:$0xff] %v3108_v21  ;;  %5343 = vst [vmem:[#allocation4_spill] sm:$0xff] %v3129_v35  ;;  %v835_v12 = vmul.f32 %v3154_v58, %v240_v33  ;;  %v635_v24 = vmul.f32 %v3067_v1, %v566_v48  ;;  %v506_v26 = vadd.f32 %v442_v54, %v309_v51  ;;  %v3179_v33 = vld [vmem:[%s5280_s1 + $0x5] ss:$0 sm:$0xff]  ;;  %v160_v35 = vld [vmem:[%s5279_s0 + $0x1b8] sm:$0xff] }
  0x45   :  { %220 = vst.msk [vmem:[#allocation2 + $0x2a1] sm:$0xff] %vm17_vm0, %v155_v28  ;;  %5344 = vst [vmem:[#allocation5_spill] sm:$0xff] %v3162_v0  ;;  %v702_v25 = vadd.f32 %v638_v50, %v505_v49  ;;  %v639_v28 = vmul.f32 %v3067_v1, %v570_v62  ;;  %v836_v29 = vmul.f32 %v3154_v58, %v3156_v59  ;;  %v157_v44 = vld [vmem:[%s5279_s0 + $0x1a0] sm:$0xff] }
  0x46   :  { %221 = vst.msk [vmem:[#allocation2 + $0x2a9] sm:$0xff] %vm17_vm0, %v156_v55  ;;  %v3185_v37 = vmul.f32 %v3086_v7, %v1583_v3  ;;  %v700_v38 = vadd.f32 %v636_v10, %v503_v8  ;;  %v834_v39 = vmul.f32 %v3154_v58, %v3079_v5  ;;  %v899_v40 = vadd.f32 %v835_v12, %v701_v11  ;;  %v375_v50 = vld [vmem:[#allocation2 + $0x61] sm:$0xff]  ;;  %v376_v11 = vld [vmem:[#allocation2 + $0x69] sm:$0xff] }
  0x47   :  { %v1032_v41 = vmul.f32 %v3179_v33, %v373_v34  ;;  %v3193_v45 = vadd.f32 %v666_v43, %v533_v14  ;;  %v699_v46 = vadd.f32 %v635_v24, %v502_v23  ;;  %v3197_v47 = vmul.f32 %v3154_v58, %v3098_v17  ;;  %222 = vst.msk [vmem:[#allocation2 + $0x2b9] sm:$0xff] %vm17_vm0, %v157_v44  ;;  %v243_v10 = vld [vmem:[#allocation2 + $0x68] sm:$0xff] }
  0x48   :  { %v833_v48 = vmul.f32 %v3154_v58, %v3059_v60  ;;  %v703_v5 = vadd.f32 %v639_v28, %v506_v26  ;;  %v900_v49 = vadd.f32 %v836_v29, %v702_v25  ;;  %v1033_v34 = vmul.f32 %v3179_v33, %v374_v13  ;;  %v3215_v60 = vld [vmem:[%s5280_s1 + $0x6] ss:$0 sm:$0xff]  ;;  %v1615_v28 = vld [vmem:[#allocation2 + $0x351] sm:$0xff]  ;;  %225 = vst.msk [vmem:[#allocation2 + $0x2d9] sm:$0xff] %vm17_vm0, %v160_v35 }
  0x49   :  { %v837_v51 = vmul.f32 %v3154_v58, %v242_v36  ;;  %v3206_v43 = vmul.f32 %v3179_v33, %v3100_v18  ;;  %v3210_v17 = vmul.f32 %v3179_v33, %v3061_v61  ;;  %v507_v54 = vadd.f32 %v443_v31, %v310_v9  ;;  %v158_v61 = vld [vmem:[%s5279_s0 + $0x1a8] sm:$0xff] }
  0x4a   :  { %v640_v55 = vmul.f32 %v3067_v1, %v571_v42  ;;  %v898_v56 = vadd.f32 %v834_v39, %v700_v38  ;;  %v1031_v3 = vmul.f32 %v3179_v33, %v3081_v6  ;;  %v1096_v8 = vadd.f32 %v1032_v41, %v899_v40  ;;  %223 = vst.msk [vmem:[#allocation2 + $0x2c1] sm:$0xff] %vm17_vm0, %v158_v61  ;;  %v572_v26 = vld [vmem:[#allocation2 + $0x62] sm:$0xff] }
  0x4b   :  { %v1229_v18 = vmul.f32 %v3215_v60, %v570_v62  ;;  %v3224_v12 = vadd.f32 %v833_v48, %v699_v46  ;;  %v3228_v13 = vmul.f32 %v3215_v60, %v3102_v19  ;;  %v311_v14 = vmul.f32 %v3049_v52, %v242_v36 }
  0x4c   :  { %v444_v23 = vmul.f32 %v3054_v53, %v375_v50  ;;  %v1097_v6 = vadd.f32 %v1033_v34, %v900_v49  ;;  %v1230_v62 = vmul.f32 %v3215_v60, %v571_v42  ;;  %v901_v24 = vadd.f32 %v837_v51, %v703_v5  ;;  %v244_v42 = vld [vmem:[#allocation2 + $0x78] sm:$0xff]  ;;  %v245_v34 = vld [vmem:[#allocation2 + $0x80] sm:$0xff] }
  0x4d   :  { %v1034_v25 = vmul.f32 %v3179_v33, %v375_v50  ;;  %v704_v29 = vadd.f32 %v640_v55, %v507_v54  ;;  %v312_v9 = vmul.f32 %v3049_v52, %v243_v10  ;;  %v445_v19 = vmul.f32 %v3054_v53, %v376_v11  ;;  %v377_v49 = vld [vmem:[#allocation2 + $0x79] sm:$0xff] }
  0x4e   :  { %v838_v31 = vmul.f32 %v3154_v58, %v243_v10  ;;  %v3238_v38 = vadd.f32 %v1031_v3, %v898_v56  ;;  %v3242_v39 = vmul.f32 %v3215_v60, %v3126_v32  ;;  %v3244_v40 = vadd.f32 %v1229_v18, %v1096_v8  ;;  %v3257_v32 = vld [vmem:[#allocation2 + $0x81] sm:$0xff]  ;;  %v3263_v56 = vld [vmem:[#allocation2 + $0x90] sm:$0xff] }
  0x4f   :  { %v3248_v41 = vmul.f32 %v3072_v2, %v3156_v59  ;;  %v508_v44 = vadd.f32 %v444_v23, %v311_v14  ;;  %v3251_v46 = vmul.f32 %v3072_v2, %v242_v36  ;;  %v3254_v48 = vmul.f32 %v3086_v7, %v375_v50  ;;  %v3265_v36 = vld [vmem:[#allocation2 + $0x91] sm:$0xff] }
  0x50   :  { %5345 = vst [vmem:[#allocation6_spill] sm:$0xff] %v3242_v39  ;;  %5346 = vst [vmem:[#allocation7_spill] sm:$0xff] %v3244_v40  ;;  %v641_v5 = vmul.f32 %v3067_v1, %v572_v26  ;;  %v1294_v51 = vadd.f32 %v1230_v62, %v1097_v6  ;;  %v1098_v54 = vadd.f32 %v1034_v25, %v901_v24  ;;  %v159_v50 = vld [vmem:[%s5279_s0 + $0x1b0] sm:$0xff] }
  0x51   :  { %5347 = vst [vmem:[#allocation8_spill] sm:$0xff] %v3248_v41  ;;  %5348 = vst [vmem:[#allocation9_spill] sm:$0xff] %v3251_v46  ;;  %v3260_v55 = vmul.f32 %v3086_v7, %v1615_v28  ;;  %v1231_v59 = vmul.f32 %v3215_v60, %v572_v26  ;;  %v509_v3 = vadd.f32 %v445_v19, %v312_v9  ;;  %v573_v14 = vld [vmem:[#allocation2 + $0x6a] sm:$0xff]  ;;  %v574_v28 = vld [vmem:[#allocation2 + $0x7a] sm:$0xff] }
  0x52   :  { %5349 = vst [vmem:[#allocation10_spill] sm:$0xff] %v3254_v48  ;;  %v902_v8 = vadd.f32 %v838_v31, %v704_v29  ;;  %v1035_v18 = vmul.f32 %v3179_v33, %v376_v11  ;;  %v1429_v61 = vmul.f32 %v3072_v2, %v243_v10  ;;  %224 = vst.msk [vmem:[#allocation2 + $0x2d1] sm:$0xff] %vm17_vm0, %v159_v50  ;;  %v3281_v29 = vld [vmem:[#allocation2 + $0x82] sm:$0xff]  ;;  %v3287_v19 = vld [vmem:[#allocation2 + $0x98] sm:$0xff] }
  0x53   :  { %5350 = vst [vmem:[#allocation11_spill] sm:$0xff] %v3260_v55  ;;  %v313_v23 = vmul.f32 %v3049_v52, %v244_v42  ;;  %v446_v6 = vmul.f32 %v3054_v53, %v377_v49  ;;  %v314_v62 = vmul.f32 %v3049_v52, %v245_v34  ;;  %v447_v24 = vmul.f32 %v3054_v53, %v3257_v32 }
  0x54   :  { %v705_v25 = vadd.f32 %v641_v5, %v508_v44  ;;  %v3279_v26 = vmul.f32 %v3086_v7, %v376_v11  ;;  %v315_v10 = vmul.f32 %v3049_v52, %v3263_v56  ;;  %v448_v9 = vmul.f32 %v3054_v53, %v3265_v36  ;;  %v3292_v11 = vld [vmem:[#allocation2 + $0x99] sm:$0xff] }
  0x55   :  { %v1295_v31 = vadd.f32 %v1231_v59, %v1098_v54  ;;  %v642_v50 = vmul.f32 %v3067_v1, %v573_v14  ;;  %v839_v55 = vmul.f32 %v3154_v58, %v244_v42  ;;  %v1430_v44 = vmul.f32 %v3072_v2, %v244_v42  ;;  %v3294_v5 = vld [vmem:[#allocation2 + $0x92] sm:$0xff] }
  0x56   :  { %5351 = vst [vmem:[#allocation12_spill] sm:$0xff] %v3279_v26  ;;  %v1099_v21 = vadd.f32 %v1035_v18, %v902_v8  ;;  %v3299_v0 = vadd.f32 %v1429_v61, %v1294_v51  ;;  %v1232_v26 = vmul.f32 %v3215_v60, %v573_v14  ;;  %v3303_v54 = vmul.f32 %v3077_v4, %v573_v14 }
  0x57   :  { %v510_v59 = vadd.f32 %v446_v6, %v313_v23  ;;  %v511_v42 = vadd.f32 %v447_v24, %v314_v62  ;;  %v643_v48 = vmul.f32 %v3067_v1, %v574_v28  ;;  %v644_v46 = vmul.f32 %v3067_v1, %v3281_v29  ;;  %v3317_v6 = vld [vmem:[#allocation2 + $0x9a] sm:$0xff]  ;;  %v3319_v62 = vld [vmem:[#allocation2 + $0xa8] sm:$0xff] }
  0x58   :  { %5352 = vst [vmem:[#allocation13_spill] sm:$0xff] %v3299_v0  ;;  %5353 = vst [vmem:[#allocation14_spill] sm:$0xff] %v3303_v54  ;;  %v512_v40 = vadd.f32 %v448_v9, %v315_v10  ;;  %v316_v8 = vmul.f32 %v3049_v52, %v3287_v19  ;;  %v449_v51 = vmul.f32 %v3054_v53, %v3292_v11 }
  0x59   :  { %v645_v18 = vmul.f32 %v3067_v1, %v3294_v5  ;;  %v903_v61 = vadd.f32 %v839_v55, %v705_v25  ;;  %v1036_v35 = vmul.f32 %v3179_v33, %v377_v49  ;;  %v1494_v14 = vadd.f32 %v1430_v44, %v1295_v31 }
  0x5a   :  { %v1627_v23 = vmul.f32 %v3086_v7, %v377_v49  ;;  %v706_v24 = vadd.f32 %v642_v50, %v509_v3  ;;  %v1296_v10 = vadd.f32 %v1232_v26, %v1099_v21  ;;  %v840_v9 = vmul.f32 %v3154_v58, %v245_v34  ;;  %v161_v49 = vld [vmem:[%s5279_s0 + $0x1c0] sm:$0xff]  ;;  %v249_v50 = vld [vmem:[#allocation2 + $0xb0] sm:$0xff] }
  0x5b   :  { %v1431_v54 = vmul.f32 %v3072_v2, %v245_v34  ;;  %v707_v0 = vadd.f32 %v643_v48, %v510_v59  ;;  %v708_v41 = vadd.f32 %v644_v46, %v511_v42  ;;  %v841_v55 = vmul.f32 %v3154_v58, %v3263_v56  ;;  %226 = vst.msk [vmem:[#allocation2 + $0x2e9] sm:$0xff] %vm17_vm0, %v161_v49 }
  0x5c   :  { %v842_v25 = vmul.f32 %v3154_v58, %v3287_v19  ;;  %v513_v31 = vadd.f32 %v449_v51, %v316_v8  ;;  %v709_v44 = vadd.f32 %v645_v18, %v512_v40  ;;  %v646_v21 = vmul.f32 %v3067_v1, %v3317_v6  ;;  %v381_v51 = vld [vmem:[#allocation2 + $0xa9] sm:$0xff] }
  0x5d   :  { %v843_v34 = vmul.f32 %v3154_v58, %v3319_v62  ;;  %v1100_v46 = vadd.f32 %v1036_v35, %v903_v61  ;;  %v3335_v48 = vadd.f32 %v1627_v23, %v1494_v14  ;;  %v1037_v3 = vmul.f32 %v3179_v33, %v3257_v32  ;;  %v162_v23 = vld [vmem:[%s5279_s0 + $0x1c8] sm:$0xff] }
  0x5e   :  { %v1233_v26 = vmul.f32 %v3215_v60, %v574_v28  ;;  %v904_v59 = vadd.f32 %v840_v9, %v706_v24  ;;  %v1495_v42 = vadd.f32 %v1431_v54, %v1296_v10  ;;  %v1628_v40 = vmul.f32 %v3086_v7, %v3257_v32  ;;  %227 = vst.msk [vmem:[#allocation2 + $0x2f1] sm:$0xff] %vm17_vm0, %v162_v23 }
  0x5f   :  { %5354 = vst [vmem:[#allocation15_spill] sm:$0xff] %v3335_v48  ;;  %v3343_v8 = vmul.f32 %v3077_v4, %v574_v28  ;;  %v905_v18 = vadd.f32 %v841_v55, %v707_v0  ;;  %v1038_v61 = vmul.f32 %v3179_v33, %v3265_v36  ;;  %v906_v35 = vadd.f32 %v842_v25, %v708_v41 }
  0x60   :  { %v1039_v14 = vmul.f32 %v3179_v33, %v3292_v11  ;;  %v710_v54 = vadd.f32 %v646_v21, %v513_v31  ;;  %v907_v24 = vadd.f32 %v843_v34, %v709_v44  ;;  %v1040_v32 = vmul.f32 %v3179_v33, %v381_v51  ;;  %v578_v44 = vld [vmem:[#allocation2 + $0xaa] sm:$0xff] }
  0x61   :  { %5355 = vst [vmem:[#allocation16_spill] sm:$0xff] %v3343_v8  ;;  %v844_v28 = vmul.f32 %v3154_v58, %v249_v50  ;;  %v1297_v0 = vadd.f32 %v1233_v26, %v1100_v46  ;;  %v1432_v10 = vmul.f32 %v3072_v2, %v3263_v56  ;;  %v317_v41 = vmul.f32 %v3049_v52, %v3319_v62  ;;  %v382_v26 = vld [vmem:[#allocation2 + $0xb1] sm:$0xff] }
  0x62   :  { %v450_v9 = vmul.f32 %v3054_v53, %v381_v51  ;;  %v1101_v55 = vadd.f32 %v1037_v3, %v904_v59  ;;  %v1692_v25 = vadd.f32 %v1628_v40, %v1495_v42  ;;  %v1234_v49 = vmul.f32 %v3215_v60, %v3281_v29 }
  0x63   :  { %v1825_v31 = vmul.f32 %v3077_v4, %v3281_v29  ;;  %v1102_v21 = vadd.f32 %v1038_v61, %v905_v18  ;;  %v1103_v34 = vadd.f32 %v1039_v14, %v906_v35  ;;  %v1235_v46 = vmul.f32 %v3215_v60, %v3294_v5  ;;  %v163_v61 = vld [vmem:[%s5279_s0 + $0x1d0] sm:$0xff] }
  0x64   :  { %v1236_v56 = vmul.f32 %v3215_v60, %v3317_v6  ;;  %v1104_v23 = vadd.f32 %v1040_v32, %v907_v24  ;;  %v908_v8 = vadd.f32 %v844_v28, %v710_v54  ;;  %v1041_v3 = vmul.f32 %v3179_v33, %v382_v26  ;;  %v250_v32 = vld [vmem:[#allocation2 + $0xc0] sm:$0xff]  ;;  %228 = vst.msk [vmem:[#allocation2 + $0x301] sm:$0xff] %vm17_vm0, %v163_v61 }
  0x65   :  { %v1237_v59 = vmul.f32 %v3215_v60, %v578_v44  ;;  %v1496_v42 = vadd.f32 %v1432_v10, %v1297_v0  ;;  %v1629_v29 = vmul.f32 %v3086_v7, %v3265_v36  ;;  %v514_v40 = vadd.f32 %v450_v9, %v317_v41  ;;  %v579_v41 = vld [vmem:[#allocation2 + $0xb2] sm:$0xff]  ;;  %v383_v9 = vld [vmem:[#allocation2 + $0xc1] sm:$0xff] }
  0x66   :  { %v647_v18 = vmul.f32 %v3067_v1, %v578_v44  ;;  %v1298_v35 = vadd.f32 %v1234_v49, %v1101_v55  ;;  %v3376_v14 = vadd.f32 %v1825_v31, %v1692_v25  ;;  %v318_v54 = vmul.f32 %v3049_v52, %v249_v50 }
  0x67   :  { %v451_v24 = vmul.f32 %v3054_v53, %v382_v26  ;;  %v1299_v28 = vadd.f32 %v1235_v46, %v1102_v21  ;;  %v1300_v0 = vadd.f32 %v1236_v56, %v1103_v34  ;;  %v1434_v36 = vmul.f32 %v3072_v2, %v3319_v62  ;;  %v164_v62 = vld [vmem:[%s5279_s0 + $0x1d8] sm:$0xff] }
  0x68   :  { %5356 = vst [vmem:[#allocation17_spill] sm:$0xff] %v3376_v14  ;;  %v1435_v10 = vmul.f32 %v3072_v2, %v249_v50  ;;  %v1105_v48 = vadd.f32 %v1041_v3, %v908_v8  ;;  %v1301_v55 = vadd.f32 %v1237_v59, %v1104_v23  ;;  %v1238_v25 = vmul.f32 %v3215_v60, %v579_v41 }
  0x69   :  { %v1436_v49 = vmul.f32 %v3072_v2, %v250_v32  ;;  %v3386_v31 = vadd.f32 %v1629_v29, %v1496_v42  ;;  %v1433_v61 = vmul.f32 %v3072_v2, %v3287_v19  ;;  %v711_v21 = vadd.f32 %v647_v18, %v514_v40  ;;  %229 = vst.msk [vmem:[#allocation2 + $0x309] sm:$0xff] %vm17_vm0, %v164_v62  ;;  %v251_v42 = vld [vmem:[#allocation2 + $0xc8] sm:$0xff] }
  0x6a   :  { %v845_v34 = vmul.f32 %v3154_v58, %v250_v32  ;;  %v515_v50 = vadd.f32 %v451_v24, %v318_v54  ;;  %v648_v8 = vmul.f32 %v3067_v1, %v579_v41  ;;  %v319_v46 = vmul.f32 %v3049_v52, %v250_v32  ;;  %v580_v29 = vld [vmem:[#allocation2 + $0xc2] sm:$0xff] }
  0x6b   :  { %v452_v56 = vmul.f32 %v3054_v53, %v383_v9  ;;  %v1498_v23 = vadd.f32 %v1434_v36, %v1299_v28  ;;  %v1631_v3 = vmul.f32 %v3086_v7, %v381_v51  ;;  %v1499_v19 = vadd.f32 %v1435_v10, %v1300_v0  ;;  %v384_v0 = vld [vmem:[#allocation2 + $0xc9] sm:$0xff] }
  0x6c   :  { %v1632_v59 = vmul.f32 %v3086_v7, %v382_v26  ;;  %v1302_v40 = vadd.f32 %v1238_v25, %v1105_v48  ;;  %v1500_v18 = vadd.f32 %v1436_v49, %v1301_v55  ;;  %v1633_v54 = vmul.f32 %v3086_v7, %v383_v9 }
  0x6d   :  { %v1437_v24 = vmul.f32 %v3072_v2, %v251_v42  ;;  %v1497_v14 = vadd.f32 %v1433_v61, %v1298_v35  ;;  %v1630_v32 = vmul.f32 %v3086_v7, %v3292_v11  ;;  %v909_v39 = vadd.f32 %v845_v34, %v711_v21  ;;  %v252_v35 = vld [vmem:[#allocation2 + $0xd8] sm:$0xff]  ;;  %v165_v11 = vld [vmem:[%s5279_s0 + $0x1e0] sm:$0xff] }
  0x6e   :  { %v1042_v28 = vmul.f32 %v3179_v33, %v383_v9  ;;  %v712_v36 = vadd.f32 %v648_v8, %v515_v50  ;;  %v516_v51 = vadd.f32 %v452_v56, %v319_v46  ;;  %v649_v26 = vmul.f32 %v3067_v1, %v580_v29  ;;  %230 = vst.msk [vmem:[#allocation2 + $0x319] sm:$0xff] %vm17_vm0, %v165_v11 }
  0x6f   :  { %v846_v10 = vmul.f32 %v3154_v58, %v251_v42  ;;  %v1695_v48 = vadd.f32 %v1631_v3, %v1498_v23  ;;  %v1696_v55 = vadd.f32 %v1632_v59, %v1499_v19  ;;  %v1828_v25 = vmul.f32 %v3077_v4, %v578_v44  ;;  %v581_v23 = vld [vmem:[#allocation2 + $0xca] sm:$0xff] }
  0x70   :  { %v1829_v49 = vmul.f32 %v3077_v4, %v579_v41  ;;  %v1697_v61 = vadd.f32 %v1633_v54, %v1500_v18  ;;  %v1501_v9 = vadd.f32 %v1437_v24, %v1302_v40  ;;  %v1634_v21 = vmul.f32 %v3086_v7, %v384_v0 }
  0x71   :  { %v1830_v34 = vmul.f32 %v3077_v4, %v580_v29  ;;  %v1106_v62 = vadd.f32 %v1042_v28, %v909_v39  ;;  %v320_v50 = vmul.f32 %v3049_v52, %v251_v42  ;;  %v453_v44 = vmul.f32 %v3054_v53, %v384_v0  ;;  %v166_v42 = vld [vmem:[%s5279_s0 + $0x1e8] sm:$0xff] }
  0x72   :  { %v1239_v41 = vmul.f32 %v3215_v60, %v580_v29  ;;  %v713_v8 = vadd.f32 %v649_v26, %v516_v51  ;;  %v910_v46 = vadd.f32 %v846_v10, %v712_v36  ;;  %v1043_v56 = vmul.f32 %v3179_v33, %v384_v0  ;;  %231 = vst.msk [vmem:[#allocation2 + $0x321] sm:$0xff] %vm17_vm0, %v166_v42  ;;  %v253_v10 = vld [vmem:[#allocation2 + $0xe0] sm:$0xff] }
  0x73   :  { %v847_v3 = vmul.f32 %v3154_v58, %v252_v35  ;;  %v1694_v19 = vadd.f32 %v1630_v32, %v1497_v14  ;;  %v1826_v59 = vmul.f32 %v3077_v4, %v3294_v5  ;;  %v1827_v39 = vmul.f32 %v3077_v4, %v3317_v6  ;;  %v385_v14 = vld [vmem:[#allocation2 + $0xd9] sm:$0xff] }
  0x74   :  { %v3424_v40 = vadd.f32 %v1828_v25, %v1695_v48  ;;  %v3429_v29 = vadd.f32 %v1829_v49, %v1696_v55  ;;  %v1698_v18 = vadd.f32 %v1634_v21, %v1501_v9  ;;  %v3431_v54 = vadd.f32 %v1830_v34, %v1697_v61 }
  0x75   :  { %v1831_v24 = vmul.f32 %v3077_v4, %v581_v23  ;;  %v517_v5 = vadd.f32 %v453_v44, %v320_v50  ;;  %v1303_v32 = vadd.f32 %v1239_v41, %v1106_v62  ;;  %v650_v6 = vmul.f32 %v3067_v1, %v581_v23  ;;  %v582_v50 = vld [vmem:[#allocation2 + $0xda] sm:$0xff]  ;;  %v167_v41 = vld [vmem:[%s5279_s0 + $0x1f0] sm:$0xff] }
  0x76   :  { %5357 = vst [vmem:[#allocation18_spill] sm:$0xff] %v3424_v40  ;;  %5358 = vst [vmem:[#allocation19_spill] sm:$0xff] %v3429_v29  ;;  %v1438_v28 = vmul.f32 %v3072_v2, %v252_v35  ;;  %v1107_v36 = vadd.f32 %v1043_v56, %v910_v46  ;;  %v1240_v51 = vmul.f32 %v3215_v60, %v581_v23 }
  0x77   :  { %5359 = vst [vmem:[#allocation20_spill] sm:$0xff] %v3431_v54  ;;  %v911_v0 = vadd.f32 %v847_v3, %v713_v8  ;;  %v1044_v26 = vmul.f32 %v3179_v33, %v385_v14  ;;  %v3440_v48 = vadd.f32 %v1826_v59, %v3386_v31  ;;  %v3442_v55 = vadd.f32 %v1827_v39, %v1694_v19  ;;  %v386_v31 = vld [vmem:[#allocation2 + $0xe1] sm:$0xff] }
  0x78   :  { %v321_v25 = vmul.f32 %v3049_v52, %v252_v35  ;;  %v454_v49 = vmul.f32 %v3054_v53, %v385_v14  ;;  %v3448_v11 = vmul.f32 %v3424_v40, %v3424_v40  ;;  %v3452_v61 = vmul.f32 %v3429_v29, %v3429_v29  ;;  %232 = vst.msk [vmem:[#allocation2 + $0x331] sm:$0xff] %vm17_vm0, %v167_v41 }
  0x79   :  { %5360 = vst [vmem:[#allocation21_spill] sm:$0xff] %v3440_v48  ;;  %5361 = vst [vmem:[#allocation22_spill] sm:$0xff] %v3442_v55  ;;  %v2091_v9 = vmul.f32 %v3431_v54, %v3431_v54  ;;  %v3456_v21 = vadd.f32 %v1831_v24, %v1698_v18  ;;  %v714_v34 = vadd.f32 %v650_v6, %v517_v5  ;;  %v3468_v3 = vsel %vm17_vm0, %v3431_v54, 0.0  ;;  %v583_v5 = vld [vmem:[#allocation2 + $0xe2] sm:$0xff]  ;;  %v387_v6 = vld [vmem:[#allocation2 + $0xf1] sm:$0xff] }
  0x7a   :  { %5362 = vst [vmem:[#allocation23_spill] sm:$0xff] %v3448_v11  ;;  %5363 = vst [vmem:[#allocation24_spill] sm:$0xff] %v3452_v61  ;;  %v1502_v62 = vadd.f32 %v1438_v28, %v1303_v32  ;;  %v1635_v35 = vmul.f32 %v3086_v7, %v385_v14  ;;  %v848_v44 = vmul.f32 %v3154_v58, %v253_v10  ;;  %v254_v32 = vld [vmem:[#allocation2 + $0xf0] sm:$0xff] }
  0x7b   :  { %5364 = vst [vmem:[#allocation25_spill] sm:$0xff] %v3456_v21  ;;  %v1304_v8 = vadd.f32 %v1240_v51, %v1107_v36  ;;  %v1108_v46 = vadd.f32 %v1044_v26, %v911_v0  ;;  %v1241_v56 = vmul.f32 %v3215_v60, %v582_v50  ;;  %v1439_v23 = vmul.f32 %v3072_v2, %v253_v10  ;;  %v255_v26 = vld [vmem:[#allocation2 + $0xf8] sm:$0xff] }
  0x7c   :  { %5365 = vst [vmem:[#allocation26_spill] sm:$0xff] %v3468_v3  ;;  %v518_v19 = vadd.f32 %v454_v49, %v321_v25  ;;  %v322_v59 = vmul.f32 %v3049_v52, %v253_v10  ;;  %v455_v39 = vmul.f32 %v3054_v53, %v386_v31  ;;  %v3473_v42 = vsel %vm17_vm0, %v2091_v9, 0.0  ;;  %v388_v10 = vld [vmem:[#allocation2 + $0xf9] sm:$0xff] }
  0x7d   :  { %5366 = vst [vmem:[#allocation27_spill] sm:$0xff] %v3473_v42  ;;  %v3477_v18 = vsel %vm17_vm0, %v3456_v21, 0.0  ;;  %v2092_v24 = vmul.f32 %v3456_v21, %v3456_v21  ;;  %v651_v14 = vmul.f32 %v3067_v1, %v582_v50  ;;  %v1699_v28 = vadd.f32 %v1635_v35, %v1502_v62  ;;  %v168_v25 = vld [vmem:[%s5279_s0 + $0x1f8] sm:$0xff] }
  0x7e   :  { %5367 = vst [vmem:[#allocation28_spill] sm:$0xff] %v3477_v18  ;;  %v912_v36 = vadd.f32 %v848_v44, %v714_v34  ;;  %v1045_v51 = vmul.f32 %v3179_v33, %v386_v31  ;;  %v1832_v0 = vmul.f32 %v3077_v4, %v582_v50  ;;  %v1305_v49 = vadd.f32 %v1241_v56, %v1108_v46  ;;  %v584_v46 = vld [vmem:[#allocation2 + $0xf2] sm:$0xff]  ;;  %v3504_v18 = vld [vmem:[#allocation2 + $0x109] sm:$0xff] }
  0x7f   :  { %v1503_v9 = vadd.f32 %v1439_v23, %v1304_v8  ;;  %v1636_v41 = vmul.f32 %v3086_v7, %v386_v31  ;;  %v1440_v21 = vmul.f32 %v3072_v2, %v254_v32  ;;  %233 = vst.msk [vmem:[#allocation2 + $0x339] sm:$0xff] %vm17_vm0, %v168_v25  ;;  %v519_v62 = vadd.f32 %v455_v39, %v322_v59  ;;  %v585_v39 = vld [vmem:[#allocation2 + $0xfa] sm:$0xff] }
  0x80   :  { %v652_v34 = vmul.f32 %v3067_v1, %v583_v5  ;;  %v323_v35 = vmul.f32 %v3049_v52, %v254_v32  ;;  %v456_v50 = vmul.f32 %v3054_v53, %v387_v6  ;;  %v715_v44 = vadd.f32 %v651_v14, %v518_v19 }
  0x81   :  { %v849_v54 = vmul.f32 %v3154_v58, %v254_v32  ;;  %v324_v42 = vmul.f32 %v3049_v52, %v255_v26  ;;  %v457_v8 = vmul.f32 %v3054_v53, %v388_v10  ;;  %v3497_v31 = vsel %vm17_vm0, %v2092_v24, 0.0  ;;  %v256_v32 = vld [vmem:[#allocation2 + $0x108] sm:$0xff] }
  0x82   :  { %5368 = vst [vmem:[#allocation29_spill] sm:$0xff] %v3497_v31  ;;  %v1109_v56 = vadd.f32 %v1045_v51, %v912_v36  ;;  %v3499_v23 = vadd.f32 %v1832_v0, %v1699_v28  ;;  %v1242_v59 = vmul.f32 %v3215_v60, %v583_v5  ;;  %v1700_v25 = vadd.f32 %v1636_v41, %v1503_v9 }
  0x83   :  { %v1833_v61 = vmul.f32 %v3077_v4, %v583_v5  ;;  %v1504_v19 = vadd.f32 %v1440_v21, %v1305_v49  ;;  %v1637_v14 = vmul.f32 %v3086_v7, %v387_v6  ;;  %v716_v11 = vadd.f32 %v652_v34, %v519_v62  ;;  %v257_v62 = vld [vmem:[#allocation2 + $0x110] sm:$0xff] }
  0x84   :  { %5369 = vst [vmem:[#allocation30_spill] sm:$0xff] %v3499_v23  ;;  %v520_v3 = vadd.f32 %v456_v50, %v323_v35  ;;  %v653_v24 = vmul.f32 %v3067_v1, %v584_v46  ;;  %v850_v36 = vmul.f32 %v3154_v58, %v255_v26  ;;  %v913_v28 = vadd.f32 %v849_v54, %v715_v44 }
  0x85   :  { %v1046_v51 = vmul.f32 %v3179_v33, %v387_v6  ;;  %v521_v0 = vadd.f32 %v457_v8, %v324_v42  ;;  %v654_v9 = vmul.f32 %v3067_v1, %v585_v39  ;;  %v2093_v21 = vmul.f32 %v3499_v23, %v3499_v23  ;;  %v3519_v42 = vld [vmem:[#allocation2 + $0x10a] sm:$0xff] }
  0x86   :  { %v1306_v5 = vadd.f32 %v1242_v59, %v1109_v56  ;;  %v325_v49 = vmul.f32 %v3049_v52, %v256_v32  ;;  %v458_v41 = vmul.f32 %v3054_v53, %v3504_v18  ;;  %v3515_v34 = vadd.f32 %v1833_v61, %v1700_v25 }
  0x87   :  { %v1701_v35 = vadd.f32 %v1637_v14, %v1504_v19  ;;  %v1441_v54 = vmul.f32 %v3072_v2, %v255_v26  ;;  %v1834_v6 = vmul.f32 %v3077_v4, %v584_v46  ;;  %v717_v50 = vadd.f32 %v653_v24, %v520_v3 }
  0x88   :  { %5370 = vst [vmem:[#allocation31_spill] sm:$0xff] %v3515_v34  ;;  %v914_v44 = vadd.f32 %v850_v36, %v716_v11  ;;  %v1047_v8 = vmul.f32 %v3179_v33, %v388_v10  ;;  %v851_v56 = vmul.f32 %v3154_v58, %v256_v32  ;;  %v1110_v59 = vadd.f32 %v1046_v51, %v913_v28  ;;  %v390_v36 = vld [vmem:[#allocation2 + $0x111] sm:$0xff]  ;;  %v258_v28 = vld [vmem:[#allocation2 + $0x120] sm:$0xff] }
  0x89   :  { %v1243_v31 = vmul.f32 %v3215_v60, %v584_v46  ;;  %v718_v29 = vadd.f32 %v654_v9, %v521_v0  ;;  %v852_v61 = vmul.f32 %v3154_v58, %v257_v62  ;;  %v3527_v25 = vsel %vm17_vm0, %v3499_v23, 0.0 }
  0x8a   :  { %v3530_v26 = vsel %vm17_vm0, %v2093_v21, 0.0  ;;  %v522_v19 = vadd.f32 %v458_v41, %v325_v49  ;;  %v655_v11 = vmul.f32 %v3067_v1, %v3519_v42  ;;  %v3536_v3 = vsel %vm17_vm0, %v3515_v34, 0.0 }
  0x8b   :  { %5371 = vst [vmem:[#allocation32_spill] sm:$0xff] %v3530_v26  ;;  %5372 = vst [vmem:[#allocation33_spill] sm:$0xff] %v3536_v3  ;;  %v1505_v14 = vadd.f32 %v1441_v54, %v1306_v5  ;;  %v1638_v46 = vmul.f32 %v3086_v7, %v388_v10  ;;  %v3539_v24 = vadd.f32 %v1834_v6, %v1701_v35 }
  0x8c   :  { %v1111_v51 = vadd.f32 %v1047_v8, %v914_v44  ;;  %v1244_v0 = vmul.f32 %v3215_v60, %v585_v39  ;;  %v915_v9 = vadd.f32 %v851_v56, %v717_v50  ;;  %v1048_v21 = vmul.f32 %v3179_v33, %v3504_v18 }
  0x8d   :  { %5373 = vst [vmem:[#allocation34_spill] sm:$0xff] %v3539_v24  ;;  %v2094_v49 = vmul.f32 %v3515_v34, %v3515_v34  ;;  %v1307_v41 = vadd.f32 %v1243_v31, %v1110_v59  ;;  %v916_v23 = vadd.f32 %v852_v61, %v718_v29  ;;  %v1049_v5 = vmul.f32 %v3179_v33, %v390_v36  ;;  %v587_v34 = vld [vmem:[#allocation2 + $0x112] sm:$0xff] }
  0x8e   :  { %v326_v10 = vmul.f32 %v3049_v52, %v257_v62  ;;  %v459_v35 = vmul.f32 %v3054_v53, %v390_v36  ;;  %v719_v54 = vadd.f32 %v655_v11, %v522_v19  ;;  %v853_v6 = vmul.f32 %v3154_v58, %v258_v28 }
  0x8f   :  { %v1702_v44 = vadd.f32 %v1638_v46, %v1505_v14  ;;  %v2095_v50 = vmul.f32 %v3539_v24, %v3539_v24  ;;  %v1835_v8 = vmul.f32 %v3077_v4, %v585_v39  ;;  %v1442_v56 = vmul.f32 %v3072_v2, %v256_v32  ;;  %v391_v46 = vld [vmem:[#allocation2 + $0x121] sm:$0xff] }
  0x90   :  { %v1308_v31 = vadd.f32 %v1244_v0, %v1111_v51  ;;  %v1112_v29 = vadd.f32 %v1048_v21, %v915_v9  ;;  %v1245_v59 = vmul.f32 %v3215_v60, %v3519_v42  ;;  %v1443_v61 = vmul.f32 %v3072_v2, %v257_v62 }
  0x91   :  { %v3558_v19 = vsel %vm17_vm0, %v2094_v49, 0.0  ;;  %v3562_v11 = vsel %vm17_vm0, %v3539_v24, 0.0  ;;  %v1113_v14 = vadd.f32 %v1049_v5, %v916_v23  ;;  %v1246_v39 = vmul.f32 %v3215_v60, %v587_v34 }
  0x92   :  { %5374 = vst [vmem:[#allocation35_spill] sm:$0xff] %v3558_v19  ;;  %5375 = vst [vmem:[#allocation36_spill] sm:$0xff] %v3562_v11  ;;  %v523_v32 = vadd.f32 %v459_v35, %v326_v10  ;;  %v656_v51 = vmul.f32 %v3067_v1, %v587_v34  ;;  %v917_v0 = vadd.f32 %v853_v6, %v719_v54  ;;  %v3568_v21 = vsel %vm17_vm0, %v2095_v50, 0.0  ;;  %v259_v19 = vld [vmem:[#allocation2 + $0x128] sm:$0xff] }
  0x93   :  { %v1050_v9 = vmul.f32 %v3179_v33, %v391_v46  ;;  %5376 = vst [vmem:[#allocation37_spill] sm:$0xff] %v3568_v21  ;;  %v3570_v62 = vadd.f32 %v1835_v8, %v1702_v44  ;;  %v1506_v49 = vadd.f32 %v1442_v56, %v1307_v41  ;;  %v1639_v24 = vmul.f32 %v3086_v7, %v3504_v18  ;;  %v392_v35 = vld [vmem:[#allocation2 + $0x129] sm:$0xff] }
  0x94   :  { %v1309_v23 = vadd.f32 %v1245_v59, %v1112_v29  ;;  %v1507_v5 = vadd.f32 %v1443_v61, %v1308_v31  ;;  %v1640_v26 = vmul.f32 %v3086_v7, %v390_v36  ;;  %v1444_v10 = vmul.f32 %v3072_v2, %v258_v28  ;;  %v588_v21 = vld [vmem:[#allocation2 + $0x122] sm:$0xff] }
  0x95   :  { %5377 = vst [vmem:[#allocation38_spill] sm:$0xff] %v3570_v62  ;;  %v1310_v54 = vadd.f32 %v1246_v39, %v1113_v14  ;;  %v327_v6 = vmul.f32 %v3049_v52, %v258_v28  ;;  %v460_v50 = vmul.f32 %v3054_v53, %v391_v46  ;;  %v1445_v44 = vmul.f32 %v3072_v2, %v259_v19 }
  0x96   :  { %v720_v41 = vadd.f32 %v656_v51, %v523_v32  ;;  %v1114_v8 = vadd.f32 %v1050_v9, %v917_v0  ;;  %v854_v18 = vmul.f32 %v3154_v58, %v259_v19  ;;  %v1247_v56 = vmul.f32 %v3215_v60, %v588_v21  ;;  %v589_v32 = vld [vmem:[#allocation2 + $0x12a] sm:$0xff] }
  0x97   :  { %v1703_v31 = vadd.f32 %v1639_v24, %v1506_v49  ;;  %v1836_v36 = vmul.f32 %v3077_v4, %v3519_v42  ;;  %v328_v29 = vmul.f32 %v3049_v52, %v259_v19  ;;  %v461_v59 = vmul.f32 %v3054_v53, %v392_v35  ;;  %v260_v49 = vld [vmem:[#allocation2 + $0x138] sm:$0xff] }
  0x98   :  { %v1704_v28 = vadd.f32 %v1640_v26, %v1507_v5  ;;  %v1837_v61 = vmul.f32 %v3077_v4, %v587_v34  ;;  %v1508_v14 = vadd.f32 %v1444_v10, %v1309_v23  ;;  %v1641_v39 = vmul.f32 %v3086_v7, %v391_v46 }
  0x99   :  { %v524_v51 = vadd.f32 %v460_v50, %v327_v6  ;;  %v657_v0 = vmul.f32 %v3067_v1, %v588_v21  ;;  %v1509_v9 = vadd.f32 %v1445_v44, %v1310_v54  ;;  %v1642_v24 = vmul.f32 %v3086_v7, %v392_v35  ;;  %v261_v54 = vld [vmem:[#allocation2 + $0x140] sm:$0xff] }
  0x9a   :  { %v918_v11 = vadd.f32 %v854_v18, %v720_v41  ;;  %v1051_v42 = vmul.f32 %v3179_v33, %v392_v35  ;;  %v1311_v52 = vadd.f32 %v1247_v56, %v1114_v8  ;;  %v1446_v53 = vmul.f32 %v3072_v2, %v260_v49  ;;  %v393_v44 = vld [vmem:[#allocation2 + $0x139] sm:$0xff] }
  0x9b   :  { %v2096_v34 = vmul.f32 %v3570_v62, %v3570_v62  ;;  %v3593_v26 = vadd.f32 %v1836_v36, %v1703_v31  ;;  %v525_v19 = vadd.f32 %v461_v59, %v328_v29  ;;  %v658_v46 = vmul.f32 %v3067_v1, %v589_v32  ;;  %v394_v29 = vld [vmem:[#allocation2 + $0x141] sm:$0xff] }
  0x9c   :  { %v3598_v23 = vsel %vm17_vm0, %v3570_v62, 0.0  ;;  %v3600_v5 = vadd.f32 %v1837_v61, %v1704_v28  ;;  %v1705_v10 = vadd.f32 %v1641_v39, %v1508_v14  ;;  %v1838_v35 = vmul.f32 %v3077_v4, %v588_v21  ;;  %v3628_v61 = vld [vmem:[%s5280_s1 + $0x1] ss:$0 sm:$0xff] }
  0x9d   :  { %5378 = vst [vmem:[#allocation39_spill] sm:$0xff] %v3593_v26  ;;  %5379 = vst [vmem:[#allocation40_spill] sm:$0xff] %v3598_v23  ;;  %v721_v6 = vadd.f32 %v657_v0, %v524_v51  ;;  %v1706_v2 = vadd.f32 %v1642_v24, %v1509_v9  ;;  %v1839_v50 = vmul.f32 %v3077_v4, %v589_v32  ;;  %v3608_v31 = vsel %vm17_vm0, %v2096_v34, 0.0  ;;  %v590_v9 = vld [vmem:[#allocation2 + $0x13a] sm:$0xff] }
  0x9e   :  { %5380 = vst [vmem:[#allocation41_spill] sm:$0xff] %v3600_v5  ;;  %v855_v41 = vmul.f32 %v3154_v58, %v260_v49  ;;  %v1115_v8 = vadd.f32 %v1051_v42, %v918_v11  ;;  %v1248_v1 = vmul.f32 %v3215_v60, %v589_v32  ;;  %v1510_v18 = vadd.f32 %v1446_v53, %v1311_v52 }
  0x9f   :  { %v1643_v56 = vmul.f32 %v3086_v7, %v393_v44  ;;  %5381 = vst [vmem:[#allocation42_spill] sm:$0xff] %v3608_v31  ;;  %v3612_v21 = vsel %vm17_vm0, %v3593_v26, 0.0  ;;  %v722_v36 = vadd.f32 %v658_v46, %v525_v19  ;;  %v856_v4 = vmul.f32 %v3154_v58, %v261_v54  ;;  %v3622_v7 = vld [vmem:[%s5280_s1] ss:$0 sm:$0xff]  ;;  %v3642_v19 = vld [vmem:[%s5280_s1 + $0x8] ss:$0 sm:$0xff] }
  0xa0   :  { %5382 = vst [vmem:[#allocation43_spill] sm:$0xff] %v3612_v21  ;;  %v2097_v59 = vmul.f32 %v3593_v26, %v3593_v26  ;;  %v3617_v11 = vadd.f32 %v1838_v35, %v1705_v10  ;;  %v329_v28 = vmul.f32 %v3622_v7, %v260_v49  ;;  %v462_v14 = vmul.f32 %v3628_v61, %v393_v44  ;;  %v3648_v10 = vld [vmem:[%s5280_s1 + $0xa] ss:$0 sm:$0xff] }
  0xa1   :  { %v2098_v39 = vmul.f32 %v3600_v5, %v3600_v5  ;;  %v3633_v32 = vadd.f32 %v1839_v50, %v1706_v2  ;;  %v919_v51 = vadd.f32 %v855_v41, %v721_v6  ;;  %v1052_v0 = vmul.f32 %v3179_v33, %v393_v44  ;;  %v591_v6 = vld [vmem:[#allocation2 + $0x142] sm:$0xff] }
  0xa2   :  { %5383 = vst [vmem:[#allocation44_spill] sm:$0xff] %v3617_v11  ;;  %v1312_v24 = vadd.f32 %v1248_v1, %v1115_v8  ;;  %v1707_v42 = vadd.f32 %v1643_v56, %v1510_v18  ;;  %v330_v49 = vmul.f32 %v3622_v7, %v261_v54  ;;  %v463_v52 = vmul.f32 %v3628_v61, %v394_v29  ;;  %v3659_v41 = vld [vmem:[%s5280_s1 + $0x2] ss:$0 sm:$0xff] }
  0xa3   :  { %5384 = vst [vmem:[#allocation45_spill] sm:$0xff] %v3633_v32  ;;  %v920_v53 = vadd.f32 %v856_v4, %v722_v36  ;;  %v1053_v34 = vmul.f32 %v3179_v33, %v394_v29  ;;  %v1447_v46 = vmul.f32 %v3642_v19, %v261_v54  ;;  %v1840_v35 = vmul.f32 %v3648_v10, %v590_v9  ;;  %v262_v36 = vld [vmem:[#allocation2 + $0x150] sm:$0xff] }
  0xa4   :  { %v3652_v2 = vsel %vm17_vm0, %v2097_v59, 0.0  ;;  %v2099_v50 = vmul.f32 %v3617_v11, %v3617_v11  ;;  %v526_v44 = vadd.f32 %v462_v14, %v329_v28  ;;  %v659_v54 = vmul.f32 %v3659_v41, %v590_v9  ;;  %v3675_v28 = vld [vmem:[%s5280_s1 + $0x9] ss:$0 sm:$0xff] }
  0xa5   :  { %5385 = vst [vmem:[#allocation46_spill] sm:$0xff] %v3652_v2  ;;  %v3664_v8 = vsel %vm17_vm0, %v3600_v5, 0.0  ;;  %v2100_v1 = vmul.f32 %v3633_v32, %v3633_v32  ;;  %v1116_v18 = vadd.f32 %v1052_v0, %v919_v51  ;;  %v1249_v56 = vmul.f32 %v3215_v60, %v590_v9  ;;  %v395_v0 = vld [vmem:[#allocation2 + $0x151] sm:$0xff] }
  0xa6   :  { %5386 = vst [vmem:[#allocation47_spill] sm:$0xff] %v3664_v8  ;;  %v3670_v4 = vsel %vm17_vm0, %v2098_v39, 0.0  ;;  %v527_v59 = vadd.f32 %v463_v52, %v330_v49  ;;  %v1644_v14 = vmul.f32 %v3675_v28, %v394_v29  ;;  %v660_v5 = vmul.f32 %v3659_v41, %v591_v6  ;;  %v398_v8 = vld [vmem:[#allocation2 + $0x171] sm:$0xff] }
  0xa7   :  { %5387 = vst [vmem:[#allocation48_spill] sm:$0xff] %v3670_v4  ;;  %v1117_v26 = vadd.f32 %v1053_v34, %v920_v53  ;;  %v1511_v62 = vadd.f32 %v1447_v46, %v1312_v24  ;;  %v3679_v2 = vadd.f32 %v1840_v35, %v1707_v42  ;;  %v1250_v51 = vmul.f32 %v3215_v60, %v591_v6  ;;  %v263_v34 = vld [vmem:[#allocation2 + $0x158] sm:$0xff] }
  0xa8   :  { %v3684_v39 = vsel %vm17_vm0, %v3617_v11, 0.0  ;;  %v3687_v9 = vsel %vm17_vm0, %v2099_v50, 0.0  ;;  %v723_v49 = vadd.f32 %v659_v54, %v526_v44  ;;  %v857_v52 = vmul.f32 %v3154_v58, %v262_v36  ;;  %v396_v54 = vld [vmem:[#allocation2 + $0x159] sm:$0xff] }
  0xa9   :  { %5388 = vst [vmem:[#allocation49_spill] sm:$0xff] %v3679_v2  ;;  %5389 = vst [vmem:[#allocation50_spill] sm:$0xff] %v3684_v39  ;;  %v3692_v29 = vsel %vm17_vm0, %v3633_v32, 0.0  ;;  %v3695_v24 = vsel %vm17_vm0, %v2100_v1, 0.0  ;;  %v1313_v42 = vadd.f32 %v1249_v56, %v1116_v18  ;;  %v1448_v53 = vmul.f32 %v3642_v19, %v262_v36  ;;  %v264_v18 = vld [vmem:[#allocation2 + $0x168] sm:$0xff] }
  0xaa   :  { %5390 = vst [vmem:[#allocation51_spill] sm:$0xff] %v3687_v9  ;;  %5391 = vst [vmem:[#allocation52_spill] sm:$0xff] %v3692_v29  ;;  %v724_v46 = vadd.f32 %v660_v5, %v527_v59  ;;  %v1841_v35 = vmul.f32 %v3648_v10, %v591_v6  ;;  %v331_v50 = vmul.f32 %v3622_v7, %v262_v36  ;;  %v592_v9 = vld [vmem:[#allocation2 + $0x152] sm:$0xff]  ;;  %v397_v56 = vld [vmem:[#allocation2 + $0x169] sm:$0xff]  ;;  %v3706_v5 = vsel %vm17_vm0, %v3679_v2, 0.0 }
  0xab   :  { %5392 = vst [vmem:[#allocation53_spill] sm:$0xff] %v3695_v24  ;;  %v464_v44 = vmul.f32 %v3628_v61, %v395_v0  ;;  %v1708_v58 = vadd.f32 %v1644_v14, %v1511_v62  ;;  %v2101_v32 = vmul.f32 %v3679_v2, %v3679_v2  ;;  %v1314_v11 = vadd.f32 %v1250_v51, %v1117_v26  ;;  %v3712_v62 = vld [vmem:[%s5280_s1 + $0x4] ss:$0 sm:$0xff] }
  0xac   :  { %v1449_v1 = vmul.f32 %v3642_v19, %v263_v34  ;;  %5393 = vst [vmem:[#allocation54_spill] sm:$0xff] %v3706_v5  ;;  %v921_v6 = vadd.f32 %v857_v52, %v723_v49  ;;  %v1054_v36 = vmul.f32 %v3179_v33, %v395_v0  ;;  %v858_v59 = vmul.f32 %v3712_v62, %v263_v34  ;;  %v593_v49 = vld [vmem:[#allocation2 + $0x15a] sm:$0xff] }
  0xad   :  { %v1512_v26 = vadd.f32 %v1448_v53, %v1313_v42  ;;  %v1645_v14 = vmul.f32 %v3675_v28, %v395_v0  ;;  %v332_v51 = vmul.f32 %v3622_v7, %v263_v34  ;;  %v465_v24 = vmul.f32 %v3628_v61, %v396_v54  ;;  %v594_v53 = vld [vmem:[#allocation2 + $0x16a] sm:$0xff] }
  0xae   :  { %v528_v4 = vadd.f32 %v464_v44, %v331_v50  ;;  %v661_v2 = vmul.f32 %v3659_v41, %v592_v9  ;;  %v333_v33 = vmul.f32 %v3622_v7, %v264_v18  ;;  %v466_v52 = vmul.f32 %v3628_v61, %v397_v56  ;;  %v3730_v50 = vld [vmem:[%s5280_s1 + $0x5] ss:$0 sm:$0xff] }
  0xaf   :  { %v3722_v5 = vsel %vm17_vm0, %v2101_v32, 0.0  ;;  %v3724_v29 = vadd.f32 %v1841_v35, %v1708_v58  ;;  %v1513_v42 = vadd.f32 %v1449_v1, %v1314_v11  ;;  %v1646_v0 = vmul.f32 %v3675_v28, %v396_v54 }
  0xb0   :  { %5394 = vst [vmem:[#allocation55_spill] sm:$0xff] %v3722_v5  ;;  %v1118_v34 = vadd.f32 %v1054_v36, %v921_v6  ;;  %v922_v39 = vadd.f32 %v858_v59, %v724_v46  ;;  %v1055_v44 = vmul.f32 %v3730_v50, %v396_v54  ;;  %v1251_v31 = vmul.f32 %v3215_v60, %v592_v9  ;;  %v265_v6 = vld [vmem:[#allocation2 + $0x170] sm:$0xff] }
  0xb1   :  { %5395 = vst [vmem:[#allocation56_spill] sm:$0xff] %v3724_v29  ;;  %v1709_v32 = vadd.f32 %v1645_v14, %v1512_v26  ;;  %v529_v5 = vadd.f32 %v465_v24, %v332_v51  ;;  %v1842_v35 = vmul.f32 %v3648_v10, %v592_v9  ;;  %v662_v11 = vmul.f32 %v3659_v41, %v593_v49  ;;  %v791_v26 = vld [vmem:[#allocation2 + $0x180] sm:$0xff]  ;;  %v595_v51 = vld [vmem:[#allocation2 + $0x172] sm:$0xff] }
  0xb2   :  { %v725_v58 = vadd.f32 %v661_v2, %v528_v4  ;;  %v530_v1 = vadd.f32 %v466_v52, %v333_v33  ;;  %v859_v46 = vmul.f32 %v3712_v62, %v264_v18  ;;  %v663_v36 = vmul.f32 %v3659_v41, %v594_v53  ;;  %v3744_v2 = vld [vmem:[%s5280_s1 + $0x6] ss:$0 sm:$0xff] }
  0xb3   :  { %v1710_v59 = vadd.f32 %v1646_v0, %v1513_v42  ;;  %v1843_v21 = vmul.f32 %v3648_v10, %v593_v49  ;;  %v334_v54 = vmul.f32 %v3622_v7, %v265_v6  ;;  %v467_v60 = vmul.f32 %v3628_v61, %v398_v8 }
  0xb4   :  { %v1119_v24 = vadd.f32 %v1055_v44, %v922_v39  ;;  %v1315_v14 = vadd.f32 %v1251_v31, %v1118_v34  ;;  %v1252_v4 = vmul.f32 %v3744_v2, %v593_v49  ;;  %v1450_v9 = vmul.f32 %v3642_v19, %v264_v18 }
  0xb5   :  { %v2102_v33 = vmul.f32 %v3724_v29, %v3724_v29  ;;  %v3750_v52 = vadd.f32 %v1842_v35, %v1709_v32  ;;  %v726_v42 = vadd.f32 %v662_v11, %v529_v5  ;;  %v860_v0 = vmul.f32 %v3712_v62, %v265_v6  ;;  %v989_v32 = vld [vmem:[#allocation2 + $0x181] sm:$0xff] }
  0xb6   :  { %v923_v39 = vadd.f32 %v859_v46, %v725_v58  ;;  %v1056_v31 = vmul.f32 %v3730_v50, %v397_v56  ;;  %v727_v34 = vadd.f32 %v663_v36, %v530_v1  ;;  %v861_v44 = vmul.f32 %v3712_v62, %v791_v26  ;;  %v792_v46 = vld [vmem:[#allocation2 + $0x188] sm:$0xff] }
  0xb7   :  { %5396 = vst [vmem:[#allocation57_spill] sm:$0xff] %v3750_v52  ;;  %v3757_v49 = vsel %vm17_vm0, %v3724_v29, 0.0  ;;  %v3759_v18 = vadd.f32 %v1843_v21, %v1710_v59  ;;  %v531_v23 = vadd.f32 %v467_v60, %v334_v54  ;;  %v664_v3 = vmul.f32 %v3659_v41, %v595_v51 }
  0xb8   :  { %5397 = vst [vmem:[#allocation58_spill] sm:$0xff] %v3757_v49  ;;  %v1316_v35 = vadd.f32 %v1252_v4, %v1119_v24  ;;  %v1514_v5 = vadd.f32 %v1450_v9, %v1315_v14  ;;  %v1647_v11 = vmul.f32 %v3675_v28, %v397_v56  ;;  %v1451_v58 = vmul.f32 %v3642_v19, %v265_v6  ;;  %v1186_v9 = vld [vmem:[#allocation2 + $0x182] sm:$0xff] }
  0xb9   :  { %5398 = vst [vmem:[#allocation59_spill] sm:$0xff] %v3759_v18  ;;  %v3765_v1 = vsel %vm17_vm0, %v2102_v33, 0.0  ;;  %v2103_v36 = vmul.f32 %v3750_v52, %v3750_v52  ;;  %v924_v29 = vadd.f32 %v860_v0, %v726_v42  ;;  %v1057_v21 = vmul.f32 %v3730_v50, %v398_v8 }
  0xba   :  { %5399 = vst [vmem:[#allocation60_spill] sm:$0xff] %v3765_v1  ;;  %v1120_v59 = vadd.f32 %v1056_v31, %v923_v39  ;;  %v1253_v54 = vmul.f32 %v3744_v2, %v594_v53  ;;  %v925_v60 = vadd.f32 %v861_v44, %v727_v34  ;;  %v1058_v24 = vmul.f32 %v3730_v50, %v989_v32  ;;  %v990_v31 = vld [vmem:[#allocation2 + $0x189] sm:$0xff] }
  0xbb   :  { %v3774_v56 = vsel %vm17_vm0, %v3750_v52, 0.0  ;;  %v2104_v6 = vmul.f32 %v3759_v18, %v3759_v18  ;;  %v728_v14 = vadd.f32 %v664_v3, %v531_v23  ;;  %v862_v4 = vmul.f32 %v3712_v62, %v792_v46  ;;  %v268_v34 = vld [vmem:[#allocation2 + $0x1c8] sm:$0xff] }
  0xbc   :  { %5400 = vst [vmem:[#allocation61_spill] sm:$0xff] %v3774_v56  ;;  %v1711_v33 = vadd.f32 %v1647_v11, %v1514_v5  ;;  %v1515_v42 = vadd.f32 %v1451_v58, %v1316_v35  ;;  %v1648_v0 = vmul.f32 %v3675_v28, %v398_v8  ;;  %v1844_v39 = vmul.f32 %v3648_v10, %v594_v53  ;;  %v401_v44 = vld [vmem:[#allocation2 + $0x1c9] sm:$0xff] }
  0xbd   :  { %v3782_v1 = vsel %vm17_vm0, %v2103_v36, 0.0  ;;  %v3786_v52 = vsel %vm17_vm0, %v3759_v18, 0.0  ;;  %v1121_v3 = vadd.f32 %v1057_v21, %v924_v29  ;;  %v1254_v23 = vmul.f32 %v3744_v2, %v595_v51 }
  0xbe   :  { %5401 = vst [vmem:[#allocation62_spill] sm:$0xff] %v3782_v1  ;;  %5402 = vst [vmem:[#allocation63_spill] sm:$0xff] %v3786_v52  ;;  %v1317_v56 = vadd.f32 %v1253_v54, %v1120_v59  ;;  %v1122_v5 = vadd.f32 %v1058_v24, %v925_v60  ;;  %v1452_v35 = vmul.f32 %v3642_v19, %v791_v26  ;;  %v269_v1 = vld [vmem:[#allocation2 + $0x1d0] sm:$0xff]  ;;  %v3795_v18 = vsel %vm17_vm0, %v2104_v6, 0.0 }
  0xbf   :  { %v1255_v8 = vmul.f32 %v3744_v2, %v1186_v9  ;;  %v926_v53 = vadd.f32 %v862_v4, %v728_v14  ;;  %v1059_v11 = vmul.f32 %v3730_v50, %v990_v31  ;;  %v337_v58 = vmul.f32 %v3622_v7, %v268_v34  ;;  %5403 = vst [vmem:[#allocation64_spill] sm:$0xff] %v3795_v18  ;;  %v1187_v54 = vld [vmem:[#allocation2 + $0x18a] sm:$0xff] }
  0xc0   :  { %v470_v36 = vmul.f32 %v3628_v61, %v401_v44  ;;  %v1712_v29 = vadd.f32 %v1648_v0, %v1515_v42  ;;  %v3797_v21 = vadd.f32 %v1844_v39, %v1711_v33  ;;  %v1845_v59 = vmul.f32 %v3648_v10, %v595_v51  ;;  %v598_v26 = vld [vmem:[#allocation2 + $0x1ca] sm:$0xff] }
  0xc1   :  { %v1318_v60 = vadd.f32 %v1254_v23, %v1121_v3  ;;  %v1453_v24 = vmul.f32 %v3642_v19, %v792_v46  ;;  %v729_v14 = vadd.f32 %v3096_v16, %v3149_v57  ;;  %v863_v4 = vmul.f32 %v3712_v62, %v268_v34  ;;  %v402_v52 = vld [vmem:[#allocation2 + $0x1d1] sm:$0xff] }
  0xc2   :  { %5404 = vst [vmem:[#allocation65_spill] sm:$0xff] %v3797_v21  ;;  %v1516_v49 = vadd.f32 %v1452_v35, %v1317_v56  ;;  %v1649_v6 = vmul.f32 %v3675_v28, %v989_v32  ;;  %v1319_v18 = vadd.f32 %v1255_v8, %v1122_v5  ;;  %v864_v33 = vmul.f32 %v3712_v62, %v269_v1  ;;  %v270_v56 = vld [vmem:[#allocation2 + $0x1e0] sm:$0xff]  ;;  %v599_v35 = vld [vmem:[#allocation2 + $0x1d2] sm:$0xff] }
  0xc3   :  { %v1123_v42 = vadd.f32 %v1059_v11, %v926_v53  ;;  %v534_v0 = vadd.f32 %v470_v36, %v337_v58  ;;  %v1256_v51 = vmul.f32 %v3744_v2, %v1187_v54  ;;  %v667_v39 = vmul.f32 %v3659_v41, %v598_v26 }
  0xc4   :  { %v2105_v46 = vmul.f32 %v3797_v21, %v3797_v21  ;;  %v3810_v3 = vadd.f32 %v1845_v59, %v1712_v29  ;;  %v338_v16 = vmul.f32 %v3622_v7, %v269_v1  ;;  %v471_v57 = vmul.f32 %v3628_v61, %v402_v52 }
  0xc5   :  { %v1517_v32 = vadd.f32 %v1453_v24, %v1318_v60  ;;  %v1650_v34 = vmul.f32 %v3675_v28, %v990_v31  ;;  %v927_v23 = vadd.f32 %v863_v4, %v729_v14  ;;  %v1060_v5 = vmul.f32 %v3730_v50, %v401_v44  ;;  %v271_v24 = vld [vmem:[#allocation2 + $0x1e8] sm:$0xff] }
  0xc6   :  { %5405 = vst [vmem:[#allocation66_spill] sm:$0xff] %v3810_v3  ;;  %v1713_v8 = vadd.f32 %v1649_v6, %v1516_v49  ;;  %v1846_v53 = vmul.f32 %v3648_v10, %v1186_v9  ;;  %v928_v11 = vadd.f32 %v864_v33, %v3193_v45  ;;  %v1061_v58 = vmul.f32 %v3730_v50, %v402_v52 }
  0xc7   :  { %v1518_v36 = vadd.f32 %v3159_v63, %v1319_v18  ;;  %v1320_v1 = vadd.f32 %v1256_v51, %v1123_v42  ;;  %v731_v29 = vadd.f32 %v667_v39, %v534_v0  ;;  %v865_v59 = vmul.f32 %v3712_v62, %v270_v56  ;;  %v403_v18 = vld [vmem:[#allocation2 + $0x1e1] sm:$0xff] }
  0xc8   :  { %v3823_v31 = vsel %vm17_vm0, %v3797_v21, 0.0  ;;  %v3826_v44 = vsel %vm17_vm0, %v2105_v46, 0.0  ;;  %v535_v49 = vadd.f32 %v471_v57, %v338_v16  ;;  %v668_v9 = vmul.f32 %v3659_v41, %v599_v35 }
  0xc9   :  { %v2106_v45 = vmul.f32 %v3810_v3, %v3810_v3  ;;  %v1714_v52 = vadd.f32 %v1650_v34, %v1517_v32  ;;  %v1124_v60 = vadd.f32 %v1060_v5, %v927_v23  ;;  %v1257_v63 = vmul.f32 %v3744_v2, %v598_v26 }
  0xca   :  { %v3832_v14 = vadd.f32 %v1846_v53, %v1713_v8  ;;  %v1847_v4 = vmul.f32 %v3648_v10, %v1187_v54  ;;  %v1125_v6 = vadd.f32 %v1061_v58, %v928_v11  ;;  %v1258_v33 = vmul.f32 %v3744_v2, %v599_v35  ;;  %v404_v35 = vld [vmem:[#allocation2 + $0x1e9] sm:$0xff] }
  0xcb   :  { %v1715_v42 = vadd.f32 %v3118_v27, %v1518_v36  ;;  %v1519_v0 = vadd.f32 %v3105_v20, %v1320_v1  ;;  %v929_v51 = vadd.f32 %v865_v59, %v731_v29  ;;  %v1062_v39 = vmul.f32 %v3730_v50, %v403_v18  ;;  %v600_v8 = vld [vmem:[#allocation2 + $0x1e2] sm:$0xff] }
  0xcc   :  { %5406 = vst [vmem:[#allocation67_spill] sm:$0xff] %v3832_v14  ;;  %v732_v46 = vadd.f32 %v668_v9, %v535_v49  ;;  %v339_v16 = vmul.f32 %v3622_v7, %v270_v56  ;;  %v472_v26 = vmul.f32 %v3628_v61, %v403_v18  ;;  %v866_v57 = vmul.f32 %v3712_v62, %v271_v24 }
  0xcd   :  { %v3844_v54 = vsel %vm17_vm0, %v3810_v3, 0.0  ;;  %v3847_v32 = vsel %vm17_vm0, %v2106_v45, 0.0  ;;  %v1321_v27 = vadd.f32 %v1257_v63, %v1124_v60  ;;  %v1456_v20 = vmul.f32 %v3642_v19, %v270_v56 }
  0xce   :  { %v2107_v34 = vmul.f32 %v3832_v14, %v3832_v14  ;;  %v3852_v23 = vadd.f32 %v1847_v4, %v1714_v52  ;;  %v1322_v5 = vadd.f32 %v1258_v33, %v1125_v6  ;;  %v1457_v53 = vmul.f32 %v3642_v19, %v271_v24  ;;  %v272_v4 = vld [vmem:[#allocation2 + $0x1f8] sm:$0xff] }
  0xcf   :  { %v1716_v11 = vadd.f32 %v3185_v37, %v1519_v0  ;;  %v3857_v58 = vadd.f32 %v3111_v22, %v1715_v42  ;;  %v1126_v36 = vadd.f32 %v1062_v39, %v929_v51  ;;  %v1259_v1 = vmul.f32 %v3744_v2, %v600_v8  ;;  %v601_v42 = vld [vmem:[#allocation2 + $0x1ea] sm:$0xff] }
  0xd0   :  { %5407 = vst [vmem:[#allocation68_spill] sm:$0xff] %v3852_v23  ;;  %v536_v29 = vadd.f32 %v472_v26, %v339_v16  ;;  %v1653_v56 = vmul.f32 %v3675_v28, %v403_v18  ;;  %v930_v59 = vadd.f32 %v866_v57, %v732_v46  ;;  %v1063_v49 = vmul.f32 %v3730_v50, %v404_v35 }
  0xd1   :  { %5408 = vst [vmem:[#allocation69_spill] sm:$0xff] %v3857_v58  ;;  %v1520_v9 = vadd.f32 %v1456_v20, %v1321_v27  ;;  %v340_v45 = vmul.f32 %v3622_v7, %v271_v24  ;;  %v473_v52 = vmul.f32 %v3628_v61, %v404_v35  ;;  %v669_v60 = vmul.f32 %v3659_v41, %v600_v8 }
  0xd2   :  { %v3867_v22 = vsel %vm17_vm0, %v3832_v14, 0.0  ;;  %v3870_v37 = vsel %vm17_vm0, %v2107_v34, 0.0  ;;  %v1521_v63 = vadd.f32 %v1457_v53, %v1322_v5  ;;  %v1654_v18 = vmul.f32 %v3675_v28, %v404_v35 }
  0xd3   :  { %5409 = vst [vmem:[#allocation70_spill] sm:$0xff] %v3870_v37  ;;  %v3875_v6 = vsel %vm17_vm0, %v3852_v23, 0.0  ;;  %v2108_v24 = vmul.f32 %v3852_v23, %v3852_v23  ;;  %v1323_v33 = vadd.f32 %v1259_v1, %v1126_v36  ;;  %v1458_v0 = vmul.f32 %v3642_v19, %v272_v4 }
  0xd4   :  { %v3881_v51 = vadd.f32 %v3168_v15, %v1716_v11  ;;  %v2109_v39 = vmul.f32 %v3857_v58, %v3857_v58  ;;  %v1127_v46 = vadd.f32 %v1063_v49, %v930_v59  ;;  %v1260_v16 = vmul.f32 %v3744_v2, %v601_v42  ;;  %v405_v15 = vld [vmem:[#allocation2 + $0x1f9] sm:$0xff] }
  0xd5   :  { %v1717_v26 = vadd.f32 %v1653_v56, %v1520_v9  ;;  %v537_v57 = vadd.f32 %v473_v52, %v340_v45  ;;  %v733_v27 = vadd.f32 %v669_v60, %v536_v29  ;;  %v867_v20 = vmul.f32 %v3712_v62, %v272_v4  ;;  %v273_v56 = vld [vmem:[#allocation2 + $0x200] sm:$0xff] }
  0xd6   :  { %5410 = vst [vmem:[#allocation71_spill] sm:$0xff] %v3881_v51  ;;  %v1718_v34 = vadd.f32 %v1654_v18, %v1521_v63  ;;  %v1850_v5 = vmul.f32 %v3648_v10, %v600_v8  ;;  %v670_v35 = vmul.f32 %v3659_v41, %v601_v42  ;;  %v1851_v53 = vmul.f32 %v3648_v10, %v601_v42  ;;  %v406_v9 = vld [vmem:[#allocation2 + $0x201] sm:$0xff] }
  0xd7   :  { %v3892_v11 = vsel %vm17_vm0, %v3857_v58, 0.0  ;;  %v3895_v36 = vsel %vm17_vm0, %v2108_v24, 0.0  ;;  %v1522_v1 = vadd.f32 %v1458_v0, %v1323_v33  ;;  %v1655_v29 = vmul.f32 %v3675_v28, %v405_v15  ;;  %v602_v0 = vld [vmem:[#allocation2 + $0x1fa] sm:$0xff] }
  0xd8   :  { %5411 = vst [vmem:[#allocation72_spill] sm:$0xff] %v3892_v11  ;;  %5412 = vst [vmem:[#allocation73_spill] sm:$0xff] %v3895_v36  ;;  %v2110_v59 = vmul.f32 %v3881_v51, %v3881_v51  ;;  %v3901_v8 = vsel %vm17_vm0, %v2109_v39, 0.0  ;;  %v1324_v49 = vadd.f32 %v1260_v16, %v1127_v46  ;;  %v1459_v45 = vmul.f32 %v3642_v19, %v273_v56  ;;  %v279_v11 = vld [vmem:[#allocation2 + $0x248] sm:$0xff] }
  0xd9   :  { %5413 = vst [vmem:[#allocation74_spill] sm:$0xff] %v3901_v8  ;;  %v341_v52 = vmul.f32 %v3622_v7, %v272_v4  ;;  %v474_v60 = vmul.f32 %v3628_v61, %v405_v15  ;;  %v931_v63 = vadd.f32 %v867_v20, %v733_v27  ;;  %v1064_v18 = vmul.f32 %v3730_v50, %v405_v15 }
  0xda   :  { %v3907_v24 = vadd.f32 %v1850_v5, %v1717_v26  ;;  %v734_v33 = vadd.f32 %v670_v35, %v537_v57  ;;  %v3909_v42 = vadd.f32 %v1851_v53, %v1718_v34  ;;  %v868_v39 = vmul.f32 %v3712_v62, %v273_v56  ;;  %v603_v34 = vld [vmem:[#allocation2 + $0x202] sm:$0xff] }
  0xdb   :  { %v1719_v58 = vadd.f32 %v1655_v29, %v1522_v1  ;;  %v342_v46 = vmul.f32 %v3622_v7, %v273_v56  ;;  %v475_v16 = vmul.f32 %v3628_v61, %v406_v9  ;;  %v1852_v4 = vmul.f32 %v3648_v10, %v602_v0  ;;  %v274_v1 = vld [vmem:[#allocation2 + $0x210] sm:$0xff] }
  0xdc   :  { %5414 = vst [vmem:[#allocation75_spill] sm:$0xff] %v3907_v24  ;;  %5415 = vst [vmem:[#allocation76_spill] sm:$0xff] %v3909_v42  ;;  %v3917_v27 = vsel %vm17_vm0, %v3881_v51, 0.0  ;;  %v3920_v26 = vsel %vm17_vm0, %v2110_v59, 0.0  ;;  %v1523_v57 = vadd.f32 %v1459_v45, %v1324_v49  ;;  %v1656_v20 = vmul.f32 %v3675_v28, %v406_v9  ;;  %v407_v29 = vld [vmem:[#allocation2 + $0x211] sm:$0xff] }
  0xdd   :  { %5416 = vst [vmem:[#allocation77_spill] sm:$0xff] %v3917_v27  ;;  %5417 = vst [vmem:[#allocation78_spill] sm:$0xff] %v3920_v26  ;;  %v538_v5 = vadd.f32 %v474_v60, %v341_v52  ;;  %v1128_v35 = vadd.f32 %v1064_v18, %v931_v63  ;;  %v671_v53 = vmul.f32 %v3659_v41, %v602_v0  ;;  %v3927_v56 = vsel %vm17_vm0, %v3907_v24, 0.0  ;;  %v275_v18 = vld [vmem:[#allocation2 + $0x218] sm:$0xff] }
  0xde   :  { %v1261_v15 = vmul.f32 %v3744_v2, %v602_v0  ;;  %5418 = vst [vmem:[#allocation79_spill] sm:$0xff] %v3927_v56  ;;  %v2111_v59 = vmul.f32 %v3907_v24, %v3907_v24  ;;  %v932_v51 = vadd.f32 %v868_v39, %v734_v33  ;;  %v1065_v49 = vmul.f32 %v3730_v50, %v406_v9  ;;  %v408_v0 = vld [vmem:[#allocation2 + $0x219] sm:$0xff] }
  0xdf   :  { %v2112_v45 = vmul.f32 %v3909_v42, %v3909_v42  ;;  %v539_v52 = vadd.f32 %v475_v16, %v342_v46  ;;  %v3934_v60 = vadd.f32 %v1852_v4, %v1719_v58  ;;  %v672_v63 = vmul.f32 %v3659_v41, %v603_v34  ;;  %v604_v46 = vld [vmem:[#allocation2 + $0x212] sm:$0xff] }
  0xe0   :  { %v1720_v23 = vadd.f32 %v1656_v20, %v1523_v57  ;;  %v1853_v14 = vmul.f32 %v3648_v10, %v603_v34  ;;  %v343_v3 = vmul.f32 %v3622_v7, %v274_v1  ;;  %v476_v24 = vmul.f32 %v3628_v61, %v407_v29 }
  0xe1   :  { %5419 = vst [vmem:[#allocation80_spill] sm:$0xff] %v3934_v60  ;;  %v735_v33 = vadd.f32 %v671_v53, %v538_v5  ;;  %v1325_v39 = vadd.f32 %v1261_v15, %v1128_v35  ;;  %v869_v9 = vmul.f32 %v3712_v62, %v274_v1  ;;  %v1460_v21 = vmul.f32 %v3642_v19, %v274_v1 }
  0xe2   :  { %v1129_v58 = vadd.f32 %v1065_v49, %v932_v51  ;;  %v1262_v16 = vmul.f32 %v3744_v2, %v603_v34  ;;  %v344_v4 = vmul.f32 %v3622_v7, %v275_v18  ;;  %v477_v57 = vmul.f32 %v3628_v61, %v408_v0  ;;  %v605_v51 = vld [vmem:[#allocation2 + $0x21a] sm:$0xff]  ;;  %v276_v49 = vld [vmem:[#allocation2 + $0x228] sm:$0xff] }
  0xe3   :  { %v3946_v20 = vsel %vm17_vm0, %v2111_v59, 0.0  ;;  %v3950_v26 = vsel %vm17_vm0, %v3909_v42, 0.0  ;;  %v3953_v5 = vsel %vm17_vm0, %v2112_v45, 0.0  ;;  %v2113_v35 = vmul.f32 %v3934_v60, %v3934_v60  ;;  %v409_v59 = vld [vmem:[#allocation2 + $0x229] sm:$0xff] }
  0xe4   :  { %5420 = vst [vmem:[#allocation81_spill] sm:$0xff] %v3946_v20  ;;  %5421 = vst [vmem:[#allocation82_spill] sm:$0xff] %v3950_v26  ;;  %v736_v53 = vadd.f32 %v672_v63, %v539_v52  ;;  %v3957_v34 = vadd.f32 %v1853_v14, %v1720_v23  ;;  %v540_v15 = vadd.f32 %v476_v24, %v343_v3  ;;  %v3964_v45 = vsel %vm17_vm0, %v3934_v60, 0.0  ;;  %v410_v63 = vld [vmem:[#allocation2 + $0x231] sm:$0xff] }
  0xe5   :  { %5422 = vst [vmem:[#allocation83_spill] sm:$0xff] %v3953_v5  ;;  %v673_v1 = vmul.f32 %v3659_v41, %v604_v46  ;;  %v933_v20 = vadd.f32 %v869_v9, %v735_v33  ;;  %v1066_v8 = vmul.f32 %v3730_v50, %v407_v29  ;;  %v1524_v42 = vadd.f32 %v1460_v21, %v1325_v39  ;;  %v277_v21 = vld [vmem:[#allocation2 + $0x230] sm:$0xff] }
  0xe6   :  { %5423 = vst [vmem:[#allocation84_spill] sm:$0xff] %v3957_v34  ;;  %v1657_v26 = vmul.f32 %v3675_v28, %v407_v29  ;;  %5424 = vst [vmem:[#allocation85_spill] sm:$0xff] %v3964_v45  ;;  %v1326_v5 = vadd.f32 %v1262_v16, %v1129_v58  ;;  %v541_v56 = vadd.f32 %v477_v57, %v344_v4  ;;  %v3968_v3 = vsel %vm17_vm0, %v2113_v35, 0.0  ;;  %v3979_v58 = vld [vmem:[#allocation2 + $0x22a] sm:$0xff] }
  0xe7   :  { %v674_v14 = vmul.f32 %v3659_v41, %v605_v51  ;;  %5425 = vst [vmem:[#allocation86_spill] sm:$0xff] %v3968_v3  ;;  %v870_v23 = vmul.f32 %v3712_v62, %v275_v18  ;;  %v345_v24 = vmul.f32 %v3622_v7, %v276_v49  ;;  %v478_v52 = vmul.f32 %v3628_v61, %v409_v59 }
  0xe8   :  { %v3975_v29 = vsel %vm17_vm0, %v3957_v34, 0.0  ;;  %v737_v33 = vadd.f32 %v673_v1, %v540_v15  ;;  %v1461_v39 = vmul.f32 %v3642_v19, %v275_v18  ;;  %v871_v9 = vmul.f32 %v3712_v62, %v276_v49 }
  0xe9   :  { %5426 = vst [vmem:[#allocation87_spill] sm:$0xff] %v3975_v29  ;;  %v1130_v16 = vadd.f32 %v1066_v8, %v933_v20  ;;  %v1721_v4 = vadd.f32 %v1657_v26, %v1524_v42  ;;  %v1263_v57 = vmul.f32 %v3744_v2, %v604_v46  ;;  %v1854_v35 = vmul.f32 %v3648_v10, %v604_v46  ;;  %v3989_v8 = vld [vmem:[#allocation2 + $0x232] sm:$0xff]  ;;  %v278_v20 = vld [vmem:[#allocation2 + $0x240] sm:$0xff] }
  0xea   :  { %v738_v60 = vadd.f32 %v674_v14, %v541_v56  ;;  %v346_v3 = vmul.f32 %v3622_v7, %v277_v21  ;;  %v479_v45 = vmul.f32 %v3628_v61, %v410_v63  ;;  %v872_v29 = vmul.f32 %v3712_v62, %v277_v21 }
  0xeb   :  { %v934_v15 = vadd.f32 %v870_v23, %v736_v53  ;;  %v1067_v18 = vmul.f32 %v3730_v50, %v408_v0  ;;  %v542_v1 = vadd.f32 %v478_v52, %v345_v24  ;;  %v675_v36 = vmul.f32 %v3659_v41, %v3979_v58 }
  0xec   :  { %v1525_v42 = vadd.f32 %v1461_v39, %v1326_v5  ;;  %v1658_v26 = vmul.f32 %v3675_v28, %v408_v0  ;;  %v935_v46 = vadd.f32 %v871_v9, %v737_v33  ;;  %v1068_v56 = vmul.f32 %v3730_v50, %v409_v59 }
  0xed   :  { %v2114_v14 = vmul.f32 %v3957_v34, %v3957_v34  ;;  %v1327_v27 = vadd.f32 %v1263_v57, %v1130_v16  ;;  %v3995_v53 = vadd.f32 %v1854_v35, %v1721_v4  ;;  %v1462_v23 = vmul.f32 %v3642_v19, %v276_v49 }
  0xee   :  { %v543_v24 = vadd.f32 %v479_v45, %v346_v3  ;;  %v936_v52 = vadd.f32 %v872_v29, %v738_v60  ;;  %v1069_v37 = vmul.f32 %v3730_v50, %v410_v63  ;;  %v676_v5 = vmul.f32 %v3659_v41, %v3989_v8 }
  0xef   :  { %5427 = vst [vmem:[#allocation88_spill] sm:$0xff] %v3995_v53  ;;  %v1131_v0 = vadd.f32 %v1067_v18, %v934_v15  ;;  %v1264_v33 = vmul.f32 %v3744_v2, %v605_v51  ;;  %v739_v39 = vadd.f32 %v675_v36, %v542_v1  ;;  %v873_v9 = vmul.f32 %v3712_v62, %v278_v20 }
  0xf0   :  { %v1722_v34 = vadd.f32 %v1658_v26, %v1525_v42  ;;  %v1855_v16 = vmul.f32 %v3648_v10, %v605_v51  ;;  %v1132_v4 = vadd.f32 %v1068_v56, %v935_v46  ;;  %v1265_v49 = vmul.f32 %v3744_v2, %v3979_v58  ;;  %v411_v51 = vld [vmem:[#allocation2 + $0x241] sm:$0xff] }
  0xf1   :  { %v4007_v60 = vsel %vm17_vm0, %v2114_v14, 0.0  ;;  %v4011_v45 = vsel %vm17_vm0, %v3995_v53, 0.0  ;;  %v1526_v3 = vadd.f32 %v1462_v23, %v1327_v27  ;;  %v1659_v36 = vmul.f32 %v3675_v28, %v409_v59 }
  0xf2   :  { %v1133_v29 = vadd.f32 %v1069_v37, %v936_v52  ;;  %v740_v57 = vadd.f32 %v676_v5, %v543_v24  ;;  %v1266_v35 = vmul.f32 %v3744_v2, %v3989_v8  ;;  %v874_v15 = vmul.f32 %v3712_v62, %v279_v11  ;;  %v412_v52 = vld [vmem:[#allocation2 + $0x249] sm:$0xff] }
  0xf3   :  { %v1328_v18 = vadd.f32 %v1264_v33, %v1131_v0  ;;  %v1463_v1 = vmul.f32 %v3642_v19, %v277_v21  ;;  %v937_v42 = vadd.f32 %v873_v9, %v739_v39  ;;  %v1070_v26 = vmul.f32 %v3730_v50, %v411_v51  ;;  %v608_v5 = vld [vmem:[#allocation2 + $0x242] sm:$0xff] }
  0xf4   :  { %v2115_v46 = vmul.f32 %v3995_v53, %v3995_v53  ;;  %v4021_v27 = vadd.f32 %v1855_v16, %v1722_v34  ;;  %v1329_v59 = vadd.f32 %v1265_v49, %v1132_v4  ;;  %v1464_v37 = vmul.f32 %v3642_v19, %v278_v20  ;;  %v413_v53 = vld [vmem:[#allocation2 + $0x259] sm:$0xff] }
  0xf5   :  { %v1723_v56 = vadd.f32 %v1659_v36, %v1526_v3  ;;  %v1660_v14 = vmul.f32 %v3675_v28, %v410_v63  ;;  %v347_v23 = vmul.f32 %v3622_v7, %v278_v20  ;;  %v480_v24 = vmul.f32 %v3628_v61, %v411_v51 }
  0xf6   :  { %5428 = vst [vmem:[#allocation89_spill] sm:$0xff] %v4021_v27  ;;  %v1330_v21 = vadd.f32 %v1266_v35, %v1133_v29  ;;  %v938_v0 = vadd.f32 %v874_v15, %v740_v57  ;;  %v1071_v33 = vmul.f32 %v3730_v50, %v412_v52  ;;  %v1465_v39 = vmul.f32 %v3642_v19, %v279_v11  ;;  %v609_v35 = vld [vmem:[#allocation2 + $0x24a] sm:$0xff] }
  0xf7   :  { %v1527_v34 = vadd.f32 %v1463_v1, %v1328_v18  ;;  %v1856_v9 = vmul.f32 %v3648_v10, %v3979_v58  ;;  %v1134_v16 = vadd.f32 %v1070_v26, %v937_v42  ;;  %v1267_v4 = vmul.f32 %v3744_v2, %v608_v5 }
  0xf8   :  { %v1528_v63 = vadd.f32 %v1464_v37, %v1329_v59  ;;  %v1661_v20 = vmul.f32 %v3675_v28, %v411_v51  ;;  %v348_v49 = vmul.f32 %v3622_v7, %v279_v11  ;;  %v481_v3 = vmul.f32 %v3628_v61, %v412_v52  ;;  %v280_v11 = vld [vmem:[#allocation2 + $0x258] sm:$0xff] }
  0xf9   :  { %v4036_v36 = vsel %vm17_vm0, %v2115_v46, 0.0  ;;  %v4040_v29 = vsel %vm17_vm0, %v4021_v27, 0.0  ;;  %v544_v57 = vadd.f32 %v480_v24, %v347_v23  ;;  %v677_v58 = vmul.f32 %v3659_v41, %v608_v5 }
  0xfa   :  { %v1135_v15 = vadd.f32 %v1071_v33, %v938_v0  ;;  %v1529_v18 = vadd.f32 %v1465_v39, %v1330_v21  ;;  %v1662_v1 = vmul.f32 %v3675_v28, %v412_v52  ;;  %v1268_v51 = vmul.f32 %v3744_v2, %v609_v35 }
  0xfb   :  { %v2116_v42 = vmul.f32 %v4021_v27, %v4021_v27  ;;  %v4047_v26 = vadd.f32 %v1856_v9, %v1723_v56  ;;  %v1331_v46 = vadd.f32 %v1267_v4, %v1134_v16  ;;  %v1466_v59 = vmul.f32 %v3642_v19, %v280_v11  ;;  %v281_v27 = vld [vmem:[#allocation2 + $0x260] sm:$0xff] }
  0xfc   :  { %v1724_v37 = vadd.f32 %v1660_v14, %v1527_v34  ;;  %v1857_v23 = vmul.f32 %v3648_v10, %v3989_v8  ;;  %v1725_v24 = vadd.f32 %v1661_v20, %v1528_v63  ;;  %v545_v0 = vadd.f32 %v481_v3, %v348_v49 }
  0xfd   :  { %5429 = vst [vmem:[#allocation90_spill] sm:$0xff] %v4047_v26  ;;  %v741_v21 = vadd.f32 %v677_v58, %v544_v57  ;;  %v1858_v52 = vmul.f32 %v3648_v10, %v608_v5  ;;  %v678_v33 = vmul.f32 %v3659_v41, %v609_v35  ;;  %v1859_v39 = vmul.f32 %v3648_v10, %v609_v35  ;;  %v414_v57 = vld [vmem:[#allocation2 + $0x261] sm:$0xff] }
  0xfe   :  { %v1726_v56 = vadd.f32 %v1662_v1, %v1529_v18  ;;  %v1332_v9 = vadd.f32 %v1268_v51, %v1135_v15  ;;  %v875_v16 = vmul.f32 %v3712_v62, %v280_v11  ;;  %v1467_v14 = vmul.f32 %v3642_v19, %v281_v27  ;;  %v610_v18 = vld [vmem:[#allocation2 + $0x25a] sm:$0xff] }
  0xff   :  { %v4058_v34 = vsel %vm17_vm0, %v2116_v42, 0.0  ;;  %v4062_v8 = vsel %vm17_vm0, %v4047_v26, 0.0  ;;  %v1530_v5 = vadd.f32 %v1466_v59, %v1331_v46  ;;  %v1663_v4 = vmul.f32 %v3675_v28, %v413_v53 }
 0x100   :  { %v2117_v63 = vmul.f32 %v4047_v26, %v4047_v26  ;;  %v4067_v20 = vadd.f32 %v1857_v23, %v1724_v37  ;;  %v349_v49 = vmul.f32 %v3622_v7, %v280_v11  ;;  %v482_v3 = vmul.f32 %v3628_v61, %v413_v53 }
 0x101   :  { %v4071_v58 = vadd.f32 %v1858_v52, %v1725_v24  ;;  %v742_v35 = vadd.f32 %v678_v33, %v545_v0  ;;  %v1072_v15 = vmul.f32 %v3730_v50, %v413_v53  ;;  %v876_v1 = vmul.f32 %v3712_v62, %v281_v27 }
 0x102   :  { %5430 = vst [vmem:[#allocation91_spill] sm:$0xff] %v4067_v20  ;;  %v4075_v51 = vadd.f32 %v1859_v39, %v1726_v56  ;;  %v939_v42 = vadd.f32 %v875_v16, %v741_v21  ;;  %v1531_v46 = vadd.f32 %v1467_v14, %v1332_v9  ;;  %v1664_v59 = vmul.f32 %v3675_v28, %v414_v57  ;;  %v611_v21 = vld [vmem:[#allocation2 + $0x262] sm:$0xff]  ;;  %v282_v16 = vld [vmem:[#allocation2 + $0x270] sm:$0xff] }
 0x103   :  { %5431 = vst [vmem:[#allocation92_spill] sm:$0xff] %v4071_v58  ;;  %v1727_v37 = vadd.f32 %v1663_v4, %v1530_v5  ;;  %v350_v11 = vmul.f32 %v3622_v7, %v281_v27  ;;  %v483_v23 = vmul.f32 %v3628_v61, %v414_v57  ;;  %v1860_v24 = vmul.f32 %v3648_v10, %v610_v18 }
 0x104   :  { %5432 = vst [vmem:[#allocation93_spill] sm:$0xff] %v4075_v51  ;;  %v4082_v0 = vsel %vm17_vm0, %v2117_v63, 0.0  ;;  %v2118_v53 = vmul.f32 %v4067_v20, %v4067_v20  ;;  %v546_v52 = vadd.f32 %v482_v3, %v349_v49  ;;  %v679_v33 = vmul.f32 %v3659_v41, %v610_v18  ;;  %v415_v49 = vld [vmem:[#allocation2 + $0x271] sm:$0xff] }
 0x105   :  { %5433 = vst [vmem:[#allocation94_spill] sm:$0xff] %v4082_v0  ;;  %v4089_v39 = vsel %vm17_vm0, %v4067_v20, 0.0  ;;  %v2119_v27 = vmul.f32 %v4071_v58, %v4071_v58  ;;  %v940_v56 = vadd.f32 %v876_v1, %v742_v35  ;;  %v1073_v9 = vmul.f32 %v3730_v50, %v414_v57 }
 0x106   :  { %v1136_v14 = vadd.f32 %v1072_v15, %v939_v42  ;;  %v1269_v5 = vmul.f32 %v3744_v2, %v610_v18  ;;  %v1728_v4 = vadd.f32 %v1664_v59, %v1531_v46  ;;  %v1861_v63 = vmul.f32 %v3648_v10, %v611_v21  ;;  %v234_v59 = vld [vmem:[#allocation2] sm:$0xff] }
 0x107   :  { %v2120_v3 = vmul.f32 %v4075_v51, %v4075_v51  ;;  %v547_v26 = vadd.f32 %v483_v23, %v350_v11  ;;  %v4098_v20 = vadd.f32 %v1860_v24, %v1727_v37  ;;  %v680_v0 = vmul.f32 %v3659_v41, %v611_v21 }
 0x108   :  { %v4102_v35 = vsel %vm17_vm0, %v2118_v53, 0.0  ;;  %v4106_v57 = vsel %vm17_vm0, %v4071_v58, 0.0  ;;  %v743_v15 = vadd.f32 %v679_v33, %v546_v52  ;;  %v877_v18 = vmul.f32 %v3712_v62, %v282_v16  ;;  %v367_v53 = vld [vmem:[#allocation2 + $0x1] sm:$0xff]  ;;  %v4136_v58 = vld [vmem:[#allocation2 + $0x272] sm:$0xff] }
 0x109   :  { %5434 = vst [vmem:[#allocation95_spill] sm:$0xff] %v4098_v20  ;;  %v1137_v10 = vadd.f32 %v1073_v9, %v940_v56  ;;  %v1270_v1 = vmul.f32 %v3744_v2, %v611_v21  ;;  %v351_v42 = vmul.f32 %v3622_v7, %v282_v16  ;;  %v484_v46 = vmul.f32 %v3628_v61, %v415_v49  ;;  %v283_v9 = vld [vmem:[#allocation2 + $0x278] sm:$0xff] }
 0x10a   :  { %v4113_v37 = vsel %vm17_vm0, %v2119_v27, 0.0  ;;  %v1333_v11 = vadd.f32 %v1269_v5, %v1136_v14  ;;  %v4115_v23 = vadd.f32 %v1861_v63, %v1728_v4  ;;  %v1468_v24 = vmul.f32 %v3642_v19, %v282_v16  ;;  %v416_v27 = vld [vmem:[#allocation2 + $0x279] sm:$0xff]  ;;  %v564_v4 = vld [vmem:[#allocation2 + $0x2] sm:$0xff] }
 0x10b   :  { %v4120_v52 = vsel %vm17_vm0, %v4075_v51, 0.0  ;;  %v4123_v33 = vsel %vm17_vm0, %v2120_v3, 0.0  ;;  %v2121_v21 = vmul.f32 %v4098_v20, %v4098_v20  ;;  %v744_v56 = vadd.f32 %v680_v0, %v547_v26 }
 0x10c   :  { %5435 = vst [vmem:[#allocation96_spill] sm:$0xff] %v4115_v23  ;;  %5436 = vst [vmem:[#allocation97_spill] sm:$0xff] %v4123_v33  ;;  %v4129_v14 = vsel %vm17_vm0, %v4098_v20, 0.0  ;;  %v941_v5 = vadd.f32 %v877_v18, %v743_v15  ;;  %v1074_v19 = vmul.f32 %v3730_v50, %v415_v49  ;;  %v303_v16 = vmul.f32 %v3622_v7, %v234_v59  ;;  %v761_v33 = vld [vmem:[#allocation2 + $0x18] sm:$0xff] }
 0x10d   :  { %v4133_v63 = vadd.f32 %v1270_v1, %v1137_v10  ;;  %v548_v3 = vadd.f32 %v484_v46, %v351_v42  ;;  %v1665_v51 = vmul.f32 %v3675_v28, %v415_v49  ;;  %v436_v26 = vmul.f32 %v3628_v61, %v367_v53  ;;  %v959_v46 = vld [vmem:[#allocation2 + $0x19] sm:$0xff] }
 0x10e   :  { %v2122_v0 = vmul.f32 %v4115_v23, %v4115_v23  ;;  %v1532_v20 = vadd.f32 %v1468_v24, %v1333_v11  ;;  %v352_v15 = vmul.f32 %v3622_v7, %v283_v9  ;;  %v485_v18 = vmul.f32 %v3628_v61, %v416_v27 }
 0x10f   :  { %v4144_v59 = vsel %vm17_vm0, %v2121_v21, 0.0  ;;  %v500_v10 = vadd.f32 %v436_v26, %v303_v16  ;;  %v633_v1 = vmul.f32 %v3659_v41, %v564_v4  ;;  %v896_v28 = vadd.f32 %v3197_v47, %v3174_v30  ;;  %v1355_v4 = vld [vmem:[#allocation2 + $0x38] sm:$0xff] }
 0x110   :  { %5437 = vst [vmem:[#allocation98_spill] sm:$0xff] %v4144_v59  ;;  %v4151_v49 = vsel %vm17_vm0, %v4115_v23, 0.0  ;;  %v1138_v42 = vadd.f32 %v1074_v19, %v941_v5  ;;  %v681_v7 = vmul.f32 %v3659_v41, %v4136_v58  ;;  %v1094_v61 = vadd.f32 %v3210_v17, %v3224_v12  ;;  %v1156_v19 = vld [vmem:[#allocation2 + $0x1a] sm:$0xff]  ;;  %v1751_v59 = vld [vmem:[#allocation2 + $0x4a] sm:$0xff] }
 0x111   :  { %5438 = vst [vmem:[#allocation99_spill] sm:$0xff] %v4151_v49  ;;  %v878_v11 = vmul.f32 %v3712_v62, %v283_v9  ;;  %v697_v24 = vadd.f32 %v633_v1, %v500_v10  ;;  %v831_v53 = vmul.f32 %v3712_v62, %v761_v33  ;;  %v1093_v21 = vadd.f32 %v3206_v43, %v896_v28  ;;  %v2587_v62 = vld [vmem:[#allocation2 + $0x22] sm:$0xff]  ;;  %v1354_v33 = vld [vmem:[#allocation2 + $0x30] sm:$0xff] }
 0x112   :  { %v4161_v30 = vsel %vm17_vm0, %v2122_v0, 0.0  ;;  %v4163_v47 = vadd.f32 %v1665_v51, %v1532_v20  ;;  %v4165_v5 = vadd.f32 %v485_v18, %v352_v15  ;;  %v4168_v41 = vmul.f32 %v3730_v50, %v416_v27  ;;  %v4179_v20 = vld [vmem:[%s5280_s1 + $0x8] ss:$0 sm:$0xff]  ;;  %v5440_v15 = vld [vmem:[#allocation6_spill] sm:$0xff] }
 0x113   :  { %5439 = vst [vmem:[#allocation100_spill] sm:$0xff] %v4161_v30  ;;  %v1271_v17 = vmul.f32 %v3744_v2, %v4136_v58  ;;  %v895_v12 = vadd.f32 %v831_v53, %v697_v24  ;;  %v1028_v16 = vmul.f32 %v3730_v50, %v959_v46  ;;  %v1226_v43 = vmul.f32 %v2587_v62, %v3744_v2  ;;  %v1553_v50 = vld [vmem:[#allocation2 + $0x39] sm:$0xff]  ;;  %v5441_v53 = vld [vmem:[#allocation8_spill] sm:$0xff] }
 0x114   :  { %v4174_v26 = vadd.f32 %v681_v7, %v548_v3  ;;  %v1469_v51 = vmul.f32 %v4179_v20, %v283_v9  ;;  %v1291_v0 = vadd.f32 %v3228_v13, %v1094_v61  ;;  %v1292_v18 = vadd.f32 %v5440_v15, %v3238_v38  ;;  %v1554_v3 = vld [vmem:[#allocation2 + $0x49] sm:$0xff]  ;;  %v1749_v30 = vld [vmem:[#allocation2 + $0x32] sm:$0xff] }
 0x115   :  { %v942_v10 = vadd.f32 %v878_v11, %v744_v56  ;;  %v1092_v1 = vadd.f32 %v1028_v16, %v895_v12  ;;  %v1225_v28 = vmul.f32 %v3744_v2, %v1156_v19  ;;  %v1290_v46 = vadd.f32 %v1226_v43, %v1093_v21  ;;  %v4189_v7 = vld [vmem:[%s5280_s1 + $0x9] ss:$0 sm:$0xff]  ;;  %v1552_v56 = vld [vmem:[#allocation2 + $0x31] sm:$0xff]  ;;  %v5442_v21 = vld [vmem:[#allocation7_spill] sm:$0xff] }
 0x116   :  { %v1666_v24 = vmul.f32 %v4189_v7, %v416_v27  ;;  %v1424_v9 = vmul.f32 %v4179_v20, %v1354_v33  ;;  %v1425_v13 = vmul.f32 %v4179_v20, %v1355_v4  ;;  %v2590_v61 = vld [vmem:[#allocation2 + $0x48] sm:$0xff]  ;;  %v1491_v19 = vadd.f32 %v5441_v53, %v1292_v18  ;;  %v5443_v12 = vld [vmem:[#allocation9_spill] sm:$0xff]  ;;  %v1750_v43 = vld [vmem:[#allocation2 + $0x3a] sm:$0xff] }
 0x117   :  { %v1426_v38 = vmul.f32 %v2590_v61, %v4179_v20  ;;  %v1289_v11 = vadd.f32 %v1225_v28, %v1092_v1  ;;  %v1492_v16 = vadd.f32 %v5443_v12, %v5442_v21  ;;  %v1622_v62 = vmul.f32 %v4189_v7, %v1553_v50  ;;  %v2591_v33 = vld [vmem:[#allocation2 + $0x51] sm:$0xff]  ;;  %v4206_v18 = vld [vmem:[%s5280_s1 + $0xa] ss:$0 sm:$0xff]  ;;  %v613_v1 = vld [vmem:[#allocation2 + $0x27a] sm:$0xff] }
 0x118   :  { %v1489_v15 = vadd.f32 %v1425_v13, %v1290_v46  ;;  %v1623_v27 = vmul.f32 %v4189_v7, %v1554_v3  ;;  %v1624_v4 = vmul.f32 %v2591_v33, %v4189_v7  ;;  %v4201_v61 = vadd.f32 %v1271_v17, %v1138_v42 }
 0x119   :  { %v1490_v23 = vadd.f32 %v1426_v38, %v1291_v0  ;;  %v1862_v50 = vmul.f32 %v4206_v18, %v4136_v58  ;;  %v1488_v28 = vadd.f32 %v1424_v9, %v1289_v11  ;;  %v1621_v0 = vmul.f32 %v4189_v7, %v1552_v56  ;;  %v1752_v38 = vld [vmem:[#allocation2 + $0x52] sm:$0xff]  ;;  %v4218_v58 = vld [vmem:[%s5280_s1 + $0x2] ss:$0 sm:$0xff] }
 0x11a   :  { %v1533_v46 = vadd.f32 %v1469_v51, %v4133_v63  ;;  %v1686_v3 = vadd.f32 %v1622_v62, %v1489_v15  ;;  %v1819_v42 = vmul.f32 %v4206_v18, %v1750_v43  ;;  %v1688_v53 = vadd.f32 %v1624_v4, %v1491_v19  ;;  %v284_v51 = vld [vmem:[#allocation2 + $0x288] sm:$0xff]  ;;  %v4243_v4 = vld [vmem:[%s5280_s1] ss:$0 sm:$0xff] }
 0x11b   :  { %v1687_v13 = vadd.f32 %v1623_v27, %v1490_v23  ;;  %v1685_v17 = vadd.f32 %v1621_v0, %v1488_v28  ;;  %v1818_v21 = vmul.f32 %v4206_v18, %v1749_v30  ;;  %v1820_v12 = vmul.f32 %v4206_v18, %v1751_v59  ;;  %v5444_v23 = vld [vmem:[#allocation10_spill] sm:$0xff]  ;;  %v4225_v62 = vld [vmem:[#allocation2 + $0x289] sm:$0xff] }
 0x11c   :  { %v682_v9 = vmul.f32 %v4218_v58, %v613_v1  ;;  %v1272_v63 = vmul.f32 %v3744_v2, %v613_v1  ;;  %v1689_v56 = vadd.f32 %v5444_v23, %v1492_v16  ;;  %v4223_v11 = vadd.f32 %v1819_v42, %v1686_v3  ;;  %v2594_v19 = vld [vmem:[#allocation2 + $0x62] sm:$0xff]  ;;  %v5449_v0 = vld [vmem:[#allocation13_spill] sm:$0xff] }
 0x11d   :  { %v1821_v30 = vmul.f32 %v4206_v18, %v1752_v38  ;;  %v1822_v59 = vmul.f32 %v2594_v19, %v4206_v18  ;;  %v4229_v43 = vadd.f32 %v1818_v21, %v1685_v17  ;;  %v4231_v15 = vadd.f32 %v1820_v12, %v1687_v13  ;;  %v5450_v3 = vld [vmem:[#allocation12_spill] sm:$0xff]  ;;  %v4277_v21 = vld [vmem:[%s5280_s1 + $0x4] ss:$0 sm:$0xff] }
 0x11e   :  { %5445 = vst [vmem:[#allocation6_spill] sm:$0xff] %v4223_v11  ;;  %v1139_v27 = vadd.f32 %v4168_v41, %v942_v10  ;;  %v4235_v2 = vadd.f32 %v1862_v50, %v4163_v47  ;;  %v1863_v16 = vmul.f32 %v4206_v18, %v613_v1  ;;  %v1947_v33 = vsel %vm17_vm0, %v4223_v11, 0.0  ;;  %v4258_v50 = vld [vmem:[%s5280_s1 + $0x1] ss:$0 sm:$0xff] }
 0x11f   :  { %5446 = vst [vmem:[#allocation8_spill] sm:$0xff] %v4229_v43  ;;  %5447 = vst [vmem:[#allocation7_spill] sm:$0xff] %v4231_v15  ;;  %v353_v28 = vmul.f32 %v4243_v4, %v284_v51  ;;  %v1690_v13 = vadd.f32 %v5450_v3, %v5449_v0  ;;  %v4248_v38 = vadd.f32 %v1821_v30, %v1688_v53  ;;  %v1946_v47 = vsel %vm17_vm0, %v4229_v43, 0.0  ;;  %v5454_v30 = vld [vmem:[#allocation14_spill] sm:$0xff] }
 0x120   :  { %5448 = vst [vmem:[#allocation9_spill] sm:$0xff] %v4235_v2  ;;  %v1730_v41 = vadd.f32 %v1666_v24, %v1533_v46  ;;  %v4253_v10 = vadd.f32 %v682_v9, %v4165_v5  ;;  %v486_v1 = vmul.f32 %v4258_v50, %v4225_v62  ;;  %v1948_v42 = vadd.f32 %v1947_v33, %v1946_v47 }
 0x121   :  { %5451 = vst [vmem:[#allocation10_spill] sm:$0xff] %v4248_v38  ;;  %v4262_v17 = vadd.f32 %v1822_v59, %v1689_v56  ;;  %v1949_v53 = vsel %vm17_vm0, %v4231_v15, 0.0  ;;  %v2079_v24 = vmul.f32 %v4229_v43, %v4229_v43  ;;  %v2080_v5 = vmul.f32 %v4223_v11, %v4223_v11 }
 0x122   :  { %v4272_v46 = vsel %vm17_vm0, %v4235_v2, 0.0  ;;  %v879_v12 = vmul.f32 %v4277_v21, %v284_v51  ;;  %v1950_v9 = vadd.f32 %v1949_v53, %v1948_v42  ;;  %v2081_v23 = vmul.f32 %v4231_v15, %v4231_v15  ;;  %v4296_v53 = vld [vmem:[%s5280_s1 + $0x5] ss:$0 sm:$0xff] }
 0x123   :  { %5452 = vst [vmem:[#allocation13_spill] sm:$0xff] %v4262_v17  ;;  %5453 = vst [vmem:[#allocation12_spill] sm:$0xff] %v4272_v46  ;;  %v2123_v56 = vmul.f32 %v4235_v2, %v4235_v2  ;;  %v4285_v19 = vadd.f32 %v5454_v30, %v1690_v13  ;;  %v1951_v59 = vsel %vm17_vm0, %v4248_v38, 0.0  ;;  %v2143_v33 = vsel %vm17_vm0, %v2079_v24, 0.0  ;;  %v5456_v30 = vld [vmem:[#allocation15_spill] sm:$0xff]  ;;  %v5457_v2 = vld [vmem:[#allocation16_spill] sm:$0xff] }
 0x124   :  { %v1336_v0 = vadd.f32 %v1272_v63, %v1139_v27  ;;  %v1952_v3 = vadd.f32 %v1951_v59, %v1950_v9  ;;  %v2082_v47 = vmul.f32 %v4248_v38, %v4248_v38  ;;  %v2144_v42 = vsel %vm17_vm0, %v2080_v5, 0.0  ;;  %v285_v9 = vld [vmem:[#allocation2 + $0x290] sm:$0xff] }
 0x125   :  { %5455 = vst [vmem:[#allocation14_spill] sm:$0xff] %v4285_v19  ;;  %v1076_v13 = vmul.f32 %v4296_v53, %v4225_v62  ;;  %v4302_v15 = vadd.f32 %v5457_v2, %v5456_v30  ;;  %v1953_v63 = vsel %vm17_vm0, %v4262_v17, 0.0  ;;  %v2145_v27 = vadd.f32 %v2144_v42, %v2143_v33  ;;  %v418_v5 = vld [vmem:[#allocation2 + $0x291] sm:$0xff] }
 0x126   :  { %v4306_v24 = vadd.f32 %v1863_v16, %v1730_v41  ;;  %v1954_v59 = vadd.f32 %v1953_v63, %v1952_v3  ;;  %v2083_v38 = vmul.f32 %v4262_v17, %v4262_v17  ;;  %v2146_v11 = vsel %vm17_vm0, %v2081_v23, 0.0  ;;  %v5460_v63 = vld [vmem:[#allocation17_spill] sm:$0xff] }
 0x127   :  { %5458 = vst [vmem:[#allocation15_spill] sm:$0xff] %v4302_v15  ;;  %v550_v43 = vadd.f32 %v486_v1, %v353_v28  ;;  %v943_v46 = vadd.f32 %v879_v12, %v4174_v26  ;;  %v1955_v2 = vsel %vm17_vm0, %v4285_v19, 0.0  ;;  %v2147_v30 = vadd.f32 %v2146_v11, %v2145_v27 }
 0x128   :  { %5459 = vst [vmem:[#allocation16_spill] sm:$0xff] %v4306_v24  ;;  %v1470_v49 = vmul.f32 %v4179_v20, %v284_v51  ;;  %v1956_v33 = vadd.f32 %v1955_v2, %v1954_v59  ;;  %v2084_v16 = vmul.f32 %v4285_v19, %v4285_v19  ;;  %v2148_v41 = vsel %vm17_vm0, %v2082_v47, 0.0 }
 0x129   :  { %v354_v3 = vmul.f32 %v4243_v4, %v285_v9  ;;  %v487_v42 = vmul.f32 %v4258_v50, %v418_v5  ;;  %v1957_v28 = vsel %vm17_vm0, %v4302_v15, 0.0  ;;  %v2149_v26 = vadd.f32 %v2148_v41, %v2147_v30  ;;  %v614_v30 = vld [vmem:[#allocation2 + $0x28a] sm:$0xff] }
 0x12a   :  { %v4323_v1 = vsel %vm17_vm0, %v2123_v56, 0.0  ;;  %v1958_v11 = vadd.f32 %v1957_v28, %v1956_v33  ;;  %v2085_v51 = vmul.f32 %v4302_v15, %v4302_v15  ;;  %v2150_v12 = vsel %vm17_vm0, %v2083_v38, 0.0 }
 0x12b   :  { %v2124_v23 = vmul.f32 %v4306_v24, %v4306_v24  ;;  %v1667_v47 = vmul.f32 %v4189_v7, %v4225_v62  ;;  %v1959_v27 = vsel %vm17_vm0, %v5460_v63, 0.0  ;;  %v2151_v59 = vadd.f32 %v2150_v12, %v2149_v26 }
 0x12c   :  { %v1140_v2 = vadd.f32 %v1076_v13, %v943_v46  ;;  %v1960_v56 = vadd.f32 %v1959_v27, %v1958_v11  ;;  %v2086_v33 = vmul.f32 %v5460_v63, %v5460_v63  ;;  %v2152_v41 = vsel %vm17_vm0, %v2084_v16, 0.0  ;;  %v4351_v16 = vld [vmem:[%s5280_s1 + $0x6] ss:$0 sm:$0xff] }
 0x12d   :  { %v1534_v38 = vadd.f32 %v1470_v49, %v4201_v61  ;;  %v551_v28 = vadd.f32 %v487_v42, %v354_v3  ;;  %v1961_v15 = vsel %vm17_vm0, %v3440_v48, 0.0  ;;  %v2153_v19 = vadd.f32 %v2152_v41, %v2151_v59  ;;  %v615_v41 = vld [vmem:[#allocation2 + $0x292] sm:$0xff]  ;;  %v286_v63 = vld [vmem:[#allocation2 + $0x2a0] sm:$0xff] }
 0x12e   :  { %v1471_v62 = vmul.f32 %v4179_v20, %v285_v9  ;;  %v1962_v17 = vadd.f32 %v1961_v15, %v1960_v56  ;;  %v2087_v46 = vmul.f32 %v3440_v48, %v3440_v48  ;;  %v2154_v13 = vsel %vm17_vm0, %v2085_v51, 0.0 }
 0x12f   :  { %v683_v26 = vmul.f32 %v4218_v58, %v614_v30  ;;  %v880_v11 = vmul.f32 %v4277_v21, %v285_v9  ;;  %v1963_v49 = vsel %vm17_vm0, %v3442_v55, 0.0  ;;  %v2155_v61 = vadd.f32 %v2154_v13, %v2153_v19 }
 0x130   :  { %v1273_v15 = vmul.f32 %v4351_v16, %v614_v30  ;;  %v1964_v3 = vadd.f32 %v1963_v49, %v1962_v17  ;;  %v2088_v42 = vmul.f32 %v3442_v55, %v3442_v55  ;;  %v2156_v51 = vsel %vm17_vm0, %v2086_v33, 0.0  ;;  %v5461_v55 = vld [vmem:[#allocation19_spill] sm:$0xff] }
 0x131   :  { %v1731_v12 = vadd.f32 %v1667_v47, %v1534_v38  ;;  %v1864_v9 = vmul.f32 %v4206_v18, %v614_v30  ;;  %v1965_v27 = vsel %vm17_vm0, %v3424_v40, 0.0  ;;  %v2157_v19 = vadd.f32 %v2156_v51, %v2155_v61  ;;  %v5463_v51 = vld [vmem:[#allocation26_spill] sm:$0xff] }
 0x132   :  { %v1535_v59 = vadd.f32 %v1471_v62, %v1336_v0  ;;  %v1668_v56 = vmul.f32 %v4189_v7, %v418_v5  ;;  %v1966_v13 = vadd.f32 %v1965_v27, %v1964_v3  ;;  %v2158_v48 = vsel %vm17_vm0, %v2087_v46, 0.0  ;;  %v419_v3 = vld [vmem:[#allocation2 + $0x2a1] sm:$0xff] }
 0x133   :  { %v944_v17 = vadd.f32 %v880_v11, %v4253_v10  ;;  %v1077_v49 = vmul.f32 %v4296_v53, %v418_v5  ;;  %v1967_v47 = vsel %vm17_vm0, %v5461_v55, 0.0  ;;  %v2159_v33 = vadd.f32 %v2158_v48, %v2157_v19  ;;  %v5464_v48 = vld [vmem:[#allocation23_spill] sm:$0xff]  ;;  %v5465_v19 = vld [vmem:[#allocation28_spill] sm:$0xff] }
 0x134   :  { %v747_v30 = vadd.f32 %v683_v26, %v550_v43  ;;  %v1337_v38 = vadd.f32 %v1273_v15, %v1140_v2  ;;  %v1968_v40 = vadd.f32 %v1967_v47, %v1966_v13  ;;  %v2160_v0 = vsel %vm17_vm0, %v2088_v42, 0.0 }
 0x135   :  { %v4367_v62 = vadd.f32 %v1864_v9, %v1731_v12  ;;  %v684_v61 = vmul.f32 %v4218_v58, %v615_v41  ;;  %v1274_v46 = vmul.f32 %v4351_v16, %v615_v41  ;;  %v2161_v10 = vadd.f32 %v2160_v0, %v2159_v33  ;;  %v287_v0 = vld [vmem:[#allocation2 + $0x2a8] sm:$0xff] }
 0x136   :  { %v1732_v11 = vadd.f32 %v1668_v56, %v1535_v59  ;;  %v1865_v5 = vmul.f32 %v4206_v18, %v615_v41  ;;  %v1970_v27 = vadd.f32 %v5463_v51, %v1968_v40  ;;  %v2162_v43 = vsel %vm17_vm0, %v5464_v48, 0.0  ;;  %v5466_v59 = vld [vmem:[#allocation24_spill] sm:$0xff] }
 0x137   :  { %5462 = vst [vmem:[#allocation101_spill] sm:$0xff] %v4367_v62  ;;  %v1141_v2 = vadd.f32 %v1077_v49, %v944_v17  ;;  %v355_v26 = vmul.f32 %v4243_v4, %v286_v63  ;;  %v881_v15 = vmul.f32 %v4277_v21, %v286_v63  ;;  %v2163_v42 = vadd.f32 %v2162_v43, %v2161_v10  ;;  %v420_v10 = vld [vmem:[#allocation2 + $0x2a9] sm:$0xff]  ;;  %v5469_v43 = vld [vmem:[#allocation27_spill] sm:$0xff] }
 0x138   :  { %v488_v12 = vmul.f32 %v4258_v50, %v419_v3  ;;  %v1472_v9 = vmul.f32 %v4179_v20, %v286_v63  ;;  %v1972_v13 = vadd.f32 %v5465_v19, %v1970_v27  ;;  %v2164_v56 = vsel %vm17_vm0, %v5466_v59, 0.0  ;;  %v616_v59 = vld [vmem:[#allocation2 + $0x2a2] sm:$0xff] }
 0x139   :  { %v4384_v40 = vsel %vm17_vm0, %v4306_v24, 0.0  ;;  %v4387_v41 = vsel %vm17_vm0, %v2124_v23, 0.0  ;;  %v748_v17 = vadd.f32 %v684_v61, %v551_v28  ;;  %v2165_v49 = vadd.f32 %v2164_v56, %v2163_v42  ;;  %v5470_v56 = vld [vmem:[#allocation33_spill] sm:$0xff] }
 0x13a   :  { %5467 = vst [vmem:[#allocation26_spill] sm:$0xff] %v4387_v41  ;;  %v4391_v47 = vsel %vm17_vm0, %v4367_v62, 0.0  ;;  %v2125_v63 = vmul.f32 %v4367_v62, %v4367_v62  ;;  %v4395_v33 = vadd.f32 %v1865_v5, %v1732_v11  ;;  %v1974_v51 = vadd.f32 %v3527_v25, %v1972_v13  ;;  %v5471_v25 = vld [vmem:[#allocation29_spill] sm:$0xff]  ;;  %v5474_v13 = vld [vmem:[#allocation32_spill] sm:$0xff]  ;;  %v421_v41 = vld [vmem:[#allocation2 + $0x2b9] sm:$0xff] }
 0x13b   :  { %v1338_v27 = vadd.f32 %v1274_v46, %v1141_v2  ;;  %v945_v48 = vadd.f32 %v881_v15, %v747_v30  ;;  %v1078_v23 = vmul.f32 %v4296_v53, %v419_v3  ;;  %v2167_v28 = vadd.f32 %v5469_v43, %v2165_v49 }
 0x13c   :  { %5468 = vst [vmem:[#allocation23_spill] sm:$0xff] %v4395_v33  ;;  %v552_v61 = vadd.f32 %v488_v12, %v355_v26  ;;  %v1536_v42 = vadd.f32 %v1472_v9, %v1337_v38  ;;  %v1669_v19 = vmul.f32 %v4189_v7, %v419_v3  ;;  %v1976_v24 = vadd.f32 %v5470_v56, %v1974_v51  ;;  %v5473_v3 = vld [vmem:[#allocation36_spill] sm:$0xff]  ;;  %v288_v56 = vld [vmem:[#allocation2 + $0x2b8] sm:$0xff] }
 0x13d   :  { %v356_v11 = vmul.f32 %v4243_v4, %v287_v0  ;;  %v489_v5 = vmul.f32 %v4258_v50, %v420_v10  ;;  %v882_v62 = vmul.f32 %v4277_v21, %v287_v0  ;;  %v2169_v46 = vadd.f32 %v5471_v25, %v2167_v28  ;;  %v617_v28 = vld [vmem:[#allocation2 + $0x2aa] sm:$0xff] }
 0x13e   :  { %v4407_v30 = vsel %vm17_vm0, %v2125_v63, 0.0  ;;  %v2126_v2 = vmul.f32 %v4395_v33, %v4395_v33  ;;  %v1473_v38 = vmul.f32 %v4179_v20, %v287_v0  ;;  %v1978_v26 = vadd.f32 %v5473_v3, %v1976_v24  ;;  %v5475_v25 = vld [vmem:[#allocation40_spill] sm:$0xff] }
 0x13f   :  { %5472 = vst [vmem:[#allocation28_spill] sm:$0xff] %v4407_v30  ;;  %v4415_v15 = vsel %vm17_vm0, %v4395_v33, 0.0  ;;  %v1142_v12 = vadd.f32 %v1078_v23, %v945_v48  ;;  %v685_v9 = vmul.f32 %v4218_v58, %v616_v59  ;;  %v2171_v49 = vadd.f32 %v5474_v13, %v2169_v46  ;;  %v5476_v33 = vld [vmem:[#allocation35_spill] sm:$0xff] }
 0x140   :  { %v1733_v51 = vadd.f32 %v1669_v19, %v1536_v42  ;;  %v1275_v63 = vmul.f32 %v4351_v16, %v616_v59  ;;  %v1866_v43 = vmul.f32 %v4206_v18, %v616_v59  ;;  %v1980_v0 = vadd.f32 %v5475_v25, %v1978_v26  ;;  %v5478_v19 = vld [vmem:[#allocation43_spill] sm:$0xff] }
 0x141   :  { %v553_v55 = vadd.f32 %v489_v5, %v356_v11  ;;  %v946_v24 = vadd.f32 %v882_v62, %v748_v17  ;;  %v1079_v3 = vmul.f32 %v4296_v53, %v420_v10  ;;  %v2173_v30 = vadd.f32 %v5476_v33, %v2171_v49  ;;  %v5479_v11 = vld [vmem:[#allocation37_spill] sm:$0xff] }
 0x142   :  { %v4425_v48 = vsel %vm17_vm0, %v2126_v2, 0.0  ;;  %v1537_v23 = vadd.f32 %v1473_v38, %v1338_v27  ;;  %v1670_v42 = vmul.f32 %v4189_v7, %v420_v10  ;;  %v1982_v46 = vadd.f32 %v5478_v19, %v1980_v0  ;;  %v5481_v2 = vld [vmem:[#allocation47_spill] sm:$0xff] }
 0x143   :  { %5477 = vst [vmem:[#allocation24_spill] sm:$0xff] %v4425_v48  ;;  %v749_v13 = vadd.f32 %v685_v9, %v552_v61  ;;  %v686_v59 = vmul.f32 %v4218_v58, %v617_v28  ;;  %v883_v26 = vmul.f32 %v4277_v21, %v288_v56  ;;  %v2175_v62 = vadd.f32 %v5479_v11, %v2173_v30  ;;  %v5482_v61 = vld [vmem:[#allocation42_spill] sm:$0xff]  ;;  %v289_v11 = vld [vmem:[#allocation2 + $0x2c0] sm:$0xff] }
 0x144   :  { %v1339_v17 = vadd.f32 %v1275_v63, %v1142_v12  ;;  %v4432_v5 = vadd.f32 %v1866_v43, %v1733_v51  ;;  %v1474_v33 = vmul.f32 %v4179_v20, %v288_v56  ;;  %v1984_v49 = vadd.f32 %v5481_v2, %v1982_v46  ;;  %v5483_v30 = vld [vmem:[#allocation50_spill] sm:$0xff] }
 0x145   :  { %v1143_v27 = vadd.f32 %v1079_v3, %v946_v24  ;;  %v1276_v10 = vmul.f32 %v4351_v16, %v617_v28  ;;  %v1867_v38 = vmul.f32 %v4206_v18, %v617_v28  ;;  %v2177_v9 = vadd.f32 %v5482_v61, %v2175_v62  ;;  %v5484_v46 = vld [vmem:[#allocation46_spill] sm:$0xff] }
 0x146   :  { %5480 = vst [vmem:[#allocation27_spill] sm:$0xff] %v4432_v5  ;;  %v1734_v25 = vadd.f32 %v1670_v42, %v1537_v23  ;;  %v357_v0 = vmul.f32 %v4243_v4, %v288_v56  ;;  %v490_v19 = vmul.f32 %v4258_v50, %v421_v41  ;;  %v1986_v12 = vadd.f32 %v5483_v30, %v1984_v49  ;;  %v422_v42 = vld [vmem:[#allocation2 + $0x2c1] sm:$0xff]  ;;  %v5489_v30 = vld [vmem:[#allocation54_spill] sm:$0xff] }
 0x147   :  { %v750_v51 = vadd.f32 %v686_v59, %v553_v55  ;;  %v947_v63 = vadd.f32 %v883_v26, %v749_v13  ;;  %v1080_v43 = vmul.f32 %v4296_v53, %v421_v41  ;;  %v2179_v24 = vadd.f32 %v5484_v46, %v2177_v9  ;;  %v5486_v56 = vld [vmem:[#allocation52_spill] sm:$0xff]  ;;  %v618_v46 = vld [vmem:[#allocation2 + $0x2ba] sm:$0xff]  ;;  %v423_v48 = vld [vmem:[#allocation2 + $0x2d1] sm:$0xff] }
 0x148   :  { %v4446_v3 = vsel %vm17_vm0, %v4432_v5, 0.0  ;;  %v1538_v28 = vadd.f32 %v1474_v33, %v1339_v17  ;;  %v1671_v23 = vmul.f32 %v4189_v7, %v421_v41  ;;  %v1988_v62 = vadd.f32 %v5486_v56, %v1986_v12  ;;  %v5487_v59 = vld [vmem:[#allocation48_spill] sm:$0xff]  ;;  %v5490_v56 = vld [vmem:[#allocation51_spill] sm:$0xff] }
 0x149   :  { %5485 = vst [vmem:[#allocation33_spill] sm:$0xff] %v4446_v3  ;;  %v2127_v2 = vmul.f32 %v4432_v5, %v4432_v5  ;;  %v1340_v55 = vadd.f32 %v1276_v10, %v1143_v27  ;;  %v1475_v13 = vmul.f32 %v4179_v20, %v289_v11  ;;  %v2181_v26 = vadd.f32 %v5487_v59, %v2179_v24 }
 0x14a   :  { %v4454_v49 = vadd.f32 %v1867_v38, %v1734_v25  ;;  %v554_v61 = vadd.f32 %v490_v19, %v357_v0  ;;  %v358_v9 = vmul.f32 %v4243_v4, %v289_v11  ;;  %v1990_v17 = vadd.f32 %v5489_v30, %v1988_v62  ;;  %v5491_v38 = vld [vmem:[#allocation58_spill] sm:$0xff]  ;;  %v5493_v62 = vld [vmem:[#allocation53_spill] sm:$0xff] }
 0x14b   :  { %v1144_v33 = vadd.f32 %v1080_v43, %v947_v63  ;;  %v491_v41 = vmul.f32 %v4258_v50, %v422_v42  ;;  %v884_v12 = vmul.f32 %v4277_v21, %v289_v11  ;;  %v2183_v5 = vadd.f32 %v5490_v56, %v2181_v26  ;;  %v619_v43 = vld [vmem:[#allocation2 + $0x2c2] sm:$0xff]  ;;  %v5495_v26 = vld [vmem:[#allocation61_spill] sm:$0xff] }
 0x14c   :  { %5488 = vst [vmem:[#allocation29_spill] sm:$0xff] %v4454_v49  ;;  %v1735_v27 = vadd.f32 %v1671_v23, %v1538_v28  ;;  %v1277_v10 = vmul.f32 %v4351_v16, %v618_v46  ;;  %v1868_v24 = vmul.f32 %v4206_v18, %v618_v46  ;;  %v1992_v25 = vadd.f32 %v5491_v38, %v1990_v17  ;;  %v5496_v56 = vld [vmem:[#allocation55_spill] sm:$0xff] }
 0x14d   :  { %v4465_v0 = vsel %vm17_vm0, %v2127_v2, 0.0  ;;  %v1539_v19 = vadd.f32 %v1475_v13, %v1340_v55  ;;  %v1672_v63 = vmul.f32 %v4189_v7, %v422_v42  ;;  %v2185_v59 = vadd.f32 %v5493_v62, %v2183_v5  ;;  %v290_v13 = vld [vmem:[#allocation2 + $0x2d0] sm:$0xff] }
 0x14e   :  { %5492 = vst [vmem:[#allocation36_spill] sm:$0xff] %v4465_v0  ;;  %v4471_v11 = vsel %vm17_vm0, %v4454_v49, 0.0  ;;  %v2128_v28 = vmul.f32 %v4454_v49, %v4454_v49  ;;  %v687_v23 = vmul.f32 %v4218_v58, %v618_v46  ;;  %v1994_v30 = vadd.f32 %v5495_v26, %v1992_v25 }
 0x14f   :  { %5494 = vst [vmem:[#allocation32_spill] sm:$0xff] %v4471_v11  ;;  %v555_v17 = vadd.f32 %v491_v41, %v358_v9  ;;  %v948_v2 = vadd.f32 %v884_v12, %v750_v51  ;;  %v1081_v55 = vmul.f32 %v4296_v53, %v422_v42  ;;  %v2187_v38 = vadd.f32 %v5496_v56, %v2185_v59  ;;  %v5497_v11 = vld [vmem:[#allocation63_spill] sm:$0xff]  ;;  %v5498_v9 = vld [vmem:[#allocation60_spill] sm:$0xff]  ;;  %v5499_v59 = vld [vmem:[#allocation62_spill] sm:$0xff] }
 0x150   :  { %v1341_v0 = vadd.f32 %v1277_v10, %v1144_v33  ;;  %v4479_v5 = vadd.f32 %v1868_v24, %v1735_v27  ;;  %v688_v62 = vmul.f32 %v4218_v58, %v619_v43  ;;  %v1996_v3 = vadd.f32 %v5497_v11, %v1994_v30  ;;  %v424_v30 = vld [vmem:[#allocation2 + $0x2d9] sm:$0xff] }
 0x151   :  { %v1736_v49 = vadd.f32 %v1672_v63, %v1539_v19  ;;  %v1869_v46 = vmul.f32 %v4206_v18, %v619_v43  ;;  %v1476_v25 = vmul.f32 %v4179_v20, %v290_v13  ;;  %v2189_v51 = vadd.f32 %v5498_v9, %v2187_v38 }
 0x152   :  { %v751_v41 = vadd.f32 %v687_v23, %v554_v61  ;;  %v1278_v42 = vmul.f32 %v4351_v16, %v619_v43  ;;  %v885_v12 = vmul.f32 %v4277_v21, %v290_v13  ;;  %v1998_v33 = vadd.f32 %v3823_v31, %v1996_v3  ;;  %v291_v43 = vld [vmem:[#allocation2 + $0x2d8] sm:$0xff] }
 0x153   :  { %v1145_v27 = vadd.f32 %v1081_v55, %v948_v2  ;;  %v359_v10 = vmul.f32 %v4243_v4, %v290_v13  ;;  %v492_v24 = vmul.f32 %v4258_v50, %v423_v48  ;;  %v2191_v19 = vadd.f32 %v5499_v59, %v2189_v51  ;;  %v5500_v2 = vld [vmem:[#allocation64_spill] sm:$0xff] }
 0x154   :  { %v4493_v63 = vsel %vm17_vm0, %v2128_v28, 0.0  ;;  %v4497_v11 = vsel %vm17_vm0, %v4479_v5, 0.0  ;;  %v752_v61 = vadd.f32 %v688_v62, %v555_v17  ;;  %v2000_v23 = vadd.f32 %v3844_v54, %v1998_v33 }
 0x155   :  { %v4500_v26 = vadd.f32 %v1869_v46, %v1736_v49  ;;  %v1540_v31 = vadd.f32 %v1476_v25, %v1341_v0  ;;  %v1673_v3 = vmul.f32 %v4189_v7, %v423_v48  ;;  %v2193_v55 = vadd.f32 %v5500_v2, %v2191_v19  ;;  %v620_v25 = vld [vmem:[#allocation2 + $0x2d2] sm:$0xff]  ;;  %v621_v19 = vld [vmem:[#allocation2 + $0x2da] sm:$0xff] }
 0x156   :  { %v2129_v28 = vmul.f32 %v4479_v5, %v4479_v5  ;;  %v949_v13 = vadd.f32 %v885_v12, %v751_v41  ;;  %v1082_v56 = vmul.f32 %v4296_v53, %v423_v48  ;;  %v2002_v38 = vadd.f32 %v3867_v22, %v2000_v23  ;;  %v5503_v2 = vld [vmem:[#allocation77_spill] sm:$0xff] }
 0x157   :  { %v1342_v17 = vadd.f32 %v1278_v42, %v1145_v27  ;;  %v556_v62 = vadd.f32 %v492_v24, %v359_v10  ;;  %v886_v54 = vmul.f32 %v4277_v21, %v291_v43  ;;  %v2195_v49 = vadd.f32 %v3826_v44, %v2193_v55  ;;  %v5501_v27 = vld [vmem:[#allocation72_spill] sm:$0xff] }
 0x158   :  { %v360_v0 = vmul.f32 %v4243_v4, %v291_v43  ;;  %v493_v46 = vmul.f32 %v4258_v50, %v424_v30  ;;  %v1477_v9 = vmul.f32 %v4179_v20, %v291_v43  ;;  %v2004_v51 = vadd.f32 %v3875_v6, %v2002_v38  ;;  %v5502_v43 = vld [vmem:[#allocation70_spill] sm:$0xff]  ;;  %v5505_v38 = vld [vmem:[#allocation73_spill] sm:$0xff] }
 0x159   :  { %v2130_v48 = vmul.f32 %v4500_v26, %v4500_v26  ;;  %v1737_v41 = vadd.f32 %v1673_v3, %v1540_v31  ;;  %v1870_v22 = vmul.f32 %v4206_v18, %v620_v25  ;;  %v2197_v42 = vadd.f32 %v3847_v32, %v2195_v49 }
 0x15a   :  { %v4519_v12 = vsel %vm17_vm0, %v2129_v28, 0.0  ;;  %v1146_v44 = vadd.f32 %v1082_v56, %v949_v13  ;;  %v1279_v33 = vmul.f32 %v4351_v16, %v620_v25  ;;  %v2006_v10 = vadd.f32 %v5501_v27, %v2004_v51  ;;  %v425_v51 = vld [vmem:[#allocation2 + $0x2e9] sm:$0xff] }
 0x15b   :  { %v689_v24 = vmul.f32 %v4218_v58, %v620_v25  ;;  %v950_v59 = vadd.f32 %v886_v54, %v752_v61  ;;  %v1083_v6 = vmul.f32 %v4296_v53, %v424_v30  ;;  %v2199_v23 = vadd.f32 %v5502_v43, %v2197_v42  ;;  %v292_v61 = vld [vmem:[#allocation2 + $0x2e8] sm:$0xff] }
 0x15c   :  { %v4528_v31 = vsel %vm17_vm0, %v4500_v26, 0.0  ;;  %v1541_v32 = vadd.f32 %v1477_v9, %v1342_v17  ;;  %v1674_v3 = vmul.f32 %v4189_v7, %v424_v30  ;;  %v2008_v55 = vadd.f32 %v5503_v2, %v2006_v10  ;;  %v5506_v17 = vld [vmem:[#allocation79_spill] sm:$0xff] }
 0x15d   :  { %v4533_v28 = vsel %vm17_vm0, %v2130_v48, 0.0  ;;  %v557_v13 = vadd.f32 %v493_v46, %v360_v0  ;;  %v4535_v56 = vadd.f32 %v1870_v22, %v1737_v41  ;;  %v2201_v54 = vadd.f32 %v5505_v38, %v2199_v23  ;;  %v5507_v48 = vld [vmem:[#allocation74_spill] sm:$0xff] }
 0x15e   :  { %v1343_v49 = vadd.f32 %v1279_v33, %v1146_v44  ;;  %v690_v25 = vmul.f32 %v4218_v58, %v621_v19  ;;  %v1478_v42 = vmul.f32 %v4179_v20, %v292_v61  ;;  %v2010_v9 = vadd.f32 %v5506_v17, %v2008_v55  ;;  %v5508_v22 = vld [vmem:[#allocation82_spill] sm:$0xff]  ;;  %v622_v17 = vld [vmem:[#allocation2 + $0x2ea] sm:$0xff] }
 0x15f   :  { %5504 = vst [vmem:[#allocation40_spill] sm:$0xff] %v4535_v56  ;;  %v753_v30 = vadd.f32 %v689_v24, %v556_v62  ;;  %v1147_v27 = vadd.f32 %v1083_v6, %v950_v59  ;;  %v1280_v10 = vmul.f32 %v4351_v16, %v621_v19  ;;  %v2203_v43 = vadd.f32 %v5507_v48, %v2201_v54  ;;  %v5509_v62 = vld [vmem:[#allocation78_spill] sm:$0xff] }
 0x160   :  { %v1738_v0 = vadd.f32 %v1674_v3, %v1541_v32  ;;  %v1871_v46 = vmul.f32 %v4206_v18, %v621_v19  ;;  %v887_v41 = vmul.f32 %v4277_v21, %v292_v61  ;;  %v2012_v44 = vadd.f32 %v5508_v22, %v2010_v9  ;;  %v293_v32 = vld [vmem:[#allocation2 + $0x2f0] sm:$0xff] }
 0x161   :  { %v2131_v33 = vmul.f32 %v4535_v56, %v4535_v56  ;;  %v361_v23 = vmul.f32 %v4243_v4, %v292_v61  ;;  %v494_v2 = vmul.f32 %v4258_v50, %v425_v51  ;;  %v2205_v24 = vadd.f32 %v5509_v62, %v2203_v43  ;;  %v5510_v3 = vld [vmem:[#allocation85_spill] sm:$0xff] }
 0x162   :  { %v754_v59 = vadd.f32 %v690_v25, %v557_v13  ;;  %v1542_v6 = vadd.f32 %v1478_v42, %v1343_v49  ;;  %v1675_v55 = vmul.f32 %v4189_v7, %v425_v51  ;;  %v2014_v19 = vadd.f32 %v5510_v3, %v2012_v44  ;;  %v5511_v61 = vld [vmem:[#allocation81_spill] sm:$0xff]  ;;  %v5513_v49 = vld [vmem:[#allocation87_spill] sm:$0xff] }
 0x163   :  { %v4555_v38 = vsel %vm17_vm0, %v4535_v56, 0.0  ;;  %v1344_v54 = vadd.f32 %v1280_v10, %v1147_v27  ;;  %v1479_v9 = vmul.f32 %v4179_v20, %v293_v32  ;;  %v2207_v48 = vadd.f32 %v5511_v61, %v2205_v24  ;;  %v4566_v62 = vld [vmem:[#allocation2 + $0x2f1] sm:$0xff]  ;;  %v5515_v10 = vld [vmem:[#allocation83_spill] sm:$0xff] }
 0x164   :  { %v4559_v22 = vadd.f32 %v1871_v46, %v1738_v0  ;;  %v951_v43 = vadd.f32 %v887_v41, %v753_v30  ;;  %v1084_v13 = vmul.f32 %v4296_v53, %v425_v51  ;;  %v2016_v25 = vadd.f32 %v5513_v49, %v2014_v19  ;;  %5514 = vst [vmem:[#allocation43_spill] sm:$0xff] %v4566_v62 }
 0x165   :  { %v4564_v42 = vsel %vm17_vm0, %v2131_v33, 0.0  ;;  %v558_v44 = vadd.f32 %v494_v2, %v361_v23  ;;  %v888_v27 = vmul.f32 %v4277_v21, %v293_v32  ;;  %v2209_v3 = vadd.f32 %v5515_v10, %v2207_v48  ;;  %v5516_v33 = vld [vmem:[#allocation86_spill] sm:$0xff]  ;;  %v4594_v10 = vld [vmem:[#allocation2 + $0x301] sm:$0xff] }
 0x166   :  { %5512 = vst [vmem:[#allocation35_spill] sm:$0xff] %v4559_v22  ;;  %v1739_v56 = vadd.f32 %v1675_v55, %v1542_v6  ;;  %v691_v24 = vmul.f32 %v4218_v58, %v622_v17  ;;  %v1872_v0 = vmul.f32 %v4206_v18, %v622_v17  ;;  %v2018_v30 = vadd.f32 %v4011_v45, %v2016_v25  ;;  %v294_v55 = vld [vmem:[#allocation2 + $0x300] sm:$0xff] }
 0x167   :  { %v362_v51 = vmul.f32 %v4243_v4, %v293_v32  ;;  %v1543_v46 = vadd.f32 %v1479_v9, %v1344_v54  ;;  %v1676_v41 = vmul.f32 %v4189_v7, %v4566_v62  ;;  %v2211_v23 = vadd.f32 %v5516_v33, %v2209_v3  ;;  %v623_v9 = vld [vmem:[#allocation2 + $0x2f2] sm:$0xff]  ;;  %5518 = vst [vmem:[#allocation47_spill] sm:$0xff] %v4594_v10 }
 0x168   :  { %v1148_v2 = vadd.f32 %v1084_v13, %v951_v43  ;;  %v495_v19 = vmul.f32 %v4258_v50, %v4566_v62  ;;  %v1281_v6 = vmul.f32 %v4351_v16, %v622_v17  ;;  %v2020_v61 = vadd.f32 %v4040_v29, %v2018_v30 }
 0x169   :  { %v4583_v45 = vsel %vm17_vm0, %v4559_v22, 0.0  ;;  %v952_v32 = vadd.f32 %v888_v27, %v754_v59  ;;  %v1085_v54 = vmul.f32 %v4296_v53, %v4566_v62  ;;  %v2213_v48 = vadd.f32 %v4007_v60, %v2211_v23  ;;  %v5524_v62 = vld [vmem:[#allocation98_spill] sm:$0xff] }
 0x16a   :  { %v2132_v43 = vmul.f32 %v4559_v22, %v4559_v22  ;;  %v755_v13 = vadd.f32 %v691_v24, %v558_v44  ;;  %v4590_v49 = vadd.f32 %v1872_v0, %v1739_v56  ;;  %v2022_v17 = vadd.f32 %v4062_v8, %v2020_v61  ;;  %v295_v24 = vld [vmem:[#allocation2 + $0x308] sm:$0xff] }
 0x16b   :  { %v1740_v29 = vadd.f32 %v1676_v41, %v1543_v46  ;;  %v1873_v25 = vmul.f32 %v4206_v18, %v623_v9  ;;  %v889_v59 = vmul.f32 %v4277_v21, %v294_v55  ;;  %v2215_v27 = vadd.f32 %v4036_v36, %v2213_v48  ;;  %v4602_v0 = vld [vmem:[#allocation2 + $0x309] sm:$0xff] }
 0x16c   :  { %5517 = vst [vmem:[#allocation37_spill] sm:$0xff] %v4590_v49  ;;  %v559_v3 = vadd.f32 %v495_v19, %v362_v51  ;;  %v1345_v30 = vadd.f32 %v1281_v6, %v1148_v2  ;;  %v692_v60 = vmul.f32 %v4218_v58, %v623_v9  ;;  %v2024_v33 = vadd.f32 %v4089_v39, %v2022_v17  ;;  %v5520_v6 = vld [vmem:[#allocation94_spill] sm:$0xff] }
 0x16d   :  { %v1149_v44 = vadd.f32 %v1085_v54, %v952_v32  ;;  %v1282_v56 = vmul.f32 %v4351_v16, %v623_v9  ;;  %v363_v8 = vmul.f32 %v4243_v4, %v294_v55  ;;  %5519 = vst [vmem:[#allocation42_spill] sm:$0xff] %v4602_v0  ;;  %v2217_v46 = vadd.f32 %v4058_v34, %v2215_v27  ;;  %v4632_v27 = vld [vmem:[#allocation2 + $0x319] sm:$0xff] }
 0x16e   :  { %v2133_v41 = vmul.f32 %v4590_v49, %v4590_v49  ;;  %v496_v36 = vmul.f32 %v4258_v50, %v4594_v10  ;;  %v1480_v51 = vmul.f32 %v4179_v20, %v294_v55  ;;  %v2026_v39 = vadd.f32 %v4106_v57, %v2024_v33 }
 0x16f   :  { %v4611_v23 = vadd.f32 %v1873_v25, %v1740_v29  ;;  %v953_v2 = vadd.f32 %v889_v59, %v755_v13  ;;  %v1086_v19 = vmul.f32 %v4296_v53, %v4594_v10  ;;  %v2219_v61 = vadd.f32 %v5520_v6, %v2217_v46  ;;  %v624_v13 = vld [vmem:[#allocation2 + $0x302] sm:$0xff]  ;;  %v4630_v59 = vld [vmem:[#allocation2 + $0x318] sm:$0xff] }
 0x170   :  { %v4617_v34 = vsel %vm17_vm0, %v2132_v43, 0.0  ;;  %v364_v32 = vmul.f32 %v4243_v4, %v295_v24  ;;  %v497_v54 = vmul.f32 %v4258_v50, %v4602_v0  ;;  %v2028_v55 = vadd.f32 %v4120_v52, %v2026_v39  ;;  %v4645_v46 = vld [vmem:[#allocation2 + $0x321] sm:$0xff] }
 0x171   :  { %v4625_v57 = vsel %vm17_vm0, %v4590_v49, 0.0  ;;  %v756_v9 = vadd.f32 %v692_v60, %v559_v3  ;;  %v1346_v48 = vadd.f32 %v1282_v56, %v1149_v44  ;;  %v2221_v17 = vadd.f32 %v4102_v35, %v2219_v61  ;;  %v625_v35 = vld [vmem:[#allocation2 + $0x30a] sm:$0xff]  ;;  %v4669_v49 = vld [vmem:[#allocation2 + $0x322] sm:$0xff] }
 0x172   :  { %v560_v29 = vadd.f32 %v496_v36, %v363_v8  ;;  %v1544_v25 = vadd.f32 %v1480_v51, %v1345_v30  ;;  %v1677_v43 = vmul.f32 %v4189_v7, %v4594_v10  ;;  %v2030_v52 = vadd.f32 %v4129_v14, %v2028_v55  ;;  %v5521_v36 = vld [vmem:[#allocation99_spill] sm:$0xff]  ;;  %v5523_v55 = vld [vmem:[#allocation12_spill] sm:$0xff] }
 0x173   :  { %v4636_v33 = vsel %vm17_vm0, %v2133_v41, 0.0  ;;  %v4640_v3 = vsel %vm17_vm0, %v4611_v23, 0.0  ;;  %v1150_v60 = vadd.f32 %v1086_v19, %v953_v2  ;;  %v2223_v30 = vadd.f32 %v4113_v37, %v2221_v17  ;;  %v5522_v2 = vld [vmem:[#allocation97_spill] sm:$0xff] }
 0x174   :  { %v561_v44 = vadd.f32 %v497_v54, %v364_v32  ;;  %v693_v56 = vmul.f32 %v4218_v58, %v624_v13  ;;  %v890_v8 = vmul.f32 %v4277_v21, %v295_v24  ;;  %v2032_v14 = vadd.f32 %v5521_v36, %v2030_v52  ;;  %v297_v32 = vld [vmem:[#allocation2 + $0x320] sm:$0xff] }
 0x175   :  { %v1087_v41 = vmul.f32 %v4296_v53, %v4602_v0  ;;  %v365_v51 = vmul.f32 %v4243_v4, %v4630_v59  ;;  %v498_v39 = vmul.f32 %v4258_v50, %v4632_v27  ;;  %v2225_v37 = vadd.f32 %v5522_v2, %v2223_v30  ;;  %v4659_v54 = vld [vmem:[#allocation2 + $0x31a] sm:$0xff] }
 0x176   :  { %v4655_v19 = vadd.f32 %v1677_v43, %v1544_v25  ;;  %v1283_v6 = vmul.f32 %v4351_v16, %v624_v13  ;;  %v694_v61 = vmul.f32 %v4218_v58, %v625_v35  ;;  %v2034_v17 = vadd.f32 %v5523_v55, %v2032_v14  ;;  %v5525_v55 = vld [vmem:[#allocation100_spill] sm:$0xff] }
 0x177   :  { %v1481_v52 = vmul.f32 %v4179_v20, %v295_v24  ;;  %v366_v36 = vmul.f32 %v4243_v4, %v297_v32  ;;  %v499_v10 = vmul.f32 %v4258_v50, %v4645_v46  ;;  %v2227_v30 = vadd.f32 %v5524_v62, %v2225_v37 }
 0x178   :  { %v757_v25 = vadd.f32 %v693_v56, %v560_v29  ;;  %v954_v43 = vadd.f32 %v890_v8, %v756_v9  ;;  %v891_v2 = vmul.f32 %v4277_v21, %v4630_v59  ;;  %v2036_v22 = vadd.f32 %v4384_v40, %v2034_v17  ;;  %v823_v56 = vld [vmem:[#allocation2 + $0x330] sm:$0xff] }
 0x179   :  { %v1678_v14 = vmul.f32 %v4189_v7, %v4602_v0  ;;  %v562_v24 = vadd.f32 %v498_v39, %v365_v51  ;;  %v695_v4 = vmul.f32 %v4218_v58, %v4659_v54  ;;  %v2229_v50 = vadd.f32 %v5525_v55, %v2227_v30  ;;  %v824_v30 = vld [vmem:[#allocation2 + $0x338] sm:$0xff] }
 0x17a   :  { %v4678_v62 = vmul.f32 %v4206_v18, %v624_v13  ;;  %v758_v9 = vadd.f32 %v694_v61, %v561_v44  ;;  %v892_v29 = vmul.f32 %v4277_v21, %v297_v32  ;;  %v2038_v8 = vadd.f32 %v4391_v47, %v2036_v22  ;;  %v5526_v22 = vld [vmem:[#allocation26_spill] sm:$0xff] }
 0x17b   :  { %v1347_v37 = vadd.f32 %v1283_v6, %v1150_v60  ;;  %v563_v40 = vadd.f32 %v499_v10, %v366_v36  ;;  %v696_v17 = vmul.f32 %v4218_v58, %v4669_v49  ;;  %v2231_v51 = vadd.f32 %v4323_v1, %v2229_v50  ;;  %v4693_v1 = vld [vmem:[#allocation2 + $0x331] sm:$0xff] }
 0x17c   :  { %v1284_v39 = vmul.f32 %v4351_v16, %v625_v35  ;;  %v955_v0 = vadd.f32 %v891_v2, %v757_v25  ;;  %v1088_v13 = vmul.f32 %v4296_v53, %v4632_v27  ;;  %v2040_v44 = vadd.f32 %v4415_v15, %v2038_v8  ;;  %v5527_v36 = vld [vmem:[#allocation33_spill] sm:$0xff] }
 0x17d   :  { %v1151_v61 = vadd.f32 %v1087_v41, %v954_v43  ;;  %v759_v55 = vadd.f32 %v695_v4, %v562_v24  ;;  %v893_v47 = vmul.f32 %v4277_v21, %v823_v56  ;;  %v2233_v10 = vadd.f32 %v5526_v22, %v2231_v51  ;;  %v5528_v41 = vld [vmem:[#allocation28_spill] sm:$0xff] }
 0x17e   :  { %v1545_v60 = vadd.f32 %v1481_v52, %v1346_v48  ;;  %v956_v6 = vadd.f32 %v892_v29, %v758_v9  ;;  %v1089_v58 = vmul.f32 %v4296_v53, %v4645_v46  ;;  %v2042_v25 = vadd.f32 %v5527_v36, %v2040_v44  ;;  %v4703_v52 = vld [vmem:[#allocation2 + $0x339] sm:$0xff]  ;;  %v5529_v9 = vld [vmem:[#allocation32_spill] sm:$0xff] }
 0x17f   :  { %v1875_v2 = vmul.f32 %v4206_v18, %v625_v35  ;;  %v760_v50 = vadd.f32 %v696_v17, %v563_v40  ;;  %v894_v15 = vmul.f32 %v4277_v21, %v824_v30  ;;  %v2235_v43 = vadd.f32 %v5528_v41, %v2233_v10  ;;  %v5530_v40 = vld [vmem:[#allocation24_spill] sm:$0xff] }
 0x180   :  { %v1152_v24 = vadd.f32 %v1088_v13, %v955_v0  ;;  %v1482_v4 = vmul.f32 %v4179_v20, %v4630_v59  ;;  %v1285_v48 = vmul.f32 %v4351_v16, %v4659_v54  ;;  %v2044_v29 = vadd.f32 %v5529_v9, %v2042_v25  ;;  %v1218_v13 = vld [vmem:[#allocation2 + $0x332] sm:$0xff] }
 0x181   :  { %v1348_v8 = vadd.f32 %v1284_v39, %v1151_v61  ;;  %v957_v51 = vadd.f32 %v893_v47, %v759_v55  ;;  %v1090_v35 = vmul.f32 %v4296_v53, %v4693_v1  ;;  %v2237_v21 = vadd.f32 %v5530_v40, %v2235_v43  ;;  %v5531_v61 = vld [vmem:[#allocation36_spill] sm:$0xff] }
 0x182   :  { %v1153_v17 = vadd.f32 %v1089_v58, %v956_v6  ;;  %v1483_v0 = vmul.f32 %v4179_v20, %v297_v32  ;;  %v1286_v59 = vmul.f32 %v4351_v16, %v4669_v49  ;;  %v2046_v44 = vadd.f32 %v4497_v11, %v2044_v29  ;;  %v1219_v58 = vld [vmem:[#allocation2 + $0x33a] sm:$0xff]  ;;  %v2600_v43 = vld [vmem:[%s5280_s1 + $0x8] ss:$0 sm:$0xff] }
 0x183   :  { %v1742_v22 = vadd.f32 %v1678_v14, %v1545_v60  ;;  %v958_v10 = vadd.f32 %v894_v15, %v760_v50  ;;  %v1091_v39 = vmul.f32 %v4296_v53, %v4703_v52  ;;  %v2239_v55 = vadd.f32 %v5531_v61, %v2237_v21  ;;  %v1811_v21 = vld [vmem:[#allocation2 + $0x34a] sm:$0xff]  ;;  %v5533_v61 = vld [vmem:[#allocation3_spill] sm:$0xff] }
 0x184   :  { %v1546_v47 = vadd.f32 %v1482_v4, %v1347_v37  ;;  %v1679_v36 = vmul.f32 %v4189_v7, %v4632_v27  ;;  %v1349_v6 = vadd.f32 %v1285_v48, %v1152_v24  ;;  %v2048_v32 = vadd.f32 %v4528_v31, %v2046_v44  ;;  %v2601_v48 = vld [vmem:[%s5280_s1 + $0x9] ss:$0 sm:$0xff] }
 0x185   :  { %v1154_v25 = vadd.f32 %v1090_v35, %v957_v51  ;;  %v1484_v41 = vmul.f32 %v4179_v20, %v823_v56  ;;  %v1287_v11 = vmul.f32 %v4351_v16, %v1218_v13  ;;  %v2241_v14 = vadd.f32 %v4493_v63, %v2239_v55 }
 0x186   :  { %v1547_v60 = vadd.f32 %v1483_v0, %v1348_v8  ;;  %v1680_v53 = vmul.f32 %v4189_v7, %v4645_v46  ;;  %v1350_v50 = vadd.f32 %v1286_v59, %v1153_v17  ;;  %v2050_v37 = vadd.f32 %v4555_v38, %v2048_v32  ;;  %v5532_v17 = vld [vmem:[#allocation5_spill] sm:$0xff] }
 0x187   :  { %v1155_v15 = vadd.f32 %v1091_v39, %v958_v10  ;;  %v1485_v31 = vmul.f32 %v2600_v43, %v824_v30  ;;  %v1288_v24 = vmul.f32 %v4351_v16, %v1219_v58  ;;  %v2243_v20 = vadd.f32 %v4519_v12, %v2241_v14  ;;  %v1812_v10 = vld [vmem:[#allocation2 + $0x352] sm:$0xff] }
 0x188   :  { %v4732_v63 = vadd.f32 %v4678_v62, %v4655_v19  ;;  %v1743_v56 = vadd.f32 %v1679_v36, %v1546_v47  ;;  %v1876_v7 = vmul.f32 %v4206_v18, %v4659_v54  ;;  %v2052_v38 = vadd.f32 %v4583_v45, %v2050_v37 }
 0x189   :  { %v1548_v4 = vadd.f32 %v1484_v41, %v1349_v6  ;;  %v1681_v30 = vmul.f32 %v2601_v48, %v4693_v1  ;;  %v1351_v16 = vadd.f32 %v1287_v11, %v1154_v25  ;;  %v2245_v12 = vadd.f32 %v4533_v28, %v2243_v20  ;;  %v5534_v11 = vld [vmem:[#allocation4_spill] sm:$0xff] }
 0x18a   :  { %v4742_v9 = vadd.f32 %v1875_v2, %v1742_v22  ;;  %v1744_v19 = vadd.f32 %v1680_v53, %v1547_v60  ;;  %v1877_v62 = vmul.f32 %v4206_v18, %v4669_v49  ;;  %v2054_v54 = vadd.f32 %v4625_v57, %v2052_v38  ;;  %v2602_v49 = vld [vmem:[%s5280_s1 + $0xa] ss:$0 sm:$0xff] }
 0x18b   :  { %v1549_v29 = vadd.f32 %v1485_v31, %v1350_v50  ;;  %v1682_v45 = vmul.f32 %v2601_v48, %v4703_v52  ;;  %v1352_v8 = vadd.f32 %v1288_v24, %v1155_v15  ;;  %v2247_v51 = vadd.f32 %v4564_v42, %v2245_v12  ;;  %v5535_v15 = vld [vmem:[#allocation11_spill] sm:$0xff] }
 0x18c   :  { %v2134_v35 = vmul.f32 %v4611_v23, %v4611_v23  ;;  %v2057_v28 = vsel %vm17_vm0, %v4732_v63, 0.0  ;;  %v4753_v2 = vadd.f32 %v1876_v7, %v1743_v56  ;;  %v2056_v40 = vadd.f32 %v4640_v3, %v2054_v54 }
 0x18d   :  { %v1745_v18 = vadd.f32 %v1681_v30, %v1548_v4  ;;  %v1878_v57 = vmul.f32 %v2602_v49, %v1218_v13  ;;  %v1550_v0 = vadd.f32 %v5532_v17, %v1351_v16  ;;  %v2249_v42 = vadd.f32 %v4617_v34, %v2247_v51 }
 0x18e   :  { %v2135_v59 = vmul.f32 %v4732_v63, %v4732_v63  ;;  %v2059_v44 = vsel %vm17_vm0, %v4742_v9, 0.0  ;;  %v4765_v22 = vadd.f32 %v1877_v62, %v1744_v19  ;;  %v2058_v3 = vadd.f32 %v2057_v28, %v2056_v40 }
 0x18f   :  { %v1746_v39 = vadd.f32 %v1682_v45, %v1549_v29  ;;  %v1551_v55 = vadd.f32 %v5533_v61, %v1352_v8  ;;  %v1879_v47 = vmul.f32 %v2602_v49, %v1219_v58  ;;  %v2251_v13 = vadd.f32 %v4636_v33, %v2249_v42 }
 0x190   :  { %v1880_v36 = vmul.f32 %v2602_v49, %v1811_v21  ;;  %v2252_v6 = vsel %vm17_vm0, %v2134_v35, 0.0  ;;  %v2136_v34 = vmul.f32 %v4742_v9, %v4742_v9  ;;  %v2060_v32 = vadd.f32 %v2059_v44, %v2058_v3 }
 0x191   :  { %v2061_v25 = vsel %vm17_vm0, %v4753_v2, 0.0  ;;  %v4774_v41 = vadd.f32 %v1878_v57, %v1745_v18  ;;  %v1747_v14 = vadd.f32 %v5534_v11, %v1550_v0  ;;  %v2253_v60 = vadd.f32 %v2252_v6, %v2251_v13 }
 0x192   :  { %v1881_v53 = vmul.f32 %v2602_v49, %v1812_v10  ;;  %v2254_v58 = vsel %vm17_vm0, %v2135_v59, 0.0  ;;  %v2137_v33 = vmul.f32 %v4753_v2, %v4753_v2  ;;  %v2062_v50 = vadd.f32 %v2061_v25, %v2060_v32 }
 0x193   :  { %v2063_v37 = vsel %vm17_vm0, %v4765_v22, 0.0  ;;  %v1748_v43 = vadd.f32 %v5535_v15, %v1551_v55  ;;  %v4783_v31 = vadd.f32 %v1879_v47, %v1746_v39  ;;  %v2255_v24 = vadd.f32 %v2254_v58, %v2253_v60 }
 0x194   :  { %v2256_v20 = vsel %vm17_vm0, %v2136_v34, 0.0  ;;  %v2138_v56 = vmul.f32 %v4765_v22, %v4765_v22  ;;  %v2064_v7 = vadd.f32 %v2063_v37, %v2062_v50  ;;  %v2065_v38 = vsel %vm17_vm0, %v4774_v41, 0.0 }
 0x195   :  { %v4790_v4 = vadd.f32 %v1880_v36, %v1747_v14  ;;  %v2257_v48 = vadd.f32 %v2256_v20, %v2255_v24  ;;  %v2258_v30 = vsel %vm17_vm0, %v2137_v33, 0.0  ;;  %v2139_v16 = vmul.f32 %v4774_v41, %v4774_v41  ;;  %v2281_v24 = vld [vmem:[%s5281_s2] sm:$0x1] }
 0x196   :  { %v2066_v12 = vadd.f32 %v2065_v38, %v2064_v7  ;;  %v4795_v19 = vadd.f32 %v1881_v53, %v1748_v43  ;;  %v2067_v62 = vsel %vm17_vm0, %v4783_v31, 0.0  ;;  %v2260_v29 = vsel %vm17_vm0, %v2138_v56, 0.0  ;;  %v2285_v38 = vld [vmem:[%s5282_s3] sm:$0x1] }
 0x197   :  { %v2259_v54 = vadd.f32 %v2258_v30, %v2257_v48  ;;  %v2140_v45 = vmul.f32 %v4783_v31, %v4783_v31  ;;  %v2069_v51 = vsel %vm17_vm0, %v4790_v4, 0.0  ;;  %v2262_v28 = vsel %vm17_vm0, %v2139_v16, 0.0 }
 0x198   :  { %v2068_v8 = vadd.f32 %v2067_v62, %v2066_v12  ;;  %v2141_v40 = vmul.f32 %v4790_v4, %v4790_v4  ;;  %v2071_v18 = vsel %vm17_vm0, %v4795_v19, 0.0  ;;  %v2142_v57 = vmul.f32 %v4795_v19, %v4795_v19  ;;  %v5536_v12 = vld [vmem:[#allocation8_spill] sm:$0xff] }
 0x199   :  { %v2261_v35 = vadd.f32 %v2260_v29, %v2259_v54  ;;  %v2264_v17 = vsel %vm17_vm0, %v2140_v45, 0.0  ;;  %v2289_v15 = vlaneseq  ;;  %v5537_v54 = vld [vmem:[#allocation6_spill] sm:$0xff]  ;;  %v5538_v45 = vld [vmem:[#allocation7_spill] sm:$0xff] }
 0x19a   :  { %v2070_v21 = vadd.f32 %v2069_v51, %v2068_v8  ;;  %v2266_v59 = vsel %vm17_vm0, %v2141_v40, 0.0  ;;  %v2268_v10 = vsel %vm17_vm0, %v2142_v57, 0.0  ;;  %v5539_v51 = vld [vmem:[#allocation10_spill] sm:$0xff] }
 0x19b   :  { %v2263_v49 = vadd.f32 %v2262_v28, %v2261_v35  ;;  %v2290_v43 = vshrl.u32 %v2289_v15, 7  ;;  %v5540_v28 = vld [vmem:[#allocation13_spill] sm:$0xff]  ;;  %v2604_v15 = vld [vmem:[#allocation2 + $0x21] sm:$0xff] }
 0x19c   :  { %v2072_v0 = vadd.f32 %v2071_v18, %v2070_v21  ;;  %v5541_v21 = vld [vmem:[#allocation14_spill] sm:$0xff] }
 0x19d   :  { %v2265_v42 = vadd.f32 %v2264_v17, %v2263_v49  ;;  %v2291_v20 = vsub.s32 0, %v2290_v43  ;;  %v5542_v49 = vld [vmem:[#allocation15_spill] sm:$0xff] }
 0x19e   :  { %v2073_v44 = vrot.slane %v2072_v0, 4 }
 0x19f   :  { %v2267_v3 = vadd.f32 %v2266_v59, %v2265_v42  ;;  %v5544_v59 = vld [vmem:[#allocation21_spill] sm:$0xff] }
 0x1a0   :  { %v2074_v39 = vadd.f32 %v2073_v44, %v2072_v0  ;;  %v5543_v0 = vld [vmem:[#allocation17_spill] sm:$0xff] }
 0x1a1   :  { %v2269_v61 = vadd.f32 %v2268_v10, %v2267_v3  ;;  %v5545_v3 = vld [vmem:[#allocation22_spill] sm:$0xff] }
 0x1a2   :  { %v2075_v55 = vrot.slane %v2074_v39, 2 }
 0x1a3   :  { %v2270_v47 = vrot.slane %v2269_v61, 4 }
 0x1a4   :  { %v2076_v13 = vadd.f32 %v2075_v55, %v2074_v39  ;;  %v5546_v39 = vld [vmem:[#allocation18_spill] sm:$0xff]  ;;  %v5547_v55 = vld [vmem:[#allocation19_spill] sm:$0xff] }
 0x1a5   :  { %v2271_v36 = vadd.f32 %v2270_v47, %v2269_v61 }
 0x1a6   :  { %v2077_v6 = vrot.slane %v2076_v13, 1 }
 0x1a7   :  { %v2272_v34 = vrot.slane %v2271_v36, 2 }
 0x1a8   :  { %v2078_v32 = vadd.f32 %v2077_v6, %v2076_v13  ;;  %v5548_v13 = vld [vmem:[#allocation20_spill] sm:$0xff]  ;;  %v5549_v6 = vld [vmem:[#allocation25_spill] sm:$0xff] }
 0x1a9   :  { %v2273_v25 = vadd.f32 %v2272_v34, %v2271_v36 }
 0x1aa   :  { %v2276_v11 = vmul.f32 0.001953125, %v2078_v32 }
 0x1ab   :  { %v2274_v14 = vrot.slane %v2273_v25, 1 }
 0x1ac   :  { %v2278_v53 = vmul.f32 %v2276_v11, %v2276_v11 }
 0x1ad   :  { %v2275_v60 = vadd.f32 %v2274_v14, %v2273_v25 }
 0x1af   :  { %v2277_v58 = vmul.f32 0.001953125, %v2275_v60 }
 0x1b1   :  { %v2279_v33 = vsub.f32 %v2277_v58, %v2278_v53 }
 0x1b3   :  { %v2280_v50 = vmax.f32 %v2279_v33, 0.0 }
 0x1b5   :  { %v2282_v37 = vadd.f32 1e-05, %v2280_v50  ;;  %v2603_v50 = vld [vmem:[#allocation2 + $0x19] sm:$0xff] }
 0x1b7   :  { %2576 = vrsqrt.f32 %v2282_v37 }
 0x1c1   :  { %v2577_v56 = vpop.eup %2576 }
 0x1c2   :  { %v2284_v7 = vmul.f32 %v2577_v56, %v2281_v24  ;;  %v2605_v24 = vld [vmem:[#allocation2 + $0x31] sm:$0xff]  ;;  %v2606_v56 = vld [vmem:[#allocation2 + $0x39] sm:$0xff] }
 0x1c4   :  { %v2286_v48 = vmul.f32 %v2284_v7, %v2276_v11  ;;  %v4820_v30 = vrot.slane %v2284_v7, %v2291_v20 }
 0x1c6   :  { %v2287_v16 = vsub.f32 %v2285_v38, %v2286_v48  ;;  %v2294_v62 = vmul.f32 %v4820_v30, %v5536_v12  ;;  %v2295_v29 = vmul.f32 %v4820_v30, %v5537_v54  ;;  %v2296_v8 = vmul.f32 %v4820_v30, %v5538_v45  ;;  %v2607_v38 = vld [vmem:[#allocation2 + $0x49] sm:$0xff] }
 0x1c7   :  { %v2297_v35 = vmul.f32 %v4820_v30, %v5539_v51  ;;  %v2298_v40 = vmul.f32 %v4820_v30, %v5540_v28  ;;  %v2299_v18 = vmul.f32 %v4820_v30, %v5541_v21  ;;  %v2300_v57 = vmul.f32 %v4820_v30, %v5542_v49 }
 0x1c8   :  { %v4836_v17 = vrot.slane %v2287_v16, %v2291_v20  ;;  %v2301_v42 = vmul.f32 %v4820_v30, %v5543_v0  ;;  %v2302_v44 = vmul.f32 %v4820_v30, %v5544_v59  ;;  %v2303_v10 = vmul.f32 %v4820_v30, %v5545_v3  ;;  %v2608_v16 = vld [vmem:[#allocation2 + $0x51] sm:$0xff] }
 0x1c9   :  { %v2304_v61 = vmul.f32 %v4820_v30, %v5546_v39  ;;  %v2305_v47 = vmul.f32 %v4820_v30, %v5547_v55  ;;  %v2306_v36 = vmul.f32 %v4820_v30, %v5548_v13  ;;  %v2307_v34 = vmul.f32 %v4820_v30, %v5549_v6  ;;  %v2616_v6 = vld [vmem:[#allocation2 + $0xb1] sm:$0xff] }
 0x1ca   :  { %v2364_v32 = vadd.f32 %v4836_v17, %v2294_v62  ;;  %v2365_v25 = vadd.f32 %v4836_v17, %v2295_v29  ;;  %v2366_v11 = vadd.f32 %v4836_v17, %v2296_v8  ;;  %v2367_v14 = vadd.f32 %v4836_v17, %v2297_v35  ;;  %v2609_v62 = vld [vmem:[#allocation2 + $0x61] sm:$0xff]  ;;  %v2610_v29 = vld [vmem:[#allocation2 + $0x69] sm:$0xff] }
 0x1cb   :  { %v2368_v60 = vadd.f32 %v4836_v17, %v2298_v40  ;;  %v2369_v53 = vadd.f32 %v4836_v17, %v2299_v18  ;;  %v2370_v58 = vadd.f32 %v4836_v17, %v2300_v57  ;;  %v2371_v33 = vadd.f32 %v4836_v17, %v2301_v42  ;;  %v5550_v18 = vld [vmem:[#allocation30_spill] sm:$0xff]  ;;  %v5551_v57 = vld [vmem:[#allocation31_spill] sm:$0xff] }
 0x1cc   :  { %v2428_v37 = vmax.f32 %v2603_v50, %v2364_v32  ;;  %v2429_v43 = vmax.f32 %v2604_v15, %v2365_v25  ;;  %v2430_v20 = vmax.f32 %v2605_v24, %v2366_v11  ;;  %v2431_v7 = vmax.f32 %v2606_v56, %v2367_v14  ;;  %v2611_v42 = vld [vmem:[#allocation2 + $0x79] sm:$0xff] }
 0x1cd   :  { %v2432_v48 = vmax.f32 %v2607_v38, %v2368_v60  ;;  %v2433_v12 = vmax.f32 %v2608_v16, %v2369_v53  ;;  %v2434_v54 = vmax.f32 %v2609_v62, %v2370_v58  ;;  %v2435_v45 = vmax.f32 %v2610_v29, %v2371_v33  ;;  %v5552_v25 = vld [vmem:[#allocation34_spill] sm:$0xff]  ;;  %v5554_v53 = vld [vmem:[#allocation39_spill] sm:$0xff]  ;;  %v5555_v33 = vld [vmem:[#allocation41_spill] sm:$0xff] }
 0x1ce   :  { %2492 = vst.msk [vmem:[%s5283_s4] sm:$0xff] %vm17_vm0, %v2428_v37  ;;  %2493 = vst.msk [vmem:[%s5283_s4 + $0x8] sm:$0xff] %vm17_vm0, %v2429_v43  ;;  %v2372_v8 = vadd.f32 %v4836_v17, %v2302_v44  ;;  %v2373_v51 = vadd.f32 %v4836_v17, %v2303_v10  ;;  %v2374_v35 = vadd.f32 %v4836_v17, %v2304_v61  ;;  %v2612_v44 = vld [vmem:[#allocation2 + $0x81] sm:$0xff]  ;;  %v2613_v10 = vld [vmem:[#allocation2 + $0x91] sm:$0xff] }
 0x1cf   :  { %2494 = vst.msk [vmem:[%s5283_s4 + $0x10] sm:$0xff] %vm17_vm0, %v2430_v20  ;;  %2495 = vst.msk [vmem:[%s5283_s4 + $0x18] sm:$0xff] %vm17_vm0, %v2431_v7  ;;  %v2375_v28 = vadd.f32 %v4836_v17, %v2305_v47  ;;  %v2376_v40 = vadd.f32 %v4836_v17, %v2306_v36  ;;  %v2377_v21 = vadd.f32 %v4836_v17, %v2307_v34  ;;  %v2614_v61 = vld [vmem:[#allocation2 + $0x99] sm:$0xff]  ;;  %v2615_v47 = vld [vmem:[#allocation2 + $0xa9] sm:$0xff] }
 0x1d0   :  { %2496 = vst.msk [vmem:[%s5283_s4 + $0x20] sm:$0xff] %vm17_vm0, %v2432_v48  ;;  %2497 = vst.msk [vmem:[%s5283_s4 + $0x28] sm:$0xff] %vm17_vm0, %v2433_v12  ;;  %v2308_v49 = vmul.f32 %v4820_v30, %v5550_v18  ;;  %v2309_v0 = vmul.f32 %v4820_v30, %v5551_v57  ;;  %v2436_v59 = vmax.f32 %v2611_v42, %v2372_v8  ;;  %v5553_v14 = vld [vmem:[#allocation38_spill] sm:$0xff]  ;;  %v2617_v37 = vld [vmem:[#allocation2 + $0xc1] sm:$0xff] }
 0x1d1   :  { %2498 = vst.msk [vmem:[%s5283_s4 + $0x30] sm:$0xff] %vm17_vm0, %v2434_v54  ;;  %2499 = vst.msk [vmem:[%s5283_s4 + $0x38] sm:$0xff] %vm17_vm0, %v2435_v45  ;;  %v2437_v3 = vmax.f32 %v2612_v44, %v2373_v51  ;;  %v2438_v39 = vmax.f32 %v2613_v10, %v2374_v35  ;;  %v2439_v55 = vmax.f32 %v2614_v61, %v2375_v28  ;;  %v2618_v43 = vld [vmem:[#allocation2 + $0xc9] sm:$0xff]  ;;  %v2619_v28 = vld [vmem:[#allocation2 + $0xd9] sm:$0xff] }
 0x1d2   :  { %v2440_v13 = vmax.f32 %v2615_v47, %v2376_v40  ;;  %v2441_v36 = vmax.f32 %v2616_v6, %v2377_v21  ;;  %v2378_v34 = vadd.f32 %v4836_v17, %v2308_v49  ;;  %v2379_v32 = vadd.f32 %v4836_v17, %v2309_v0  ;;  %2500 = vst.msk [vmem:[%s5283_s4 + $0x40] sm:$0xff] %vm17_vm0, %v2436_v59  ;;  %v5556_v20 = vld [vmem:[#allocation44_spill] sm:$0xff]  ;;  %v5557_v7 = vld [vmem:[#allocation45_spill] sm:$0xff]  ;;  %v2622_v0 = vld [vmem:[#allocation2 + $0xf9] sm:$0xff] }
 0x1d3   :  { %2501 = vst.msk [vmem:[%s5283_s4 + $0x48] sm:$0xff] %vm17_vm0, %v2437_v3  ;;  %2502 = vst.msk [vmem:[%s5283_s4 + $0x50] sm:$0xff] %vm17_vm0, %v2438_v39  ;;  %v2310_v11 = vmul.f32 %v4820_v30, %v5552_v25  ;;  %v2311_v60 = vmul.f32 %v4820_v30, %v5553_v14  ;;  %v2312_v58 = vmul.f32 %v4820_v30, %v5554_v53  ;;  %v5558_v45 = vld [vmem:[#allocation49_spill] sm:$0xff]  ;;  %v5559_v51 = vld [vmem:[#allocation56_spill] sm:$0xff] }
 0x1d4   :  { %2503 = vst.msk [vmem:[%s5283_s4 + $0x58] sm:$0xff] %vm17_vm0, %v2439_v55  ;;  %v2313_v50 = vmul.f32 %v4820_v30, %v5555_v33  ;;  %2504 = vst.msk [vmem:[%s5283_s4 + $0x60] sm:$0xff] %vm17_vm0, %v2440_v13  ;;  %v2442_v15 = vmax.f32 %v2617_v37, %v2378_v34  ;;  %v2443_v24 = vmax.f32 %v2618_v43, %v2379_v32  ;;  %v2620_v21 = vld [vmem:[#allocation2 + $0xe1] sm:$0xff]  ;;  %v2621_v49 = vld [vmem:[#allocation2 + $0xf1] sm:$0xff] }
 0x1d5   :  { %2505 = vst.msk [vmem:[%s5283_s4 + $0x68] sm:$0xff] %vm17_vm0, %v2441_v36  ;;  %v2314_v56 = vmul.f32 %v4820_v30, %v5556_v20  ;;  %v2315_v38 = vmul.f32 %v4820_v30, %v5557_v7  ;;  %v2380_v48 = vadd.f32 %v4836_v17, %v2310_v11  ;;  %v2381_v16 = vadd.f32 %v4836_v17, %v2311_v60  ;;  %v2623_v59 = vld [vmem:[#allocation2 + $0x109] sm:$0xff]  ;;  %v2624_v3 = vld [vmem:[#allocation2 + $0x111] sm:$0xff]  ;;  %v5561_v13 = vld [vmem:[#allocation59_spill] sm:$0xff] }
 0x1d6   :  { %v2382_v12 = vadd.f32 %v4836_v17, %v2312_v58  ;;  %v2383_v62 = vadd.f32 %v4836_v17, %v2313_v50  ;;  %2506 = vst.msk [vmem:[%s5283_s4 + $0x70] sm:$0xff] %vm17_vm0, %v2442_v15  ;;  %2507 = vst.msk [vmem:[%s5283_s4 + $0x78] sm:$0xff] %vm17_vm0, %v2443_v24  ;;  %v2316_v8 = vmul.f32 %v4820_v30, %v5558_v45  ;;  %v5560_v55 = vld [vmem:[#allocation57_spill] sm:$0xff]  ;;  %v5563_v32 = vld [vmem:[#allocation66_spill] sm:$0xff] }
 0x1d7   :  { %v2384_v54 = vadd.f32 %v4836_v17, %v2314_v56  ;;  %v2385_v29 = vadd.f32 %v4836_v17, %v2315_v38  ;;  %v2317_v35 = vmul.f32 %v4820_v30, %v5559_v51  ;;  %v2444_v40 = vmax.f32 %v2619_v28, %v2380_v48  ;;  %v5562_v36 = vld [vmem:[#allocation65_spill] sm:$0xff]  ;;  %v2625_v11 = vld [vmem:[#allocation2 + $0x121] sm:$0xff] }
 0x1d8   :  { %v2445_v18 = vmax.f32 %v2620_v21, %v2381_v16  ;;  %v2446_v57 = vmax.f32 %v2621_v49, %v2382_v12  ;;  %v2447_v42 = vmax.f32 %v2622_v0, %v2383_v62  ;;  %v2386_v39 = vadd.f32 %v4836_v17, %v2316_v8  ;;  %v2626_v60 = vld [vmem:[#allocation2 + $0x129] sm:$0xff]  ;;  %v5564_v58 = vld [vmem:[#allocation67_spill] sm:$0xff]  ;;  %v2629_v8 = vld [vmem:[#allocation2 + $0x151] sm:$0xff] }
 0x1d9   :  { %v2448_v44 = vmax.f32 %v2623_v59, %v2384_v54  ;;  %v2449_v10 = vmax.f32 %v2624_v3, %v2385_v29  ;;  %v2387_v61 = vadd.f32 %v4836_v17, %v2317_v35  ;;  %2508 = vst.msk [vmem:[%s5283_s4 + $0x80] sm:$0xff] %vm17_vm0, %v2444_v40  ;;  %v2318_v47 = vmul.f32 %v4820_v30, %v5560_v55  ;;  %v5565_v50 = vld [vmem:[#allocation68_spill] sm:$0xff]  ;;  %v5566_v38 = vld [vmem:[#allocation69_spill] sm:$0xff]  ;;  %v5567_v16 = vld [vmem:[#allocation71_spill] sm:$0xff] }
 0x1da   :  { %2509 = vst.msk [vmem:[%s5283_s4 + $0x88] sm:$0xff] %vm17_vm0, %v2445_v18  ;;  %2510 = vst.msk [vmem:[%s5283_s4 + $0x90] sm:$0xff] %vm17_vm0, %v2446_v57  ;;  %v2319_v6 = vmul.f32 %v4820_v30, %v5561_v13  ;;  %v2320_v34 = vmul.f32 %v4820_v30, %v5562_v36  ;;  %v2321_v25 = vmul.f32 %v4820_v30, %v5563_v32  ;;  %v2627_v62 = vld [vmem:[#allocation2 + $0x139] sm:$0xff]  ;;  %v2628_v29 = vld [vmem:[#allocation2 + $0x141] sm:$0xff] }
 0x1db   :  { %2511 = vst.msk [vmem:[%s5283_s4 + $0x98] sm:$0xff] %vm17_vm0, %v2447_v42  ;;  %2512 = vst.msk [vmem:[%s5283_s4 + $0xa0] sm:$0xff] %vm17_vm0, %v2448_v44  ;;  %v2450_v14 = vmax.f32 %v2625_v11, %v2386_v39  ;;  %v2451_v53 = vmax.f32 %v2626_v60, %v2387_v61  ;;  %v2322_v33 = vmul.f32 %v4820_v30, %v5564_v58  ;;  %v2630_v35 = vld [vmem:[#allocation2 + $0x159] sm:$0xff]  ;;  %v2631_v40 = vld [vmem:[#allocation2 + $0x169] sm:$0xff] }
 0x1dc   :  { %2513 = vst.msk [vmem:[%s5283_s4 + $0xa8] sm:$0xff] %vm17_vm0, %v2449_v10  ;;  %v2323_v37 = vmul.f32 %v4820_v30, %v5565_v50  ;;  %v2388_v15 = vadd.f32 %v4836_v17, %v2318_v47  ;;  %v2389_v43 = vadd.f32 %v4836_v17, %v2319_v6  ;;  %v2390_v24 = vadd.f32 %v4836_v17, %v2320_v34  ;;  %v2632_v18 = vld [vmem:[#allocation2 + $0x171] sm:$0xff]  ;;  %v5568_v42 = vld [vmem:[#allocation75_spill] sm:$0xff]  ;;  %v5569_v44 = vld [vmem:[#allocation76_spill] sm:$0xff] }
 0x1dd   :  { %v2391_v20 = vadd.f32 %v4836_v17, %v2321_v25  ;;  %2514 = vst.msk [vmem:[%s5283_s4 + $0xb0] sm:$0xff] %vm17_vm0, %v2450_v14  ;;  %2515 = vst.msk [vmem:[%s5283_s4 + $0xb8] sm:$0xff] %vm17_vm0, %v2451_v53  ;;  %v2392_v56 = vadd.f32 %v4836_v17, %v2322_v33  ;;  %v2324_v48 = vmul.f32 %v4820_v30, %v5566_v38  ;;  %v5570_v10 = vld [vmem:[#allocation80_spill] sm:$0xff]  ;;  %v5573_v25 = vld [vmem:[#allocation89_spill] sm:$0xff] }
 0x1de   :  { %v2393_v7 = vadd.f32 %v4836_v17, %v2323_v37  ;;  %v2325_v12 = vmul.f32 %v4820_v30, %v5567_v16  ;;  %v2452_v54 = vmax.f32 %v2627_v62, %v2388_v15  ;;  %v2453_v45 = vmax.f32 %v2628_v29, %v2389_v43  ;;  %v5571_v61 = vld [vmem:[#allocation84_spill] sm:$0xff]  ;;  %v5574_v37 = vld [vmem:[#allocation90_spill] sm:$0xff]  ;;  %v5575_v43 = vld [vmem:[#allocation91_spill] sm:$0xff] }
 0x1df   :  { %v2454_v51 = vmax.f32 %v2629_v8, %v2390_v24  ;;  %v2455_v28 = vmax.f32 %v2630_v35, %v2391_v20  ;;  %v2456_v21 = vmax.f32 %v2631_v40, %v2392_v56  ;;  %v2394_v57 = vadd.f32 %v4836_v17, %v2324_v48  ;;  %v2633_v47 = vld [vmem:[#allocation2 + $0x181] sm:$0xff]  ;;  %v2634_v6 = vld [vmem:[#allocation2 + $0x189] sm:$0xff] }
 0x1e0   :  { %v2457_v49 = vmax.f32 %v2632_v18, %v2393_v7  ;;  %v2395_v0 = vadd.f32 %v4836_v17, %v2325_v12  ;;  %2516 = vst.msk [vmem:[%s5283_s4 + $0xc0] sm:$0xff] %vm17_vm0, %v2452_v54  ;;  %2517 = vst.msk [vmem:[%s5283_s4 + $0xc8] sm:$0xff] %vm17_vm0, %v2453_v45  ;;  %v2326_v59 = vmul.f32 %v4820_v30, %v5568_v42  ;;  %v5572_v34 = vld [vmem:[#allocation88_spill] sm:$0xff]  ;;  %v2636_v7 = vld [vmem:[#allocation2 + $0x1d1] sm:$0xff] }
 0x1e1   :  { %2518 = vst.msk [vmem:[%s5283_s4 + $0xd0] sm:$0xff] %vm17_vm0, %v2454_v51  ;;  %2519 = vst.msk [vmem:[%s5283_s4 + $0xd8] sm:$0xff] %vm17_vm0, %v2455_v28  ;;  %v2327_v3 = vmul.f32 %v4820_v30, %v5569_v44  ;;  %v2328_v39 = vmul.f32 %v4820_v30, %v5570_v10  ;;  %v2329_v55 = vmul.f32 %v4820_v30, %v5571_v61  ;;  %v2635_v20 = vld [vmem:[#allocation2 + $0x1c9] sm:$0xff]  ;;  %v2637_v48 = vld [vmem:[#allocation2 + $0x1e1] sm:$0xff] }
 0x1e2   :  { %2520 = vst.msk [vmem:[%s5283_s4 + $0xe0] sm:$0xff] %vm17_vm0, %v2456_v21  ;;  %2521 = vst.msk [vmem:[%s5283_s4 + $0xe8] sm:$0xff] %vm17_vm0, %v2457_v49  ;;  %v2458_v13 = vmax.f32 %v2633_v47, %v2394_v57  ;;  %v2459_v36 = vmax.f32 %v2634_v6, %v2395_v0  ;;  %v2330_v32 = vmul.f32 %v4820_v30, %v5572_v34  ;;  %v2638_v12 = vld [vmem:[#allocation2 + $0x1e9] sm:$0xff]  ;;  %v2639_v54 = vld [vmem:[#allocation2 + $0x1f9] sm:$0xff] }
 0x1e3   :  { %v2331_v11 = vmul.f32 %v4820_v30, %v5573_v25  ;;  %v2396_v14 = vadd.f32 %v4836_v17, %v2326_v59  ;;  %v2397_v60 = vadd.f32 %v4836_v17, %v2327_v3  ;;  %v2398_v53 = vadd.f32 %v4836_v17, %v2328_v39  ;;  %v2640_v45 = vld [vmem:[#allocation2 + $0x201] sm:$0xff]  ;;  %v5577_v21 = vld [vmem:[#allocation93_spill] sm:$0xff]  ;;  %v2642_v3 = vld [vmem:[#allocation2 + $0x219] sm:$0xff] }
 0x1e4   :  { %v2399_v58 = vadd.f32 %v4836_v17, %v2329_v55  ;;  %2522 = vst.msk [vmem:[%s5283_s4 + $0xf0] sm:$0xff] %vm17_vm0, %v2458_v13  ;;  %2523 = vst.msk [vmem:[%s5283_s4 + $0xf8] sm:$0xff] %vm17_vm0, %v2459_v36  ;;  %v2400_v33 = vadd.f32 %v4836_v17, %v2330_v32  ;;  %v2332_v15 = vmul.f32 %v4820_v30, %v5574_v37  ;;  %v5576_v28 = vld [vmem:[#allocation92_spill] sm:$0xff]  ;;  %v5578_v49 = vld [vmem:[#allocation95_spill] sm:$0xff] }
 0x1e5   :  { %v2401_v50 = vadd.f32 %v4836_v17, %v2331_v11  ;;  %v2333_v24 = vmul.f32 %v4820_v30, %v5575_v43  ;;  %v2460_v56 = vmax.f32 %v2635_v20, %v2396_v14  ;;  %v2461_v38 = vmax.f32 %v2636_v7, %v2397_v60  ;;  %v5579_v0 = vld [vmem:[#allocation96_spill] sm:$0xff]  ;;  %v2641_v59 = vld [vmem:[#allocation2 + $0x211] sm:$0xff]  ;;  %v5583_v60 = vld [vmem:[#allocation23_spill] sm:$0xff] }
 0x1e6   :  { %v2462_v16 = vmax.f32 %v2637_v48, %v2398_v53  ;;  %v2463_v62 = vmax.f32 %v2638_v12, %v2399_v58  ;;  %v2464_v29 = vmax.f32 %v2639_v54, %v2400_v33  ;;  %v2402_v51 = vadd.f32 %v4836_v17, %v2332_v15  ;;  %v5580_v39 = vld [vmem:[#allocation9_spill] sm:$0xff]  ;;  %v5581_v55 = vld [vmem:[#allocation16_spill] sm:$0xff] }
 0x1e7   :  { %v2465_v8 = vmax.f32 %v2640_v45, %v2401_v50  ;;  %v2403_v35 = vadd.f32 %v4836_v17, %v2333_v24  ;;  %2524 = vst.msk [vmem:[%s5283_s4 + $0x100] sm:$0xff] %vm17_vm0, %v2460_v56  ;;  %2525 = vst.msk [vmem:[%s5283_s4 + $0x108] sm:$0xff] %vm17_vm0, %v2461_v38  ;;  %v2334_v40 = vmul.f32 %v4820_v30, %v5576_v28  ;;  %v5582_v11 = vld [vmem:[#allocation101_spill] sm:$0xff]  ;;  %v2645_v15 = vld [vmem:[#allocation2 + $0x241] sm:$0xff] }
 0x1e8   :  { %2526 = vst.msk [vmem:[%s5283_s4 + $0x110] sm:$0xff] %vm17_vm0, %v2462_v16  ;;  %2527 = vst.msk [vmem:[%s5283_s4 + $0x118] sm:$0xff] %vm17_vm0, %v2463_v62  ;;  %v2335_v18 = vmul.f32 %v4820_v30, %v5577_v21  ;;  %v2336_v57 = vmul.f32 %v4820_v30, %v5578_v49  ;;  %v2337_v42 = vmul.f32 %v4820_v30, %v5579_v0  ;;  %v2643_v58 = vld [vmem:[#allocation2 + $0x229] sm:$0xff]  ;;  %v2644_v50 = vld [vmem:[#allocation2 + $0x231] sm:$0xff] }
 0x1e9   :  { %2528 = vst.msk [vmem:[%s5283_s4 + $0x120] sm:$0xff] %vm17_vm0, %v2464_v29  ;;  %2529 = vst.msk [vmem:[%s5283_s4 + $0x128] sm:$0xff] %vm17_vm0, %v2465_v8  ;;  %v2466_v44 = vmax.f32 %v2641_v59, %v2402_v51  ;;  %v2467_v10 = vmax.f32 %v2642_v3, %v2403_v35  ;;  %v2338_v61 = vmul.f32 %v4820_v30, %v5580_v39  ;;  %v2646_v24 = vld [vmem:[#allocation2 + $0x249] sm:$0xff]  ;;  %v2647_v56 = vld [vmem:[#allocation2 + $0x259] sm:$0xff] }
 0x1ea   :  { %v2339_v47 = vmul.f32 %v4820_v30, %v5581_v55  ;;  %v2404_v13 = vadd.f32 %v4836_v17, %v2334_v40  ;;  %v2405_v6 = vadd.f32 %v4836_v17, %v2335_v18  ;;  %v2406_v36 = vadd.f32 %v4836_v17, %v2336_v57  ;;  %v2648_v38 = vld [vmem:[#allocation2 + $0x261] sm:$0xff]  ;;  %v5585_v29 = vld [vmem:[#allocation29_spill] sm:$0xff]  ;;  %v2650_v40 = vld [vmem:[#allocation2 + $0x279] sm:$0xff] }
 0x1eb   :  { %v2407_v34 = vadd.f32 %v4836_v17, %v2337_v42  ;;  %2530 = vst.msk [vmem:[%s5283_s4 + $0x130] sm:$0xff] %vm17_vm0, %v2466_v44  ;;  %2531 = vst.msk [vmem:[%s5283_s4 + $0x138] sm:$0xff] %vm17_vm0, %v2467_v10  ;;  %v2408_v32 = vadd.f32 %v4836_v17, %v2338_v61  ;;  %v2340_v14 = vmul.f32 %v4820_v30, %v5582_v11  ;;  %v5584_v62 = vld [vmem:[#allocation27_spill] sm:$0xff]  ;;  %v2649_v35 = vld [vmem:[#allocation2 + $0x271] sm:$0xff] }
 0x1ec   :  { %v2409_v25 = vadd.f32 %v4836_v17, %v2339_v47  ;;  %v2341_v53 = vmul.f32 %v4820_v30, %v5583_v60  ;;  %v2468_v33 = vmax.f32 %v2643_v58, %v2404_v13  ;;  %v2469_v37 = vmax.f32 %v2644_v50, %v2405_v6  ;;  %v5586_v18 = vld [vmem:[#allocation40_spill] sm:$0xff]  ;;  %v5587_v49 = vld [vmem:[#allocation35_spill] sm:$0xff]  ;;  %v5588_v10 = vld [vmem:[#allocation37_spill] sm:$0xff] }
 0x1ed   :  { %v2470_v43 = vmax.f32 %v2645_v15, %v2406_v36  ;;  %v2471_v20 = vmax.f32 %v2646_v24, %v2407_v34  ;;  %v2472_v7 = vmax.f32 %v2647_v56, %v2408_v32  ;;  %v2410_v16 = vadd.f32 %v4836_v17, %v2340_v14  ;;  %v2651_v55 = vld [vmem:[#allocation2 + $0x289] sm:$0xff]  ;;  %v2652_v13 = vld [vmem:[#allocation2 + $0x291] sm:$0xff]  ;;  %v2653_v36 = vld [vmem:[#allocation2 + $0x2a1] sm:$0xff] }
 0x1ee   :  { %v2473_v48 = vmax.f32 %v2648_v38, %v2409_v25  ;;  %v2411_v12 = vadd.f32 %v4836_v17, %v2341_v53  ;;  %2532 = vst.msk [vmem:[%s5283_s4 + $0x140] sm:$0xff] %vm17_vm0, %v2468_v33  ;;  %2533 = vst.msk [vmem:[%s5283_s4 + $0x148] sm:$0xff] %vm17_vm0, %v2469_v37  ;;  %v2342_v54 = vmul.f32 %v4820_v30, %v5584_v62  ;;  %v2654_v32 = vld [vmem:[#allocation2 + $0x2a9] sm:$0xff]  ;;  %v2655_v11 = vld [vmem:[#allocation2 + $0x2b9] sm:$0xff] }
 0x1ef   :  { %2534 = vst.msk [vmem:[%s5283_s4 + $0x150] sm:$0xff] %vm17_vm0, %v2470_v43  ;;  %2535 = vst.msk [vmem:[%s5283_s4 + $0x158] sm:$0xff] %vm17_vm0, %v2471_v20  ;;  %v2343_v45 = vmul.f32 %v4820_v30, %v5585_v29  ;;  %v2344_v8 = vmul.f32 %v4820_v30, %v4479_v5  ;;  %v2345_v51 = vmul.f32 %v4820_v30, %v4500_v26  ;;  %v2656_v60 = vld [vmem:[#allocation2 + $0x2c1] sm:$0xff]  ;;  %v2658_v24 = vld [vmem:[#allocation2 + $0x2d9] sm:$0xff] }
 0x1f0   :  { %2536 = vst.msk [vmem:[%s5283_s4 + $0x160] sm:$0xff] %vm17_vm0, %v2472_v7  ;;  %2537 = vst.msk [vmem:[%s5283_s4 + $0x168] sm:$0xff] %vm17_vm0, %v2473_v48  ;;  %v2474_v28 = vmax.f32 %v2649_v35, %v2410_v16  ;;  %v2475_v21 = vmax.f32 %v2650_v40, %v2411_v12  ;;  %v2346_v5 = vmul.f32 %v4820_v30, %v5586_v18  ;;  %v2659_v12 = vld [vmem:[#allocation2 + $0x2e9] sm:$0xff] }
 0x1f1   :  { %v2347_v26 = vmul.f32 %v4820_v30, %v5587_v49  ;;  %v2412_v57 = vadd.f32 %v4836_v17, %v2342_v54  ;;  %v2413_v0 = vadd.f32 %v4836_v17, %v2343_v45  ;;  %v2414_v42 = vadd.f32 %v4836_v17, %v2344_v8  ;;  %v5589_v54 = vld [vmem:[#allocation43_spill] sm:$0xff] }
 0x1f2   :  { %v2415_v59 = vadd.f32 %v4836_v17, %v2345_v51  ;;  %2538 = vst.msk [vmem:[%s5283_s4 + $0x170] sm:$0xff] %vm17_vm0, %v2474_v28  ;;  %2539 = vst.msk [vmem:[%s5283_s4 + $0x178] sm:$0xff] %vm17_vm0, %v2475_v21  ;;  %v2416_v44 = vadd.f32 %v4836_v17, %v2346_v5  ;;  %v2348_v39 = vmul.f32 %v4820_v30, %v5588_v10  ;;  %v5590_v45 = vld [vmem:[#allocation47_spill] sm:$0xff]  ;;  %v5591_v51 = vld [vmem:[#allocation42_spill] sm:$0xff] }
 0x1f3   :  { %v2417_v3 = vadd.f32 %v4836_v17, %v2347_v26  ;;  %v2349_v61 = vmul.f32 %v4820_v30, %v4611_v23  ;;  %v2476_v47 = vmax.f32 %v2651_v55, %v2412_v57  ;;  %v2477_v6 = vmax.f32 %v2652_v13, %v2413_v0 }
 0x1f4   :  { %v2478_v34 = vmax.f32 %v2653_v36, %v2414_v42  ;;  %v2479_v25 = vmax.f32 %v2654_v32, %v2415_v59  ;;  %v2480_v14 = vmax.f32 %v2655_v11, %v2416_v44  ;;  %v2418_v58 = vadd.f32 %v4836_v17, %v2348_v39 }
 0x1f5   :  { %v2481_v53 = vmax.f32 %v2656_v60, %v2417_v3  ;;  %v2419_v33 = vadd.f32 %v4836_v17, %v2349_v61  ;;  %2540 = vst.msk [vmem:[%s5283_s4 + $0x180] sm:$0xff] %vm17_vm0, %v2476_v47  ;;  %2541 = vst.msk [vmem:[%s5283_s4 + $0x188] sm:$0xff] %vm17_vm0, %v2477_v6  ;;  %v2350_v23 = vmul.f32 %v4820_v30, %v4732_v63  ;;  %v2657_v63 = vld [vmem:[#allocation2 + $0x2d1] sm:$0xff] }
 0x1f6   :  { %2542 = vst.msk [vmem:[%s5283_s4 + $0x190] sm:$0xff] %vm17_vm0, %v2478_v34  ;;  %2543 = vst.msk [vmem:[%s5283_s4 + $0x198] sm:$0xff] %vm17_vm0, %v2479_v25  ;;  %v2351_v50 = vmul.f32 %v4820_v30, %v4742_v9  ;;  %v2352_v37 = vmul.f32 %v4820_v30, %v4753_v2  ;;  %v2353_v15 = vmul.f32 %v4820_v30, %v4765_v22 }
 0x1f7   :  { %2544 = vst.msk [vmem:[%s5283_s4 + $0x1a0] sm:$0xff] %vm17_vm0, %v2480_v14  ;;  %2545 = vst.msk [vmem:[%s5283_s4 + $0x1a8] sm:$0xff] %vm17_vm0, %v2481_v53  ;;  %v2482_v43 = vmax.f32 %v2657_v63, %v2418_v58  ;;  %v2483_v9 = vmax.f32 %v2658_v24, %v2419_v33  ;;  %v2354_v2 = vmul.f32 %v4820_v30, %v4774_v41 }
 0x1f8   :  { %v2355_v22 = vmul.f32 %v4820_v30, %v4783_v31  ;;  %v2420_v20 = vadd.f32 %v4836_v17, %v2350_v23  ;;  %v2421_v56 = vadd.f32 %v4836_v17, %v2351_v50  ;;  %v2422_v7 = vadd.f32 %v4836_v17, %v2352_v37 }
 0x1f9   :  { %v2423_v38 = vadd.f32 %v4836_v17, %v2353_v15  ;;  %2546 = vst.msk [vmem:[%s5283_s4 + $0x1b0] sm:$0xff] %vm17_vm0, %v2482_v43  ;;  %2547 = vst.msk [vmem:[%s5283_s4 + $0x1b8] sm:$0xff] %vm17_vm0, %v2483_v9  ;;  %v2424_v41 = vadd.f32 %v4836_v17, %v2354_v2  ;;  %v2356_v48 = vmul.f32 %v4820_v30, %v4790_v4 }
 0x1fa   :  { %v2425_v31 = vadd.f32 %v4836_v17, %v2355_v22  ;;  %v2357_v16 = vmul.f32 %v4820_v30, %v4795_v19  ;;  %v2484_v62 = vmax.f32 %v2659_v12, %v2420_v20  ;;  %v2485_v29 = vmax.f32 %v5589_v54, %v2421_v56 }
 0x1fb   :  { %v2486_v8 = vmax.f32 %v5590_v45, %v2422_v7  ;;  %v2487_v35 = vmax.f32 %v5591_v51, %v2423_v38  ;;  %v2488_v28 = vmax.f32 %v4632_v27, %v2424_v41  ;;  %v2426_v21 = vadd.f32 %v4836_v17, %v2356_v48 }
 0x1fc   :  { %v2489_v40 = vmax.f32 %v4645_v46, %v2425_v31  ;;  %v2427_v18 = vadd.f32 %v4836_v17, %v2357_v16  ;;  %2548 = vst.msk [vmem:[%s5283_s4 + $0x1c0] sm:$0xff] %vm17_vm0, %v2484_v62  ;;  %2549 = vst.msk [vmem:[%s5283_s4 + $0x1c8] sm:$0xff] %vm17_vm0, %v2485_v29 }
 0x1fd   :  { %2550 = vst.msk [vmem:[%s5283_s4 + $0x1d0] sm:$0xff] %vm17_vm0, %v2486_v8  ;;  %2551 = vst.msk [vmem:[%s5283_s4 + $0x1d8] sm:$0xff] %vm17_vm0, %v2487_v35  ;;  %v2490_v27 = vmax.f32 %v4693_v1, %v2426_v21 }
 0x1fe   :  { %2552 = vst.msk [vmem:[%s5283_s4 + $0x1e0] sm:$0xff] %vm17_vm0, %v2488_v28  ;;  %2553 = vst.msk [vmem:[%s5283_s4 + $0x1e8] sm:$0xff] %vm17_vm0, %v2489_v40  ;;  %v2491_v46 = vmax.f32 %v4703_v52, %v2427_v18 }
 0x1ff   :  { %2554 = vst.msk [vmem:[%s5283_s4 + $0x1f0] sm:$0xff] %vm17_vm0, %v2490_v27 }
 0x200   :  { %2555 = vst.msk [vmem:[%s5283_s4 + $0x1f8] sm:$0xff] %vm17_vm0, %v2491_v46 }

</bundles_post_ra>
